<compile_context>
chip_gen: v7x
topology: tpu7x:2x2x1
jax: 0.10.0
libtpu: 0.0.40
codegen_flags: <defaults>
</compile_context>

<pallas_src>
import functools
import math

import jax
import jax.numpy as jnp
from jax.experimental import pallas as pl
from jax.experimental.pallas import tpu as pltpu

VMEM_LIMIT_BYTES = 48 * 1024 * 1024   # explicit scoped-VMEM limit, safe on v5e/v6e/v7x


def _round_up(x, m=128):
    return ((x + m - 1) // m) * m


# ----------------------------------------------------------------------------
# Kernel 1: fused dilated-conv stack (3 layers, folded BN + ReLU), per batch row.
# ----------------------------------------------------------------------------
def _conv_stack_kernel(x_ref, w1_ref, b1_ref, w2_ref, b2_ref, w3_ref, b3_ref,
                       o_ref, y1_ref, y2_ref, *, T):
    cmid = o_ref.shape[-1]                      # 512

    # Layer 1: Conv1d(ncoef, 512, 5, padding=2) + BN + ReLU.
    # x_ref already carries its 2-row zero time halo, so tap k reads rows [k, k+T).
    acc = jnp.zeros((T, cmid), jnp.float32)
    for k in range(5):
        acc = acc + jnp.dot(x_ref[k:k + T, :], w1_ref[k],
                            preferred_element_type=jnp.float32)
    y1 = jnp.maximum(acc + b1_ref[...], 0.0).astype(jnp.bfloat16)

    # Stage layer-1 output in VMEM scratch with a 2-row zero halo (= layer-2 padding).
    zeros2 = jnp.zeros((2, cmid), jnp.bfloat16)
    y1_ref[0:2, :] = zeros2
    y1_ref[T + 2:T + 4, :] = zeros2
    y1_ref[2:T + 2, :] = y1

    # Layer 2: Conv1d(512, 512, 3, dilation=2, padding=2) + BN + ReLU.
    acc = jnp.zeros((T, cmid), jnp.float32)
    for k in range(3):
        acc = acc + jnp.dot(y1_ref[2 * k:2 * k + T, :], w2_ref[k],
                            preferred_element_type=jnp.float32)
    y2 = jnp.maximum(acc + b2_ref[...], 0.0).astype(jnp.bfloat16)

    # Stage layer-2 output with a 3-row zero halo (= layer-3 padding).
    zeros3 = jnp.zeros((3, cmid), jnp.bfloat16)
    y2_ref[0:3, :] = zeros3
    y2_ref[T + 3:T + 6, :] = zeros3
    y2_ref[3:T + 3, :] = y2

    # Layer 3: Conv1d(512, 512, 3, dilation=3, padding=3) + BN + ReLU.
    acc = jnp.zeros((T, cmid), jnp.float32)
    for k in range(3):
        acc = acc + jnp.dot(y2_ref[3 * k:3 * k + T, :], w3_ref[k],
                            preferred_element_type=jnp.float32)
    o_ref[...] = jnp.maximum(acc + b3_ref[...], 0.0).astype(o_ref.dtype)


def conv_stack(x, dconv):
    """x: (B, T+4, Cin) bf16 (2-row halo included) -> (B, T, 512) bf16."""
    B, Tin, Cin = x.shape
    T = Tin - 4
    Cmid = dconv[0]["w"].shape[-1]
    kernel = functools.partial(_conv_stack_kernel, T=T)
    return pl.pallas_call(
        kernel,
        out_shape=jax.ShapeDtypeStruct((B, T, Cmid), jnp.bfloat16),
        grid=(B,),
        in_specs=[
            pl.BlockSpec((None, Tin, Cin), lambda b: (b, 0, 0)),
            pl.BlockSpec((5, Cin, Cmid), lambda b: (0, 0, 0)),
            pl.BlockSpec((1, Cmid), lambda b: (0, 0)),
            pl.BlockSpec((3, Cmid, Cmid), lambda b: (0, 0, 0)),
            pl.BlockSpec((1, Cmid), lambda b: (0, 0)),
            pl.BlockSpec((3, Cmid, Cmid), lambda b: (0, 0, 0)),
            pl.BlockSpec((1, Cmid), lambda b: (0, 0)),
        ],
        out_specs=pl.BlockSpec((None, T, Cmid), lambda b: (b, 0, 0)),
        scratch_shapes=[pltpu.VMEM((T + 4, Cmid), jnp.bfloat16),
                        pltpu.VMEM((T + 6, Cmid), jnp.bfloat16)],
        compiler_params=pltpu.CompilerParams(
            dimension_semantics=("parallel",),
            vmem_limit_bytes=VMEM_LIMIT_BYTES),
    )(x, dconv[0]["w"], dconv[0]["b"], dconv[1]["w"], dconv[1]["b"],
      dconv[2]["w"], dconv[2]["b"])


# ----------------------------------------------------------------------------
# Kernel 2: fused 1x1 convs + statistic pooling + post-pooling MLP.
# ----------------------------------------------------------------------------
def _pw_pool_mlp_kernel(x_ref, w4_ref, b4_ref, w5_ref, b5_ref,
                        w1_ref, b1_ref, w2_ref, b2_ref, w3_ref, b3_ref,
                        o_ref, sum_ref, sq_ref, *, T):
    t = pl.program_id(1)
    nt = pl.num_programs(1)

    @pl.when(t == 0)
    def _():
        sum_ref[...] = jnp.zeros_like(sum_ref)
        sq_ref[...] = jnp.zeros_like(sq_ref)

    # Fused 1x1 convs: (tile_t, 512) -> ReLU -> (tile_t, 1536) -> ReLU.
    h = jnp.dot(x_ref[...], w4_ref[...], preferred_element_type=jnp.float32) + b4_ref[...]
    h = jnp.maximum(h, 0.0).astype(jnp.bfloat16)
    y = jnp.dot(h, w5_ref[...], preferred_element_type=jnp.float32) + b5_ref[...]
    y = jnp.maximum(y, 0.0)                                         # (tile_t, 1536) f32

    # Statistic-pool accumulation: the (B, T, 1536) activation never leaves VMEM.
    sum_ref[...] += jnp.sum(y, axis=0, keepdims=True)
    sq_ref[...] += jnp.sum(y * y, axis=0, keepdims=True)

    @pl.when(t == nt - 1)
    def _():
        c_pool = sum_ref.shape[-1]
        mean = sum_ref[...] * (1.0 / T)
        var = (sq_ref[...] - T * mean * mean) * (1.0 / (T - 1))      # unbiased (torch default)
        # TODO(synk): PyTorch adds randn_like(x) * 1e-6 before std(); the TPU PRNG
        # primitive has no interpret-mode lowering, so it is replaced by a 1e-12
        # variance floor (identical effect to <=1e-6 noise on the forward pass).
        std = jnp.sqrt(jnp.maximum(var, 0.0) + 1e-12)

        # Post-pooling MLP on [mean || std]; split matmul avoids an explicit concat.
        h1 = (jnp.dot(mean.astype(jnp.bfloat16), w1_ref[0:c_pool, :],
                      preferred_element_type=jnp.float32)
              + jnp.dot(std.astype(jnp.bfloat16), w1_ref[c_pool:2 * c_pool, :],
                        preferred_element_type=jnp.float32)
              + b1_ref[...])
        h1 = jnp.maximum(h1, 0.0).astype(jnp.bfloat16)
        h2 = jnp.dot(h1, w2_ref[...], preferred_element_type=jnp.float32) + b2_ref[...]
        h2 = jnp.maximum(h2, 0.0).astype(jnp.bfloat16)
        o_ref[...] = (jnp.dot(h2, w3_ref[...], preferred_element_type=jnp.float32)
                      + b3_ref[...])


def _pick_tile_t(T):
    for cand in (512, 256, 128, 64, 32, 16, 8):
        if T % cand == 0:
            return cand
    return T   # odd T: whole-T block (equals the full dim, so still a legal block)


def pw_pool_mlp(x, pconv, mlp):
    """x: (B, T, 512) bf16 -> (B, c_out) f32 logits (padded classes)."""
    B, T, Cmid = x.shape
    Cpool = pconv[1]["w"].shape[-1]
    Chid = mlp[1]["w"].shape[-1]
    Cout = mlp[2]["w"].shape[-1]
    tile_t = _pick_tile_t(T)
    nt = T // tile_t
    kernel = functools.partial(_pw_pool_mlp_kernel, T=T)
    out = pl.pallas_call(
        kernel,
        out_shape=jax.ShapeDtypeStruct((B, 1, Cout), jnp.float32),
        grid=(B, nt),
        in_specs=[
            pl.BlockSpec((None, tile_t, Cmid), lambda b, t: (b, t, 0)),
            pl.BlockSpec((Cmid, Cmid), lambda b, t: (0, 0)),
            pl.BlockSpec((1, Cmid), lambda b, t: (0, 0)),
            pl.BlockSpec((Cmid, Cpool), lambda b, t: (0, 0)),
            pl.BlockSpec((1, Cpool), lambda b, t: (0, 0)),
            pl.BlockSpec((2 * Cpool, Chid), lambda b, t: (0, 0)),
            pl.BlockSpec((1, Chid), lambda b, t: (0, 0)),
            pl.BlockSpec((Chid, Chid), lambda b, t: (0, 0)),
            pl.BlockSpec((1, Chid), lambda b, t: (0, 0)),
            pl.BlockSpec((Chid, Cout), lambda b, t: (0, 0)),
            pl.BlockSpec((1, Cout), lambda b, t: (0, 0)),
        ],
        out_specs=pl.BlockSpec((None, 1, Cout), lambda b, t: (b, 0, 0)),
        scratch_shapes=[pltpu.VMEM((1, Cpool), jnp.float32),
                        pltpu.VMEM((1, Cpool), jnp.float32)],
        compiler_params=pltpu.CompilerParams(
            dimension_semantics=("parallel", "arbitrary"),
            vmem_limit_bytes=VMEM_LIMIT_BYTES),
    )(x, pconv[0]["w"], pconv[0]["b"], pconv[1]["w"], pconv[1]["b"],
      mlp[0]["w"], mlp[0]["b"], mlp[1]["w"], mlp[1]["b"], mlp[2]["w"], mlp[2]["b"])
    return out.reshape(B, Cout)


# ----------------------------------------------------------------------------
# Parameter construction (deterministic, synthetic, channel-padded)
# ----------------------------------------------------------------------------
def init_params(key, ncoef, n_classes, eps=1e-5):
    # TODO(synk): BatchNorm is applied in inference mode (running_mean=0, running_var=1,
    # gamma=1, beta=0) and folded into the preceding conv/linear weights; PyTorch's
    # train-mode batch statistics are not reproduced.
    c_in = _round_up(ncoef)          # 257 -> 384
    c_pool = _round_up(1500)         # 1500 -> 1536
    c_out = _round_up(n_classes)     # 1000 -> 1024
    bn_scale = 1.0 / math.sqrt(1.0 + eps)
    keys = iter(jax.random.split(key, 16))

    def w_pad(k_, shape_log, shape_pad, fan_in):
        w = jax.random.normal(k_, shape_log, jnp.float32) / math.sqrt(fan_in)
        return jnp.pad(w, [(0, p - l) for l, p in zip(shape_log, shape_pad)])

    def b_pad(k_, n_log, n_pad, fan_in):
        b = jax.random.uniform(k_, (n_log,), jnp.float32, -1.0, 1.0) / math.sqrt(fan_in)
        return jnp.pad(b, (0, n_pad - n_log)).reshape(1, n_pad)

    dconv = []
    for (cin_l, cin_p, cout_l, cout_p, ks) in [
        (ncoef, c_in, 512, 512, 5),   # Conv1d(ncoef, 512, 5, padding=2)
        (512, 512, 512, 512, 3),      # Conv1d(512, 512, 3, dilation=2, padding=2)
        (512, 512, 512, 512, 3),      # Conv1d(512, 512, 3, dilation=3, padding=3)
    ]:
        fan_in = cin_l * ks
        w = w_pad(next(keys), (ks, cin_l, cout_l), (ks, cin_p, cout_p), fan_in) * bn_scale
        b = b_pad(next(keys), cout_l, cout_p, fan_in) * bn_scale
        dconv.append({"w": w.astype(jnp.bfloat16), "b": b})

    pconv = []
    for (cin_l, cin_p, cout_l, cout_p) in [(512, 512, 512, 512),       # Conv1d(512, 512, 1)
                                           (512, 512, 1500, c_pool)]:  # Conv1d(512, 1500, 1)
        w = w_pad(next(keys), (cin_l, cout_l), (cin_p, cout_p), cin_l) * bn_scale
        b = b_pad(next(keys), cout_l, cout_p, cin_l) * bn_scale
        pconv.append({"w": w.astype(jnp.bfloat16), "b": b})

    # FC1 (3000 -> 512): rows [0:1500] act on the mean half, rows [c_pool:c_pool+1500]
    # on the std half; padded rows stay zero so padded stat-pool channels are inert.
    w_log = jax.random.normal(next(keys), (3000, 512), jnp.float32) / math.sqrt(3000.0)
    w1 = jnp.zeros((2 * c_pool, 512), jnp.float32)
    w1 = w1.at[:1500, :].set(w_log[:1500]).at[c_pool:c_pool + 1500, :].set(w_log[1500:])
    b1 = b_pad(next(keys), 512, 512, 3000)
    w2 = w_pad(next(keys), (512, 512), (512, 512), 512) * bn_scale
    b2 = b_pad(next(keys), 512, 512, 512) * bn_scale
    w3 = w_pad(next(keys), (512, n_classes), (512, c_out), 512)
    b3 = b_pad(next(keys), n_classes, c_out, 512)
    mlp = [{"w": (w1 * bn_scale).astype(jnp.bfloat16), "b": b1 * bn_scale},
           {"w": w2.astype(jnp.bfloat16), "b": b2},
           {"w": w3.astype(jnp.bfloat16), "b": b3}]

    return {"dconv": dconv, "pconv": pconv, "mlp": mlp,
            "c_in": c_in, "c_pool": c_pool, "c_out": c_out, "n_classes": n_classes}


# ----------------------------------------------------------------------------
# Forward pass (mirrors TDNN.forward)
# ----------------------------------------------------------------------------
def tdnn_forward(params, x, init_coef=0):
    # PyTorch: x[:, :, init_coef:, :].squeeze(1).transpose(-1, -2) -> Conv1d NCL.
    # We keep channels-last (B, T, ncoef); the transpose is folded into the layout.
    x = x[:, :, init_coef:, :]
    x = jnp.squeeze(x, axis=1)                                   # (B, T, ncoef)
    B, T, nc = x.shape
    c_in = params["c_in"]
    # Single small pad on the raw input: channels -> 128-aligned, 2-row time halo for conv1.
    x = jnp.pad(x, ((0, 0), (2, 2), (0, c_in - nc))).astype(jnp.bfloat16)
    x = conv_stack(x, params["dconv"])                           # (B, T, 512) bf16
    x = pw_pool_mlp(x, params["pconv"], params["mlp"])           # (B, 1024) f32
    return x[:, :params["n_classes"]]                            # drop padded classes


if __name__ == "__main__":
    ncoef, init_coef, n_classes = 257, 0, 1000
    B, T = 2, 8

    key = jax.random.PRNGKey(0)
    pkey, xkey = jax.random.split(key)

    params = init_params(pkey, ncoef, n_classes)
    # PyTorch-style input: (B, 1, T, ncoef) so that slice/squeeze/transpose feeds the
    # first Conv1d with ncoef channels and T time steps.
    x = jax.random.normal(xkey, (B, 1, T + init_coef, ncoef), jnp.float32)

    out = tdnn_forward(params, x, init_coef=init_coef)
    out = jax.block_until_ready(out)
    assert out.shape == (B, n_classes), out.shape
    assert bool(jnp.all(jnp.isfinite(out)))
    print("KERNEL_OK")
</pallas_src>

<mosaic_0001>
module attributes {stable_mosaic.version = 11 : i64} {
  func.func @_conv_stack_kernel(%arg0: i32, %arg1: memref<1x12x384xbf16, #tpu.memory_space<vmem>>, %arg2: memref<5x384x512xbf16, #tpu.memory_space<vmem>>, %arg3: memref<1x512xf32, #tpu.memory_space<vmem>>, %arg4: memref<3x512x512xbf16, #tpu.memory_space<vmem>>, %arg5: memref<1x512xf32, #tpu.memory_space<vmem>>, %arg6: memref<3x512x512xbf16, #tpu.memory_space<vmem>>, %arg7: memref<1x512xf32, #tpu.memory_space<vmem>>, %arg8: memref<1x8x512xbf16, #tpu.memory_space<vmem>>, %arg9: memref<12x512xbf16, #tpu.memory_space<vmem>>, %arg10: memref<14x512xbf16, #tpu.memory_space<vmem>>) attributes {dimension_semantics = [#tpu.dimension_semantics<parallel>], iteration_bounds = array<i64: 2>, scalar_prefetch = 0 : i64, scratch_operands = 2 : i64, tpu.core_type = #tpu.core_type<tc>, window_params = [{transform_indices = @transform_0, window_bounds = array<i64: 1, 12, 384>}, {pipeline_mode = #tpu.pipeline_mode<synchronous>, transform_indices = @transform_1, window_bounds = array<i64: 5, 384, 512>}, {pipeline_mode = #tpu.pipeline_mode<synchronous>, transform_indices = @transform_2, window_bounds = array<i64: 1, 512>}, {pipeline_mode = #tpu.pipeline_mode<synchronous>, transform_indices = @transform_3, window_bounds = array<i64: 3, 512, 512>}, {pipeline_mode = #tpu.pipeline_mode<synchronous>, transform_indices = @transform_4, window_bounds = array<i64: 1, 512>}, {pipeline_mode = #tpu.pipeline_mode<synchronous>, transform_indices = @transform_5, window_bounds = array<i64: 3, 512, 512>}, {pipeline_mode = #tpu.pipeline_mode<synchronous>, transform_indices = @transform_6, window_bounds = array<i64: 1, 512>}, {transform_indices = @transform_7, window_bounds = array<i64: 1, 8, 512>}]} {
    %cst = arith.constant 0.000000e+00 : f32
    %0 = vector.broadcast %cst : f32 to vector<8x512xf32>
    %c0 = arith.constant 0 : index
    %c0_0 = arith.constant 0 : index
    %c0_1 = arith.constant 0 : index
    %1 = vector.load %arg1[%c0, %c0_0, %c0_1] : memref<1x12x384xbf16, #tpu.memory_space<vmem>>, vector<1x8x384xbf16>
    %2 = vector.shape_cast %1 : vector<1x8x384xbf16> to vector<8x384xbf16>
    %c0_2 = arith.constant 0 : index
    %c0_3 = arith.constant 0 : index
    %c0_4 = arith.constant 0 : index
    %3 = vector.load %arg2[%c0_2, %c0_3, %c0_4] : memref<5x384x512xbf16, #tpu.memory_space<vmem>>, vector<1x384x512xbf16>
    %4 = vector.shape_cast %3 : vector<1x384x512xbf16> to vector<384x512xbf16>
    %cst_5 = arith.constant dense<0.000000e+00> : vector<8x512xf32>
    %5 = tpu.matmul %2, %4, %cst_5 {dimension_numbers = #tpu.dot_dimension_numbers<[1], [0], [0], [1], [0, 0, 1, 1], [], []>} : vector<8x384xbf16>, vector<384x512xbf16>, vector<8x512xf32> -> vector<8x512xf32>
    %6 = arith.addf %0, %5 : vector<8x512xf32>
    %c0_6 = arith.constant 0 : index
    %c1 = arith.constant 1 : index
    %c0_7 = arith.constant 0 : index
    %7 = vector.load %arg1[%c0_6, %c1, %c0_7] : memref<1x12x384xbf16, #tpu.memory_space<vmem>>, vector<1x8x384xbf16>
    %8 = vector.shape_cast %7 : vector<1x8x384xbf16> to vector<8x384xbf16>
    %c1_8 = arith.constant 1 : index
    %c0_9 = arith.constant 0 : index
    %c0_10 = arith.constant 0 : index
    %9 = vector.load %arg2[%c1_8, %c0_9, %c0_10] : memref<5x384x512xbf16, #tpu.memory_space<vmem>>, vector<1x384x512xbf16>
    %10 = vector.shape_cast %9 : vector<1x384x512xbf16> to vector<384x512xbf16>
    %cst_11 = arith.constant dense<0.000000e+00> : vector<8x512xf32>
    %11 = tpu.matmul %8, %10, %cst_11 {dimension_numbers = #tpu.dot_dimension_numbers<[1], [0], [0], [1], [0, 0, 1, 1], [], []>} : vector<8x384xbf16>, vector<384x512xbf16>, vector<8x512xf32> -> vector<8x512xf32>
    %12 = arith.addf %6, %11 : vector<8x512xf32>
    %c0_12 = arith.constant 0 : index
    %c2 = arith.constant 2 : index
    %c0_13 = arith.constant 0 : index
    %13 = vector.load %arg1[%c0_12, %c2, %c0_13] : memref<1x12x384xbf16, #tpu.memory_space<vmem>>, vector<1x8x384xbf16>
    %14 = vector.shape_cast %13 : vector<1x8x384xbf16> to vector<8x384xbf16>
    %c2_14 = arith.constant 2 : index
    %c0_15 = arith.constant 0 : index
    %c0_16 = arith.constant 0 : index
    %15 = vector.load %arg2[%c2_14, %c0_15, %c0_16] : memref<5x384x512xbf16, #tpu.memory_space<vmem>>, vector<1x384x512xbf16>
    %16 = vector.shape_cast %15 : vector<1x384x512xbf16> to vector<384x512xbf16>
    %cst_17 = arith.constant dense<0.000000e+00> : vector<8x512xf32>
    %17 = tpu.matmul %14, %16, %cst_17 {dimension_numbers = #tpu.dot_dimension_numbers<[1], [0], [0], [1], [0, 0, 1, 1], [], []>} : vector<8x384xbf16>, vector<384x512xbf16>, vector<8x512xf32> -> vector<8x512xf32>
    %18 = arith.addf %12, %17 : vector<8x512xf32>
    %c0_18 = arith.constant 0 : index
    %c3 = arith.constant 3 : index
    %c0_19 = arith.constant 0 : index
    %19 = vector.load %arg1[%c0_18, %c3, %c0_19] : memref<1x12x384xbf16, #tpu.memory_space<vmem>>, vector<1x8x384xbf16>
    %20 = vector.shape_cast %19 : vector<1x8x384xbf16> to vector<8x384xbf16>
    %c3_20 = arith.constant 3 : index
    %c0_21 = arith.constant 0 : index
    %c0_22 = arith.constant 0 : index
    %21 = vector.load %arg2[%c3_20, %c0_21, %c0_22] : memref<5x384x512xbf16, #tpu.memory_space<vmem>>, vector<1x384x512xbf16>
    %22 = vector.shape_cast %21 : vector<1x384x512xbf16> to vector<384x512xbf16>
    %cst_23 = arith.constant dense<0.000000e+00> : vector<8x512xf32>
    %23 = tpu.matmul %20, %22, %cst_23 {dimension_numbers = #tpu.dot_dimension_numbers<[1], [0], [0], [1], [0, 0, 1, 1], [], []>} : vector<8x384xbf16>, vector<384x512xbf16>, vector<8x512xf32> -> vector<8x512xf32>
    %24 = arith.addf %18, %23 : vector<8x512xf32>
    %c0_24 = arith.constant 0 : index
    %c4 = arith.constant 4 : index
    %c0_25 = arith.constant 0 : index
    %25 = vector.load %arg1[%c0_24, %c4, %c0_25] : memref<1x12x384xbf16, #tpu.memory_space<vmem>>, vector<1x8x384xbf16>
    %26 = vector.shape_cast %25 : vector<1x8x384xbf16> to vector<8x384xbf16>
    %c4_26 = arith.constant 4 : index
    %c0_27 = arith.constant 0 : index
    %c0_28 = arith.constant 0 : index
    %27 = vector.load %arg2[%c4_26, %c0_27, %c0_28] : memref<5x384x512xbf16, #tpu.memory_space<vmem>>, vector<1x384x512xbf16>
    %28 = vector.shape_cast %27 : vector<1x384x512xbf16> to vector<384x512xbf16>
    %cst_29 = arith.constant dense<0.000000e+00> : vector<8x512xf32>
    %29 = tpu.matmul %26, %28, %cst_29 {dimension_numbers = #tpu.dot_dimension_numbers<[1], [0], [0], [1], [0, 0, 1, 1], [], []>} : vector<8x384xbf16>, vector<384x512xbf16>, vector<8x512xf32> -> vector<8x512xf32>
    %30 = arith.addf %24, %29 : vector<8x512xf32>
    %c0_30 = arith.constant 0 : index
    %c0_31 = arith.constant 0 : index
    %31 = vector.load %arg3[%c0_30, %c0_31] : memref<1x512xf32, #tpu.memory_space<vmem>>, vector<1x512xf32>
    %32 = vector.broadcast %31 : vector<1x512xf32> to vector<8x512xf32>
    %33 = arith.addf %30, %32 : vector<8x512xf32>
    %cst_32 = arith.constant 0.000000e+00 : f32
    %34 = vector.broadcast %cst_32 : f32 to vector<8x512xf32>
    %35 = arith.maximumf %33, %34 : vector<8x512xf32>
    %36 = arith.truncf %35 : vector<8x512xf32> to vector<8x512xbf16>
    %cst_33 = arith.constant 0.000000e+00 : bf16
    %37 = vector.broadcast %cst_33 : bf16 to vector<2x512xbf16>
    %c0_34 = arith.constant 0 : index
    %c0_35 = arith.constant 0 : index
    %38 = vector.load %arg9[%c0_34, %c0_35] : memref<12x512xbf16, #tpu.memory_space<vmem>>, vector<2x512xbf16>
    tpu.vector_store %arg9[%c0_34, %c0_35], %37 {strides = array<i32>} : memref<12x512xbf16, #tpu.memory_space<vmem>>, vector<2x512xbf16>,
    %c10 = arith.constant 10 : index
    %c0_36 = arith.constant 0 : index
    %39 = vector.load %arg9[%c10, %c0_36] : memref<12x512xbf16, #tpu.memory_space<vmem>>, vector<2x512xbf16>
    tpu.vector_store %arg9[%c10, %c0_36], %37 {strides = array<i32>} : memref<12x512xbf16, #tpu.memory_space<vmem>>, vector<2x512xbf16>,
    %c2_37 = arith.constant 2 : index
    %c0_38 = arith.constant 0 : index
    %40 = vector.load %arg9[%c2_37, %c0_38] : memref<12x512xbf16, #tpu.memory_space<vmem>>, vector<8x512xbf16>
    tpu.vector_store %arg9[%c2_37, %c0_38], %36 {strides = array<i32>} : memref<12x512xbf16, #tpu.memory_space<vmem>>, vector<8x512xbf16>,
    %cst_39 = arith.constant 0.000000e+00 : f32
    %41 = vector.broadcast %cst_39 : f32 to vector<8x512xf32>
    %c0_40 = arith.constant 0 : index
    %c0_41 = arith.constant 0 : index
    %42 = vector.load %arg9[%c0_40, %c0_41] : memref<12x512xbf16, #tpu.memory_space<vmem>>, vector<8x512xbf16>
    %c0_42 = arith.constant 0 : index
    %c0_43 = arith.constant 0 : index
    %c0_44 = arith.constant 0 : index
    %43 = vector.load %arg4[%c0_42, %c0_43, %c0_44] : memref<3x512x512xbf16, #tpu.memory_space<vmem>>, vector<1x512x512xbf16>
    %44 = vector.shape_cast %43 : vector<1x512x512xbf16> to vector<512x512xbf16>
    %cst_45 = arith.constant dense<0.000000e+00> : vector<8x512xf32>
    %45 = tpu.matmul %42, %44, %cst_45 {dimension_numbers = #tpu.dot_dimension_numbers<[1], [0], [0], [1], [0, 0, 1, 1], [], []>} : vector<8x512xbf16>, vector<512x512xbf16>, vector<8x512xf32> -> vector<8x512xf32>
    %46 = arith.addf %41, %45 : vector<8x512xf32>
    %c2_46 = arith.constant 2 : index
    %c0_47 = arith.constant 0 : index
    %47 = vector.load %arg9[%c2_46, %c0_47] : memref<12x512xbf16, #tpu.memory_space<vmem>>, vector<8x512xbf16>
    %c1_48 = arith.constant 1 : index
    %c0_49 = arith.constant 0 : index
    %c0_50 = arith.constant 0 : index
    %48 = vector.load %arg4[%c1_48, %c0_49, %c0_50] : memref<3x512x512xbf16, #tpu.memory_space<vmem>>, vector<1x512x512xbf16>
    %49 = vector.shape_cast %48 : vector<1x512x512xbf16> to vector<512x512xbf16>
    %cst_51 = arith.constant dense<0.000000e+00> : vector<8x512xf32>
    %50 = tpu.matmul %47, %49, %cst_51 {dimension_numbers = #tpu.dot_dimension_numbers<[1], [0], [0], [1], [0, 0, 1, 1], [], []>} : vector<8x512xbf16>, vector<512x512xbf16>, vector<8x512xf32> -> vector<8x512xf32>
    %51 = arith.addf %46, %50 : vector<8x512xf32>
    %c4_52 = arith.constant 4 : index
    %c0_53 = arith.constant 0 : index
    %52 = vector.load %arg9[%c4_52, %c0_53] : memref<12x512xbf16, #tpu.memory_space<vmem>>, vector<8x512xbf16>
    %c2_54 = arith.constant 2 : index
    %c0_55 = arith.constant 0 : index
    %c0_56 = arith.constant 0 : index
    %53 = vector.load %arg4[%c2_54, %c0_55, %c0_56] : memref<3x512x512xbf16, #tpu.memory_space<vmem>>, vector<1x512x512xbf16>
    %54 = vector.shape_cast %53 : vector<1x512x512xbf16> to vector<512x512xbf16>
    %cst_57 = arith.constant dense<0.000000e+00> : vector<8x512xf32>
    %55 = tpu.matmul %52, %54, %cst_57 {dimension_numbers = #tpu.dot_dimension_numbers<[1], [0], [0], [1], [0, 0, 1, 1], [], []>} : vector<8x512xbf16>, vector<512x512xbf16>, vector<8x512xf32> -> vector<8x512xf32>
    %56 = arith.addf %51, %55 : vector<8x512xf32>
    %c0_58 = arith.constant 0 : index
    %c0_59 = arith.constant 0 : index
    %57 = vector.load %arg5[%c0_58, %c0_59] : memref<1x512xf32, #tpu.memory_space<vmem>>, vector<1x512xf32>
    %58 = vector.broadcast %57 : vector<1x512xf32> to vector<8x512xf32>
    %59 = arith.addf %56, %58 : vector<8x512xf32>
    %cst_60 = arith.constant 0.000000e+00 : f32
    %60 = vector.broadcast %cst_60 : f32 to vector<8x512xf32>
    %61 = arith.maximumf %59, %60 : vector<8x512xf32>
    %62 = arith.truncf %61 : vector<8x512xf32> to vector<8x512xbf16>
    %cst_61 = arith.constant 0.000000e+00 : bf16
    %63 = vector.broadcast %cst_61 : bf16 to vector<3x512xbf16>
    %c0_62 = arith.constant 0 : index
    %c0_63 = arith.constant 0 : index
    %64 = vector.load %arg10[%c0_62, %c0_63] : memref<14x512xbf16, #tpu.memory_space<vmem>>, vector<3x512xbf16>
    tpu.vector_store %arg10[%c0_62, %c0_63], %63 {strides = array<i32>} : memref<14x512xbf16, #tpu.memory_space<vmem>>, vector<3x512xbf16>,
    %c11 = arith.constant 11 : index
    %c0_64 = arith.constant 0 : index
    %65 = vector.load %arg10[%c11, %c0_64] : memref<14x512xbf16, #tpu.memory_space<vmem>>, vector<3x512xbf16>
    tpu.vector_store %arg10[%c11, %c0_64], %63 {strides = array<i32>} : memref<14x512xbf16, #tpu.memory_space<vmem>>, vector<3x512xbf16>,
    %c3_65 = arith.constant 3 : index
    %c0_66 = arith.constant 0 : index
    %66 = vector.load %arg10[%c3_65, %c0_66] : memref<14x512xbf16, #tpu.memory_space<vmem>>, vector<8x512xbf16>
    tpu.vector_store %arg10[%c3_65, %c0_66], %62 {strides = array<i32>} : memref<14x512xbf16, #tpu.memory_space<vmem>>, vector<8x512xbf16>,
    %cst_67 = arith.constant 0.000000e+00 : f32
    %67 = vector.broadcast %cst_67 : f32 to vector<8x512xf32>
    %c0_68 = arith.constant 0 : index
    %c0_69 = arith.constant 0 : index
    %68 = vector.load %arg10[%c0_68, %c0_69] : memref<14x512xbf16, #tpu.memory_space<vmem>>, vector<8x512xbf16>
    %c0_70 = arith.constant 0 : index
    %c0_71 = arith.constant 0 : index
    %c0_72 = arith.constant 0 : index
    %69 = vector.load %arg6[%c0_70, %c0_71, %c0_72] : memref<3x512x512xbf16, #tpu.memory_space<vmem>>, vector<1x512x512xbf16>
    %70 = vector.shape_cast %69 : vector<1x512x512xbf16> to vector<512x512xbf16>
    %cst_73 = arith.constant dense<0.000000e+00> : vector<8x512xf32>
    %71 = tpu.matmul %68, %70, %cst_73 {dimension_numbers = #tpu.dot_dimension_numbers<[1], [0], [0], [1], [0, 0, 1, 1], [], []>} : vector<8x512xbf16>, vector<512x512xbf16>, vector<8x512xf32> -> vector<8x512xf32>
    %72 = arith.addf %67, %71 : vector<8x512xf32>
    %c3_74 = arith.constant 3 : index
    %c0_75 = arith.constant 0 : index
    %73 = vector.load %arg10[%c3_74, %c0_75] : memref<14x512xbf16, #tpu.memory_space<vmem>>, vector<8x512xbf16>
    %c1_76 = arith.constant 1 : index
    %c0_77 = arith.constant 0 : index
    %c0_78 = arith.constant 0 : index
    %74 = vector.load %arg6[%c1_76, %c0_77, %c0_78] : memref<3x512x512xbf16, #tpu.memory_space<vmem>>, vector<1x512x512xbf16>
    %75 = vector.shape_cast %74 : vector<1x512x512xbf16> to vector<512x512xbf16>
    %cst_79 = arith.constant dense<0.000000e+00> : vector<8x512xf32>
    %76 = tpu.matmul %73, %75, %cst_79 {dimension_numbers = #tpu.dot_dimension_numbers<[1], [0], [0], [1], [0, 0, 1, 1], [], []>} : vector<8x512xbf16>, vector<512x512xbf16>, vector<8x512xf32> -> vector<8x512xf32>
    %77 = arith.addf %72, %76 : vector<8x512xf32>
    %c6 = arith.constant 6 : index
    %c0_80 = arith.constant 0 : index
    %78 = vector.load %arg10[%c6, %c0_80] : memref<14x512xbf16, #tpu.memory_space<vmem>>, vector<8x512xbf16>
    %c2_81 = arith.constant 2 : index
    %c0_82 = arith.constant 0 : index
    %c0_83 = arith.constant 0 : index
    %79 = vector.load %arg6[%c2_81, %c0_82, %c0_83] : memref<3x512x512xbf16, #tpu.memory_space<vmem>>, vector<1x512x512xbf16>
    %80 = vector.shape_cast %79 : vector<1x512x512xbf16> to vector<512x512xbf16>
    %cst_84 = arith.constant dense<0.000000e+00> : vector<8x512xf32>
    %81 = tpu.matmul %78, %80, %cst_84 {dimension_numbers = #tpu.dot_dimension_numbers<[1], [0], [0], [1], [0, 0, 1, 1], [], []>} : vector<8x512xbf16>, vector<512x512xbf16>, vector<8x512xf32> -> vector<8x512xf32>
    %82 = arith.addf %77, %81 : vector<8x512xf32>
    %c0_85 = arith.constant 0 : index
    %c0_86 = arith.constant 0 : index
    %83 = vector.load %arg7[%c0_85, %c0_86] : memref<1x512xf32, #tpu.memory_space<vmem>>, vector<1x512xf32>
    %84 = vector.broadcast %83 : vector<1x512xf32> to vector<8x512xf32>
    %85 = arith.addf %82, %84 : vector<8x512xf32>
    %cst_87 = arith.constant 0.000000e+00 : f32
    %86 = vector.broadcast %cst_87 : f32 to vector<8x512xf32>
    %87 = arith.maximumf %85, %86 : vector<8x512xf32>
    %88 = arith.truncf %87 : vector<8x512xf32> to vector<8x512xbf16>
    %c0_88 = arith.constant 0 : index
    %c0_89 = arith.constant 0 : index
    %c0_90 = arith.constant 0 : index
    %89 = vector.load %arg8[%c0_88, %c0_89, %c0_90] : memref<1x8x512xbf16, #tpu.memory_space<vmem>>, vector<1x8x512xbf16>
    %90 = vector.shape_cast %89 : vector<1x8x512xbf16> to vector<8x512xbf16>
    %91 = vector.shape_cast %88 : vector<8x512xbf16> to vector<1x8x512xbf16>
    tpu.vector_store %arg8[%c0_88, %c0_89, %c0_90], %91 {strides = array<i32>} : memref<1x8x512xbf16, #tpu.memory_space<vmem>>, vector<1x8x512xbf16>,
    return
  }
  func.func @transform_0(%arg0: i32) -> (i32, i32, i32) {
    %c0_i32 = arith.constant 0 : i32
    %c0_i32_0 = arith.constant 0 : i32
    %c0_i32_1 = arith.constant 0 : i32
    return %arg0, %c0_i32, %c0_i32_0 : i32, i32, i32
  }
  func.func @transform_1(%arg0: i32) -> (i32, i32, i32) {
    %c0_i32 = arith.constant 0 : i32
    %c0_i32_0 = arith.constant 0 : i32
    %c0_i32_1 = arith.constant 0 : i32
    %c0_i32_2 = arith.constant 0 : i32
    return %c0_i32, %c0_i32_0, %c0_i32_1 : i32, i32, i32
  }
  func.func @transform_2(%arg0: i32) -> (i32, i32) {
    %c0_i32 = arith.constant 0 : i32
    %c0_i32_0 = arith.constant 0 : i32
    %c0_i32_1 = arith.constant 0 : i32
    return %c0_i32, %c0_i32_0 : i32, i32
  }
  func.func @transform_3(%arg0: i32) -> (i32, i32, i32) {
    %c0_i32 = arith.constant 0 : i32
    %c0_i32_0 = arith.constant 0 : i32
    %c0_i32_1 = arith.constant 0 : i32
    %c0_i32_2 = arith.constant 0 : i32
    return %c0_i32, %c0_i32_0, %c0_i32_1 : i32, i32, i32
  }
  func.func @transform_4(%arg0: i32) -> (i32, i32) {
    %c0_i32 = arith.constant 0 : i32
    %c0_i32_0 = arith.constant 0 : i32
    %c0_i32_1 = arith.constant 0 : i32
    return %c0_i32, %c0_i32_0 : i32, i32
  }
  func.func @transform_5(%arg0: i32) -> (i32, i32, i32) {
    %c0_i32 = arith.constant 0 : i32
    %c0_i32_0 = arith.constant 0 : i32
    %c0_i32_1 = arith.constant 0 : i32
    %c0_i32_2 = arith.constant 0 : i32
    return %c0_i32, %c0_i32_0, %c0_i32_1 : i32, i32, i32
  }
  func.func @transform_6(%arg0: i32) -> (i32, i32) {
    %c0_i32 = arith.constant 0 : i32
    %c0_i32_0 = arith.constant 0 : i32
    %c0_i32_1 = arith.constant 0 : i32
    return %c0_i32, %c0_i32_0 : i32, i32
  }
  func.func @transform_7(%arg0: i32) -> (i32, i32, i32) {
    %c0_i32 = arith.constant 0 : i32
    %c0_i32_0 = arith.constant 0 : i32
    %c0_i32_1 = arith.constant 0 : i32
    return %arg0, %c0_i32, %c0_i32_0 : i32, i32, i32
  }
}

</mosaic_0001>

<bundles_post_ra>
// kernel: tpu_custom_call.1
= control target key start
LH: loop header
LB: loop body
LE: loop exit
PB: predicated region body
PF: predicated region fallthrough
CT: control target
= control target key end

     0   :  { %s14678_s0 = inlined_call_operand.vmem [shape: bf16[2,12,384], index: 0, kind: input, shape index: {}]   ;;  %s14679_s1 = inlined_call_operand.hbm [shape: bf16[5,384,512], index: 1, kind: input, shape index: {}]   ;;  %s14680_s2 = inlined_call_operand.hbm [shape: f32[1,512], index: 2, kind: input, shape index: {}]   ;;  %s14681_s3 = inlined_call_operand.hbm [shape: bf16[3,512,512], index: 3, kind: input, shape index: {}]   ;;  %s14682_s4 = inlined_call_operand.hbm [shape: f32[1,512], index: 4, kind: input, shape index: {}]   ;;  %s14683_s5 = inlined_call_operand.hbm [shape: bf16[3,512,512], index: 5, kind: input, shape index: {}]   ;;  %s14684_s6 = inlined_call_operand.hbm [shape: f32[1,512], index: 6, kind: input, shape index: {}]   ;;  %s14685_s7 = inlined_call_operand.hbm [shape: bf16[2,8,512], index: 7, kind: output, shape index: {}]  }
   0x1   :  { %14692 = sst [smem:[#allocation24_spill]] %s14680_s2 }
   0x2   :  { %14693 = sst [smem:[#allocation25_spill]] %s14682_s4 }
   0x3   :  { %12 = vsyncpa [#allocation5], 0 }
   0x4   :  { %13 = vsyncpa [#allocation8], 0 }
   0x5   :  { %14 = vsyncpa [#allocation11], 0 }
   0x6   :  { %15 = vsyncpa [#allocation14], 0 }
   0x7   :  { %16 = vsyncpa [#allocation6], 0 }
   0x8   :  { %18 = vsyncpa [#allocation6 + $0x1], 0  ;;  %s13968_s24 = smov 0   ;;  %s13970_s25 = smov 0  }
   0x9   :  { %s13972_s26 = smov 0   ;;  %s13974_s27 = smov 0  }
   0xa LB: > { %14694 = sst [smem:[#allocation21_spill]] %s13912_s26  ;;  %s13989_s28 = sadd.s32 4294967295, %s13916_s27   ;;  %s13916_s27 = sphi %s13974_s27, %s14721_s27   ;;  %s13912_s26 = sphi %s13972_s26, %s14723_s26   ;;  %s13908_s25 = sphi %s13970_s25, %s14725_s25   ;;  %s13904_s24 = sphi %s13968_s24, %s14724_s24  }
   0xb   : > { %s10319_s29 = sadd.s32 4294967294, %s13916_s27   ;;  %s13993_s30 = sadd.s32 1, %s13916_s27  }
   0xc   : > { %14695 = sst [smem:[#allocation22_spill]] %s13993_s30  ;;  %s183_s8 = sadd.s32 1, %s13912_s26 }
   0xd   : > { %s180_s9 = ssub.s32 %s13916_s27, %s13993_s30  ;;  %p193_p0 = scmp.ne.s32.totalorder %s13912_s26, %s13908_s25 }
   0xe   : > { %p181_p1 = scmp.eq.s32.totalorder %s180_s9, 0  ;;  %p194_p2 = scmp.eq.s32.totalorder %s13989_s28, 1 }
   0xf   : > { %p199_p3 = scmp.ne.s32.totalorder %s13908_s25, %s13904_s24  ;;  %p200_p4 = scmp.eq.s32.totalorder %s10319_s29, 1 }
  0x10   : > { %s14004_s10 = scalar_select %p181_p1, %s13912_s26, %s183_s8  }
  0x11   : > { %p14006_p5 = por %p194_p2, %p193_p0  ;;  %p14010_p6 = por %p200_p4, %p199_p3 }
  0x12   : > { %14696 = sst [smem:[#allocation23_spill]] %s14004_s10  ;;  %p10320_p7 = scmp.ge.s32.totalorder %s13916_s27, 1 }
  0x13   : > { %s14697_s11 = scalar_select %p14006_p5, 1, 0 }
  0x14   : > { %s14698_s12 = scalar_select %p14010_p6, 1, 0 }
  0x15   : > { %p207_p8 = scmp.lt.s32.totalorder %s13916_s27, 3  ;;  %p14686_p9 = scmp.eq.s32.totalorder %s13989_s28, 0 }
  0x16   : > { %s13918_s14 = smov [#allocation7]   ;;  %s13919_s16 = smov [#allocation10]  }
  0x17   : > { %p14017_p10 = pnand %p10320_p7, %p207_p8  ;;  %s233_s15 = sshll.u32 %s13918_s14, 4  ;;  %s234_s15 = int_to_ptr.vmem [resolvable:$true] %s233_s15 }
  0x18   : > { %s257_s17 = sshll.u32 %s13919_s16, 4  ;;  %s13920_s19 = smov [#allocation4]   ;;  %s14029_s17 = int_to_ptr.vmem [resolvable:$true] %s257_s17 }
  0x19   : > { %s14699_s13 = scalar_select %p14017_p10, 1, 0 }
  0x1a   : > { %p11669_p11 = pneg %p14017_p10  ;;  %s219_s20 = sshll.u32 %s13920_s19, 4  ;;  %s14031_s20 = int_to_ptr.vmem [resolvable:$true] %s219_s20 }
  0x1b   : > { %s14701_s2 = sld [smem:[#allocation24_spill]] }
  0x1c   : > { %p14025_p12 = pnand %p14686_p9, %p11669_p11 }
  0x1e   : > { %p14041_p0 = pneg %p14025_p12 }
  0x21   : > { %s13670_s23 = scalar_lea.hbm %s14701_s2, 64 }
  0x22   : > { %p13671_p13 = scmp.ne.s32.totalorder %s14701_s2, %s13670_s23  ;;  %p13677_p3 = scmp.lt.u32.totalorder %s13670_s23, %s14701_s2 }
  0x24   : > { %p13673_p1 = pnand %p14041_p0, %p13671_p13 }
  0x26   : > { %p13674_p2 = pneg %p13673_p1 }
  0x28   : > { %p13679_p4 = pnand %p13677_p3, %p13674_p2 }
  0x2a   : > { %13682 = shalt.err (!%p13679_p4)
}
  0x2b   : > { %s13683_s19 = scalar_lea.vmem %s234_s15, 64  ;;  %p13691_p9 = scmp.lt.s32.totalorder %s234_s15, %s234_s15 }
  0x2c   : > { %p13684_p7 = scmp.ne.s32.totalorder %s234_s15, %s13683_s19  ;;  %p13692_p6 = scmp.lt.s32.totalorder %s13683_s19, %s13683_s19 }
  0x2e   : > { %p13686_p8 = pnand %p13684_p7, %p14041_p0  ;;  %p13693_p5 = por %p13692_p6, %p13691_p9 }
  0x30   : > { %p13687_p11 = pneg %p13686_p8 }
  0x32   : > { %p13694_p10 = pnand %p13693_p5, %p13687_p11 }
  0x34   : > { %13697 = shalt.err (!%p13694_p10)
}
  0x35   : > { %11675 = dma.hbm_to_vmem [thread:$0]  (!%p14025_p12), %s14701_s2, 64, %s234_s15, [#allocation8]  }
  0x36   : > { %s14703_s4 = sld [smem:[#allocation25_spill]] }
  0x3c   : > { %s13698_s8 = scalar_lea.hbm %s14703_s4, 64 }
  0x3d   : > { %p13699_p13 = scmp.ne.s32.totalorder %s14703_s4, %s13698_s8  ;;  %p13705_p5 = scmp.lt.u32.totalorder %s13698_s8, %s14703_s4 }
  0x3f   : > { %p13701_p1 = pnand %p13699_p13, %p14041_p0 }
  0x41   : > { %p13702_p6 = pneg %p13701_p1 }
  0x43   : > { %p13707_p9 = pnand %p13705_p5, %p13702_p6 }
  0x45   : > { %13710 = shalt.err (!%p13707_p9)
}
  0x46   : > { %s13711_s15 = scalar_lea.vmem %s14029_s17, 64  ;;  %p13719_p4 = scmp.lt.s32.totalorder %s14029_s17, %s14029_s17 }
  0x47   : > { %p13712_p10 = scmp.ne.s32.totalorder %s14029_s17, %s13711_s15  ;;  %p13720_p7 = scmp.lt.s32.totalorder %s13711_s15, %s13711_s15 }
  0x49   : > { %p13714_p2 = pnand %p13712_p10, %p14041_p0  ;;  %p13721_p8 = por %p13720_p7, %p13719_p4 }
  0x4b   : > { %p13715_p3 = pneg %p13714_p2 }
  0x4d   : > { %p13722_p11 = pnand %p13721_p8, %p13715_p3 }
  0x4f   : > { %13725 = shalt.err (!%p13722_p11)
}
  0x50   : > { %11681 = dma.hbm_to_vmem [thread:$0]  (!%p14025_p12), %s14703_s4, 64, %s14029_s17, [#allocation11]  }
  0x51   : > { %s13726_s29 = scalar_lea.hbm %s14679_s1, 61440 }
  0x52   : > { %p13727_p13 = scmp.ne.s32.totalorder %s14679_s1, %s13726_s29  ;;  %p13733_p5 = scmp.lt.u32.totalorder %s13726_s29, %s14679_s1 }
  0x54   : > { %p13729_p1 = pnand %p13727_p13, %p14041_p0 }
  0x56   : > { %p13730_p6 = pneg %p13729_p1 }
  0x58   : > { %p13735_p9 = pnand %p13733_p5, %p13730_p6 }
  0x5a   : > { %13738 = shalt.err (!%p13735_p9)
}
  0x5b   : > { %s13739_s17 = scalar_lea.vmem %s14031_s20, 61440  ;;  %p13747_p4 = scmp.lt.s32.totalorder %s14031_s20, %s14031_s20 }
  0x5c   : > { %p13740_p10 = scmp.ne.s32.totalorder %s14031_s20, %s13739_s17  ;;  %p13748_p7 = scmp.lt.s32.totalorder %s13739_s17, %s13739_s17 }
  0x5e   : > { %p13742_p2 = pnand %p13740_p10, %p14041_p0  ;;  %p13749_p8 = por %p13748_p7, %p13747_p4 }
  0x60   : > { %p13743_p3 = pneg %p13742_p2 }
  0x62   : > { %p13750_p11 = pnand %p13749_p8, %p13743_p3 }
  0x64   : > { %13753 = shalt.err (!%p13750_p11)
}
  0x65   : > { %s13921_s15 = smov 256   ;;  %s13922_s10 = smov 16  }
  0x66   : > { %11672 = dma.hbm_to_vmem [thread:$0]  (!%p14025_p12), %s14679_s1, 61440, %s14031_s20, [#allocation5], %s13921_s15, %s13921_s15, %s13922_s10  }
  0x67   : > { %s13923_s23 = smov [#allocation9]   ;;  %s13924_s8 = smov [#allocation12]  }
  0x68   : > { %s243_s29 = sshll.u32 %s13923_s23, 4  ;;  %s267_s14 = sshll.u32 %s13924_s8, 4  ;;  %s244_s29 = int_to_ptr.vmem [resolvable:$true] %s243_s29  ;;  %s268_s14 = int_to_ptr.vmem [resolvable:$true] %s267_s14 }
  0x69   : > { %s13754_s17 = scalar_lea.hbm %s14681_s3, 49152 }
  0x6a   : > { %p13755_p13 = scmp.ne.s32.totalorder %s14681_s3, %s13754_s17  ;;  %p13761_p5 = scmp.lt.u32.totalorder %s13754_s17, %s14681_s3 }
  0x6c   : > { %p13757_p1 = pnand %p13755_p13, %p14041_p0 }
  0x6e   : > { %p13758_p6 = pneg %p13757_p1 }
  0x70   : > { %p13763_p9 = pnand %p13761_p5, %p13758_p6 }
  0x72   : > { %13766 = shalt.err (!%p13763_p9)
}
  0x73   : > { %s13767_s20 = scalar_lea.vmem %s244_s29, 49152  ;;  %p13775_p4 = scmp.lt.s32.totalorder %s244_s29, %s244_s29 }
  0x74   : > { %p13768_p10 = scmp.ne.s32.totalorder %s244_s29, %s13767_s20  ;;  %p13776_p7 = scmp.lt.s32.totalorder %s13767_s20, %s13767_s20 }
  0x76   : > { %p13770_p2 = pnand %p13768_p10, %p14041_p0  ;;  %p13777_p8 = por %p13776_p7, %p13775_p4 }
  0x78   : > { %p13771_p3 = pneg %p13770_p2 }
  0x7a   : > { %p13778_p11 = pnand %p13777_p8, %p13771_p3 }
  0x7c   : > { %13781 = shalt.err (!%p13778_p11)
}
  0x7d   : > { %11678 = dma.hbm_to_vmem [thread:$0]  (!%p14025_p12), %s14681_s3, 49152, %s244_s29, [#allocation8], %s13921_s15, %s13921_s15, %s13922_s10  }
  0x7e   : > { %s13782_s21 = scalar_lea.hbm %s14683_s5, 49152 }
  0x7f   : > { %p13783_p13 = scmp.ne.s32.totalorder %s14683_s5, %s13782_s21  ;;  %p13789_p5 = scmp.lt.u32.totalorder %s13782_s21, %s14683_s5 }
  0x81   : > { %p13785_p1 = pnand %p13783_p13, %p14041_p0 }
  0x83   : > { %p13786_p6 = pneg %p13785_p1 }
  0x85   : > { %p13791_p9 = pnand %p13789_p5, %p13786_p6 }
  0x87   : > { %13794 = shalt.err (!%p13791_p9)
}
  0x88   : > { %s13795_s19 = scalar_lea.vmem %s268_s14, 49152  ;;  %p13803_p4 = scmp.lt.s32.totalorder %s268_s14, %s268_s14 }
  0x89   : > { %p13796_p10 = scmp.ne.s32.totalorder %s268_s14, %s13795_s19  ;;  %p13804_p7 = scmp.lt.s32.totalorder %s13795_s19, %s13795_s19 }
  0x8b   : > { %p13798_p2 = pnand %p13796_p10, %p14041_p0  ;;  %p13805_p8 = por %p13804_p7, %p13803_p4 }
  0x8d   : > { %p13799_p3 = pneg %p13798_p2 }
  0x8f   : > { %p13806_p11 = pnand %p13805_p8, %p13799_p3 }
  0x91   : > { %13809 = shalt.err (!%p13806_p11)
}
  0x92   : > { %11684 = dma.hbm_to_vmem [thread:$0]  (!%p14025_p12), %s14683_s5, 49152, %s268_s14, [#allocation11], %s13921_s15, %s13921_s15, %s13922_s10  }
  0x93   : > { %s13925_s20 = smov [#allocation13]   ;;  %s13810_s30 = scalar_lea.hbm %s14684_s6, 64 }
  0x94   : > { %s281_s2 = sshll.u32 %s13925_s20, 4  ;;  %p13811_p13 = scmp.ne.s32.totalorder %s14684_s6, %s13810_s30  ;;  %s282_s2 = int_to_ptr.vmem [resolvable:$true] %s281_s2 }
  0x95   : > { %p13817_p5 = scmp.lt.u32.totalorder %s13810_s30, %s14684_s6 }
  0x96   : > { %p13813_p1 = pnand %p13811_p13, %p14041_p0 }
  0x98   : > { %p13814_p6 = pneg %p13813_p1 }
  0x9a   : > { %p13819_p9 = pnand %p13817_p5, %p13814_p6 }
  0x9c   : > { %13822 = shalt.err (!%p13819_p9)
}
  0x9d   : > { %s13823_s15 = scalar_lea.vmem %s282_s2, 64  ;;  %p13831_p4 = scmp.lt.s32.totalorder %s282_s2, %s282_s2 }
  0x9e   : > { %p13824_p10 = scmp.ne.s32.totalorder %s282_s2, %s13823_s15  ;;  %p13832_p7 = scmp.lt.s32.totalorder %s13823_s15, %s13823_s15 }
  0xa0   : > { %p13826_p2 = pnand %p13824_p10, %p14041_p0  ;;  %p13833_p8 = por %p13832_p7, %p13831_p4 }
  0xa2   : > { %p13827_p3 = pneg %p13826_p2 }
  0xa4   : > { %p13834_p11 = pnand %p13833_p8, %p13827_p3 }
  0xa6   : > { %13837 = shalt.err (!%p13834_p11)
}
  0xa7   : > { %11687 = dma.hbm_to_vmem [thread:$0]  (!%p14025_p12), %s14684_s6, 64, %s282_s2, [#allocation14]  }
  0xa8   : > { %p14704_p13 = scmp.ne.s32.totalorder %s14699_s13, 0 }
  0xa9   : > { %p14705_p1 = scmp.eq.s32.totalorder (!%p14704_p13), %s13989_s28, 0 }
  0xaa   : > { %302 = sbr.rel (%p14704_p13) target bundleno = 2033 (0x7f1), region = 48 }
  0xb1   : > { %13883 = dma.done.wait (%p14705_p1), [#allocation5], 61440   ;;  %p14706_p0 = pmov %p14705_p1 }
  0xb3   : > { %13885 = vsyncadd (%p14706_p0), [#allocation5], 4294905856  ;;  %p14707_p6 = pmov %p14706_p0 }
  0xb4   : > { %p14708_p5 = pmov %p14706_p0 }
  0xb5   : > { %13887 = dma.done.wait (%p14707_p6), [#allocation8], 49216  }
  0xb6   : > { %13889 = vsyncadd (%p14708_p5), [#allocation8], 4294918080  ;;  %p14709_p9 = pmov %p14706_p0 }
  0xb7   : > { %p14710_p12 = pmov %p14706_p0 }
  0xb8   : > { %13891 = dma.done.wait (%p14709_p9), [#allocation11], 49216  }
  0xb9   : > { %13893 = vsyncadd (%p14710_p12), [#allocation11], 4294918080  ;;  %p14711_p10 = pmov %p14706_p0 }
  0xba   : > { %p14712_p2 = pmov %p14706_p0 }
  0xbb   : > { %13895 = dma.done.wait (%p14711_p10), [#allocation14], 64  }
  0xbc   : > { %13897 = vsyncadd (%p14712_p2), [#allocation14], 4294967232  ;;  %v13926_v0 = vmov 0   ;;  %v11746_v1 = vld [vmem:[#allocation4 + $0x304] ss:$16 sps:$4 sm:$0xff]   ;;  %p354_p3 = scmp.lt.s32.totalorder %s13989_s28, 1 }
  0xbd   : > { %1147 = vmatprep.mubr.bf16.mxu1 %v13926_v0  ;;  %4226 = vst [vmem:[#allocation2] sm:$0x11] %v13926_v0  ;;  %4227 = vst [vmem:[#allocation2 + $0x8] sm:$0x11] %v13926_v0  ;;  %v11748_v2 = vld [vmem:[#allocation4 + $0x504] ss:$16 sps:$4 sm:$0xff]   ;;  %1074 = vmatprep.subr.bf16.mxu0 %v11746_v1 }
  0xbe   : > { %4228 = vst [vmem:[#allocation2 + $0x10] sm:$0x22] %v13926_v0  ;;  %4229 = vst [vmem:[#allocation2 + $0x18] sm:$0x22] %v13926_v0  ;;  %v11750_v3 = vld [vmem:[#allocation4 + $0x300] ss:$16 sps:$4 sm:$0xff]   ;;  %1115 = vmatprep.subr.bf16.mxu1 %v11748_v2 }
  0xbf   : > { %v11751_v4 = vld [vmem:[#allocation4 + $0x500] ss:$16 sps:$4 sm:$0xff]   ;;  %v11752_v5 = vld [vmem:[#allocation4 + $0x324] ss:$16 sps:$4 sm:$0xff]   ;;  %1075 = vmatpush1.bf16.msra.mxu0 %v11750_v3  ;;  %s355_s13 = scalar_select %p354_p3, %s13989_s28, 1  ;;  %vm7160_vm0 = vcmask 1041408  }
  0xc0   : > { %1116 = vmatpush1.bf16.msra.mxu1 %v11751_v4  ;;  %v11754_v6 = vld [vmem:[#allocation4 + $0x524] ss:$16 sps:$4 sm:$0xff]   ;;  %v11756_v7 = vld [vmem:[#allocation4 + $0x320] ss:$16 sps:$4 sm:$0xff]   ;;  %1076 = vmatprep.subr.bf16.mxu0 %v11752_v5  ;;  %v11799_v40 = vld [vmem:[#allocation4 + $0x30c] ss:$16 sps:$4 sm:$0xff]  }
  0xc1   : > { %v11757_v8 = vld [vmem:[#allocation4 + $0x520] ss:$16 sps:$4 sm:$0xff]   ;;  %1117 = vmatprep.subr.bf16.mxu1 %v11754_v6  ;;  %v11758_v9 = vld [vmem:[#allocation4 + $0x344] ss:$16 sps:$4 sm:$0xff]   ;;  %s11642_s18 = smul.u32 24, %s355_s13  ;;  %vm7163_vm2 = vcmask 1045508  }
  0xc2   : > { %v11760_v10 = vld [vmem:[#allocation4 + $0x544] ss:$16 sps:$4 sm:$0xff]   ;;  %v11762_v11 = vld [vmem:[#allocation4 + $0x340] ss:$16 sps:$4 sm:$0xff]   ;;  %v11797_v42 = vld [vmem:[#allocation4 + $0x308] ss:$16 sps:$4 sm:$0xff]  }
  0xc3   : > { %v11763_v12 = vld [vmem:[#allocation4 + $0x540] ss:$16 sps:$4 sm:$0xff]   ;;  %1077 = vmatpush1.bf16.msra.mxu0 %v11756_v7  ;;  %v11764_v13 = vld [vmem:[#allocation4 + $0x364] ss:$16 sps:$4 sm:$0xff]   ;;  %s14194_s19 = scalar_lea.vmem %s14678_s0, %s11642_s18  ;;  %v11805_v45 = vld [vmem:[#allocation4 + $0x32c] ss:$16 sps:$4 sm:$0xff]  }
  0xc4   : > { %1118 = vmatpush1.bf16.msra.mxu1 %v11757_v8  ;;  %1078 = vmatprep.subr.bf16.mxu0 %v11758_v9  ;;  %v11766_v14 = vld [vmem:[#allocation4 + $0x564] ss:$16 sps:$4 sm:$0xff]   ;;  %v11768_v15 = vld [vmem:[#allocation4 + $0x360] ss:$16 sps:$4 sm:$0xff]   ;;  %v14197_v27 = vld [vmem:[%s14194_s19 + $0x8] sm:$0xf] }
  0xc5   : > { %1119 = vmatprep.subr.bf16.mxu1 %v11760_v10  ;;  %v11769_v16 = vld [vmem:[#allocation4 + $0x560] ss:$16 sps:$4 sm:$0xff]   ;;  %v11770_v17 = vld [vmem:[#allocation4 + $0x384] ss:$16 sps:$4 sm:$0xff]   ;;  %v11803_v46 = vld [vmem:[#allocation4 + $0x328] ss:$16 sps:$4 sm:$0xff]  }
  0xc6   : > { %v11772_v18 = vld [vmem:[#allocation4 + $0x584] ss:$16 sps:$4 sm:$0xff]   ;;  %v11774_v19 = vld [vmem:[#allocation4 + $0x380] ss:$16 sps:$4 sm:$0xff]   ;;  %v11811_v49 = vld [vmem:[#allocation4 + $0x34c] ss:$16 sps:$4 sm:$0xff]  }
  0xc7   : > { %1079 = vmatpush1.bf16.msra.mxu0 %v11762_v11  ;;  %v11775_v20 = vld [vmem:[#allocation4 + $0x580] ss:$16 sps:$4 sm:$0xff]   ;;  %v11776_v21 = vld [vmem:[#allocation4 + $0x3a4] ss:$16 sps:$4 sm:$0xff]   ;;  %v11809_v50 = vld [vmem:[#allocation4 + $0x348] ss:$16 sps:$4 sm:$0xff]  }
  0xc8   : > { %1120 = vmatpush1.bf16.msra.mxu1 %v11763_v12  ;;  %1080 = vmatprep.subr.bf16.mxu0 %v11764_v13  ;;  %v11778_v22 = vld [vmem:[#allocation4 + $0x5a4] ss:$16 sps:$4 sm:$0xff]   ;;  %v11780_v23 = vld [vmem:[#allocation4 + $0x3a0] ss:$16 sps:$4 sm:$0xff]   ;;  %v11817_v53 = vld [vmem:[#allocation4 + $0x36c] ss:$16 sps:$4 sm:$0xff]  }
  0xc9   : > { %1121 = vmatprep.subr.bf16.mxu1 %v11766_v14  ;;  %v11781_v24 = vld [vmem:[#allocation4 + $0x5a0] ss:$16 sps:$4 sm:$0xff]   ;;  %v11782_v25 = vld [vmem:[#allocation4 + $0x3c4] ss:$16 sps:$4 sm:$0xff]   ;;  %v11815_v54 = vld [vmem:[#allocation4 + $0x368] ss:$16 sps:$4 sm:$0xff]  }
  0xca   : > { %v11784_v26 = vld [vmem:[#allocation4 + $0x5c4] ss:$16 sps:$4 sm:$0xff]   ;;  %v11786_v29 = vld [vmem:[#allocation4 + $0x3c0] ss:$16 sps:$4 sm:$0xff]   ;;  %v11823_v60 = vld [vmem:[#allocation4 + $0x38c] ss:$16 sps:$4 sm:$0xff]  }
  0xcb   : > { %1081 = vmatpush1.bf16.msra.mxu0 %v11768_v15  ;;  %v459_v28 = vld [vmem:[%s14194_s19 + $0x14] sm:$0x1]  ;;  %v11787_v31 = vld [vmem:[#allocation4 + $0x5c0] ss:$16 sps:$4 sm:$0xff]   ;;  %v11821_v63 = vld [vmem:[#allocation4 + $0x388] ss:$16 sps:$4 sm:$0xff]  }
  0xcc   : > { %1122 = vmatpush1.bf16.msra.mxu1 %v11769_v16  ;;  %1082 = vmatprep.subr.bf16.mxu0 %v11770_v17  ;;  %v10339_v30 = vcombine.low %v14197_v27, %v459_v28  ;;  %v11788_v32 = vld [vmem:[#allocation4 + $0x3e4] ss:$16 sps:$4 sm:$0xff]   ;;  %v11792_v35 = vld [vmem:[#allocation4 + $0x3e0] ss:$16 sps:$4 sm:$0xff]   ;;  %v11829_v4 = vld [vmem:[#allocation4 + $0x3ac] ss:$16 sps:$4 sm:$0xff]  }
  0xcd   : > { %1123 = vmatprep.subr.bf16.mxu1 %v11772_v18  ;;  %v11790_v33 = vld [vmem:[#allocation4 + $0x5e4] ss:$16 sps:$4 sm:$0xff]   ;;  %v11793_v38 = vld [vmem:[#allocation4 + $0x5e0] ss:$16 sps:$4 sm:$0xff]   ;;  %v11827_v6 = vld [vmem:[#allocation4 + $0x3a8] ss:$16 sps:$4 sm:$0xff]  }
  0xce   : > { %v587_v34 = vshll.u32 %v10339_v30, 16  ;;  %v585_v36 = vshrl.u32 %v10339_v30, 16  ;;  %v11794_v39 = vld [vmem:[#allocation4 + $0x404] ss:$16 sps:$4 sm:$0xff]   ;;  %v11800_v43 = vld [vmem:[#allocation4 + $0x400] ss:$16 sps:$4 sm:$0xff]  }
  0xcf   : > { %1083 = vmatpush1.bf16.msra.mxu0 %v11774_v19  ;;  %v11801_v44 = vld [vmem:[#allocation4 + $0x424] ss:$16 sps:$4 sm:$0xff]   ;;  %v11806_v47 = vld [vmem:[#allocation4 + $0x420] ss:$16 sps:$4 sm:$0xff]   ;;  %v11835_v10 = vld [vmem:[#allocation4 + $0x3cc] ss:$16 sps:$4 sm:$0xff]  }
  0xd0   : > { %1124 = vmatpush1.bf16.msra.mxu1 %v11775_v20  ;;  %1084 = vmatprep.subr.bf16.mxu0 %v11776_v21  ;;  %v589_v37 = vrot.slane %v587_v34, 1  ;;  %v11807_v48 = vld [vmem:[#allocation4 + $0x444] ss:$16 sps:$4 sm:$0xff]   ;;  %v11812_v51 = vld [vmem:[#allocation4 + $0x440] ss:$16 sps:$4 sm:$0xff]   ;;  %vm7173_vm5 = vcmask 1042433  }
  0xd1   : > { %1125 = vmatprep.subr.bf16.mxu1 %v11778_v22  ;;  %v11813_v52 = vld [vmem:[#allocation4 + $0x464] ss:$16 sps:$4 sm:$0xff]   ;;  %v11818_v55 = vld [vmem:[#allocation4 + $0x460] ss:$16 sps:$4 sm:$0xff]   ;;  %v11833_v11 = vld [vmem:[#allocation4 + $0x3c8] ss:$16 sps:$4 sm:$0xff]  }
  0xd2   : > { %v14201_v41 = vor.u32 %v589_v37, %v585_v36  ;;  %v14205_v56 = vld [vmem:[%s14194_s19] sm:$0xff]  ;;  %v458_v57 = vld [vmem:[%s14194_s19 + $0xc] sm:$0x11]  ;;  %v11839_v16 = vld [vmem:[#allocation4 + $0x3e8] ss:$16 sps:$4 sm:$0xff]   ;;  %vm7176_vm6 = vcmask 1046533  }
  0xd3   : > { %1085 = vmatpush1.bf16.msra.mxu0 %v11780_v23  ;;  %v11819_v58 = vld [vmem:[#allocation4 + $0x484] ss:$16 sps:$4 sm:$0xff]   ;;  %v10338_v59 = vcombine.high %v14205_v56, %v458_v57  ;;  %v11824_v1 = vld [vmem:[#allocation4 + $0x480] ss:$16 sps:$4 sm:$0xff]   ;;  %v10337_v7 = vcombine.low %v14205_v56, %v458_v57  ;;  %v11841_v15 = vld [vmem:[#allocation4 + $0x3ec] ss:$16 sps:$4 sm:$0xff]  }
  0xd4   : > { %1126 = vmatpush1.bf16.msra.mxu1 %v11781_v24  ;;  %1086 = vmatprep.subr.bf16.mxu0 %v11782_v25  ;;  %v11825_v2 = vld [vmem:[#allocation4 + $0x4a4] ss:$16 sps:$4 sm:$0xff]   ;;  %v11830_v8 = vld [vmem:[#allocation4 + $0x4a0] ss:$16 sps:$4 sm:$0xff]   ;;  %v11847_v20 = vld [vmem:[#allocation4 + $0x40c] ss:$16 sps:$4 sm:$0xff]  }
  0xd5   : > { %1127 = vmatprep.subr.bf16.mxu1 %v11784_v26  ;;  %v578_v61 = vshrl.u32 %v10338_v59, 16  ;;  %v580_v62 = vshll.u32 %v10338_v59, 16  ;;  %v11831_v9 = vld [vmem:[#allocation4 + $0x4c4] ss:$16 sps:$4 sm:$0xff]   ;;  %v573_v12 = vshll.u32 %v10337_v7, 16  ;;  %v571_v17 = vshrl.u32 %v10337_v7, 16 }
  0xd6   : > { %v11836_v13 = vld [vmem:[#allocation4 + $0x4c0] ss:$16 sps:$4 sm:$0xff]   ;;  %v11837_v14 = vld [vmem:[#allocation4 + $0x4e4] ss:$16 sps:$4 sm:$0xff]   ;;  %v11850_v21 = vld [vmem:[#allocation4 + $0x50c] ss:$16 sps:$4 sm:$0xff]  }
  0xd7   : > { %1087 = vmatpush1.bf16.msra.mxu0 %v11786_v29  ;;  %v582_v3 = vrot.slane %v580_v62, 1  ;;  %v575_v18 = vrot.slane %v573_v12, 1  ;;  %v11842_v19 = vld [vmem:[#allocation4 + $0x4e0] ss:$16 sps:$4 sm:$0xff]   ;;  %v11845_v23 = vld [vmem:[#allocation4 + $0x408] ss:$16 sps:$4 sm:$0xff]   ;;  %v14216_v62 = vcombine.high %v14205_v56, %v14205_v56 }
  0xd8   : > { %1128 = vmatpush1.bf16.msra.mxu1 %v11787_v31  ;;  %1088 = vmatprep.subr.bf16.mxu0 %v11788_v32  ;;  %v11848_v24 = vld [vmem:[#allocation4 + $0x508] ss:$16 sps:$4 sm:$0xff]   ;;  %v11853_v25 = vld [vmem:[#allocation4 + $0x42c] ss:$16 sps:$4 sm:$0xff]   ;;  %v11898_v57 = vld [vmem:[#allocation4 + $0x204] ss:$16 sps:$4 sm:$0xff]  }
  0xd9   : > { %1129 = vmatprep.subr.bf16.mxu1 %v11790_v33  ;;  %v583_v5 = vor.u32 %v582_v3, %v578_v61  ;;  %v14210_v22 = vor.u32 %v575_v18, %v571_v17  ;;  %v11856_v26 = vld [vmem:[#allocation4 + $0x52c] ss:$16 sps:$4 sm:$0xff]   ;;  %v11851_v28 = vld [vmem:[#allocation4 + $0x428] ss:$16 sps:$4 sm:$0xff]   ;;  %v11896_v59 = vld [vmem:[#allocation4 + $0x200] ss:$16 sps:$4 sm:$0xff]  }
  0xda   : > { %v11854_v29 = vld [vmem:[#allocation4 + $0x528] ss:$16 sps:$4 sm:$0xff]   ;;  %v11859_v30 = vld [vmem:[#allocation4 + $0x44c] ss:$16 sps:$4 sm:$0xff]   ;;  %v11904_v61 = vld [vmem:[#allocation4 + $0x224] ss:$16 sps:$4 sm:$0xff]  }
  0xdb   : > { %1089 = vmatpush1.bf16.msra.mxu0 %v11792_v35  ;;  %1106 = vmatprep.mubr.bf16.mxu0 %v583_v5  ;;  %v11862_v31 = vld [vmem:[#allocation4 + $0x54c] ss:$16 sps:$4 sm:$0xff]   ;;  %v11857_v32 = vld [vmem:[#allocation4 + $0x448] ss:$16 sps:$4 sm:$0xff]   ;;  %v11910_v3 = vld [vmem:[#allocation4 + $0x244] ss:$16 sps:$4 sm:$0xff]  }
  0xdc   : > { %1130 = vmatpush1.bf16.msra.mxu1 %v11793_v38  ;;  %1090 = vmatprep.subr.bf16.mxu0 %v11794_v39  ;;  %v11860_v33 = vld [vmem:[#allocation4 + $0x548] ss:$16 sps:$4 sm:$0xff]   ;;  %v11865_v34 = vld [vmem:[#allocation4 + $0x46c] ss:$16 sps:$4 sm:$0xff]   ;;  %v11911_v7 = vld [vmem:[#allocation4 + $0x60] ss:$16 sps:$4 sm:$0xff]  }
  0xdd   : > { %1156 = vmatprep.subr.bf16.mxu1 %v11799_v40  ;;  %v11868_v35 = vld [vmem:[#allocation4 + $0x56c] ss:$16 sps:$4 sm:$0xff]   ;;  %v11863_v36 = vld [vmem:[#allocation4 + $0x468] ss:$16 sps:$4 sm:$0xff]   ;;  %v11920_v12 = vld [vmem:[#allocation4 + $0x280] ss:$16 sps:$4 sm:$0xff]  }
  0xde   : > { %v11866_v37 = vld [vmem:[#allocation4 + $0x568] ss:$16 sps:$4 sm:$0xff]   ;;  %v11871_v38 = vld [vmem:[#allocation4 + $0x48c] ss:$16 sps:$4 sm:$0xff]   ;;  %v11931_v17 = vld [vmem:[#allocation4 + $0xc4] ss:$16 sps:$4 sm:$0xff]  }
  0xdf   : > { %1148 = vmatmul.mubr.bf16.vlgmr.msra.gmra.mrb[0].mxu1 %v14201_v41  ;;  %1091 = vmatpush1.bf16.msra.mxu0 %v11800_v43  ;;  %v11874_v39 = vld [vmem:[#allocation4 + $0x58c] ss:$16 sps:$4 sm:$0xff]   ;;  %v11869_v40 = vld [vmem:[#allocation4 + $0x488] ss:$16 sps:$4 sm:$0xff]   ;;  %v11934_v18 = vld [vmem:[#allocation4 + $0x2c4] ss:$16 sps:$4 sm:$0xff]  }
  0xe0   : > { %1157 = vmatpush1.bf16.msra.mxu1 %v11797_v42  ;;  %1092 = vmatprep.subr.bf16.mxu0 %v11801_v44  ;;  %v11872_v42 = vld [vmem:[#allocation4 + $0x588] ss:$16 sps:$4 sm:$0xff]   ;;  %v11877_v43 = vld [vmem:[#allocation4 + $0x4ac] ss:$16 sps:$4 sm:$0xff]   ;;  %vm7161_vm1 = vsmask.f32 1280 }
  0xe1   : > { %1158 = vmatprep.subr.bf16.mxu1 %v11805_v45  ;;  %1188 = vmatprep.mubr.bf16.mxu1 %v583_v5  ;;  %v11880_v44 = vld [vmem:[#allocation4 + $0x5ac] ss:$16 sps:$4 sm:$0xff]   ;;  %v11875_v45 = vld [vmem:[#allocation4 + $0x4a8] ss:$16 sps:$4 sm:$0xff]   ;;  %v11908_v5 = vld [vmem:[#allocation4 + $0x240] ss:$16 sps:$4 sm:$0xff]  }
  0xe2   : > { %vm7164_vm3 = vsmask.f32 5376  ;;  %vm7162_vm4 = vmand %vm7160_vm0, %vm7161_vm1  ;;  %vm7174_vm8 = vsmask.f32 7942  ;;  %vm7177_vm9 = vsmask.f32 7958 }
  0xe3   : > { %1093 = vmatpush1.bf16.msra.mxu0 %v11806_v47  ;;  %v11883_v47 = vld [vmem:[#allocation4 + $0x4cc] ss:$16 sps:$4 sm:$0xff]   ;;  %vm7165_vm7 = vmand %vm7163_vm2, %vm7164_vm3  ;;  %vm7218_vm14 = vcmask 1043457   ;;  %vm7220_vm15 = vcmask 1047557   ;;  %s351_s29 = sand.u32 1, %s13908_s25   ;;  %s11641_s2 = sshll.u32 %s13989_s28, 8 }
  0xe4   : > { %1159 = vmatpush1.bf16.msra.mxu1 %v11803_v46  ;;  %1094 = vmatprep.subr.bf16.mxu0 %v11807_v48  ;;  %v11878_v46 = vld [vmem:[#allocation4 + $0x5a8] ss:$16 sps:$4 sm:$0xff]   ;;  %v11886_v48 = vld [vmem:[#allocation4 + $0x5cc] ss:$16 sps:$4 sm:$0xff]   ;;  %vm14482_vm10 = vmor %vm7165_vm7, %vm7162_vm4  ;;  %s10335_s17 = sshll.u32 %s351_s29, 4  ;;  %s14634_s21 = scalar_lea.hbm %s14685_s7, %s11641_s2 }
  0xe5   : > { %1160 = vmatprep.subr.bf16.mxu1 %v11811_v49  ;;  %v11881_v49 = vld [vmem:[#allocation4 + $0x4c8] ss:$16 sps:$4 sm:$0xff]   ;;  %vm7175_vm11 = vmand %vm7173_vm5, %vm7174_vm8  ;;  %s353_s20 = scalar_lea.vmem [#allocation15], %s10335_s17  ;;  %s10186_s22 = scalar_lea.sflag [#allocation6], %s351_s29 }
  0xe6   : > { %vm7178_vm12 = vmand %vm7176_vm6, %vm7177_vm9  ;;  %s10200_s4 = sshll.u32 %s353_s20, 4  ;;  %p14719_p7 = scmp.ne.s32.totalorder %s14697_s11, 0  ;;  %s14636_s4 = int_to_ptr.vmem [resolvable:$true] %s10200_s4 }
  0xe7   : > { %1095 = vmatpush1.bf16.msra.mxu0 %v11812_v51  ;;  %v11889_v51 = vld [vmem:[#allocation4 + $0x4ec] ss:$16 sps:$4 sm:$0xff]   ;;  %vm7179_vm13 = vmor %vm7178_vm12, %vm7175_vm11  ;;  %s13838_s23 = scalar_lea.vmem %s14636_s4, 256  ;;  %s13927_s28 = smov [#allocation15]  }
  0xe8   : > { %1161 = vmatpush1.bf16.msra.mxu1 %v11809_v50  ;;  %1096 = vmatprep.subr.bf16.mxu0 %v11813_v52  ;;  %v11884_v50 = vld [vmem:[#allocation4 + $0x5c8] ss:$16 sps:$4 sm:$0xff]   ;;  %v11892_v52 = vld [vmem:[#allocation4 + $0x5ec] ss:$16 sps:$4 sm:$0xff]   ;;  %vm14494_vm0 = vmand %vm7218_vm14, %vm7174_vm8  ;;  %p13839_p4 = scmp.ne.s32.totalorder %s14636_s4, %s13838_s23  ;;  %s13842_s8 = sshll.u32 %s13927_s28, 4  ;;  %s13843_s8 = int_to_ptr.vmem [resolvable:$false] %s13842_s8 }
  0xe9   : > { %1162 = vmatprep.subr.bf16.mxu1 %v11817_v53  ;;  %v11887_v53 = vld [vmem:[#allocation4 + $0x4e8] ss:$16 sps:$4 sm:$0xff]   ;;  %vm14499_vm1 = vmand %vm7220_vm15, %vm7177_vm9  ;;  %s13844_s15 = scalar_lea.vmem %s13843_s8, 512  ;;  %p13845_p13 = scmp.lt.s32.totalorder %s14636_s4, %s13843_s8 }
  0xea   : > { %vm7222_vm2 = vmor %vm14499_vm1, %vm14494_vm0  ;;  %p13840_p8 = pnand %p13839_p4, %p14719_p7  ;;  %p13846_p1 = scmp.lt.s32.totalorder %s13844_s15, %s13838_s23 }
  0xeb   : > { %1097 = vmatpush1.bf16.msra.mxu0 %v11818_v55  ;;  %v11895_v55 = vld [vmem:[#allocation4 + $0x4] ss:$16 sps:$4 sm:$0xff]  }
  0xec   : > { %1163 = vmatpush1.bf16.msra.mxu1 %v11815_v54  ;;  %1098 = vmatprep.subr.bf16.mxu0 %v11819_v58  ;;  %v11890_v54 = vld [vmem:[#allocation4 + $0x5e8] ss:$16 sps:$4 sm:$0xff]   ;;  %v11893_v58 = vld [vmem:[#allocation4] ss:$16 sps:$4 sm:$0xff]   ;;  %p13841_p11 = pneg %p13840_p8  ;;  %p13847_p0 = por %p13846_p1, %p13845_p13 }
  0xed   : > { %1164 = vmatprep.subr.bf16.mxu1 %v11823_v60  ;;  %v11901_v60 = vld [vmem:[#allocation4 + $0x24] ss:$16 sps:$4 sm:$0xff]  }
  0xee   : > { %p13848_p6 = pnand %p13847_p0, %p13841_p11 }
  0xef   : > { %1099 = vmatpush1.bf16.msra.mxu0 %v11824_v1  ;;  %v11902_v1 = vld [vmem:[#allocation4 + $0x220] ss:$16 sps:$4 sm:$0xff]  }
  0xf0   : > { %1165 = vmatpush1.bf16.msra.mxu1 %v11821_v63  ;;  %1100 = vmatprep.subr.bf16.mxu0 %v11825_v2  ;;  %v11899_v63 = vld [vmem:[#allocation4 + $0x20] ss:$16 sps:$4 sm:$0xff]   ;;  %v11907_v2 = vld [vmem:[#allocation4 + $0x44] ss:$16 sps:$4 sm:$0xff]  }
  0xf1   : > { %1166 = vmatprep.subr.bf16.mxu1 %v11829_v4  ;;  %v11905_v4 = vld [vmem:[#allocation4 + $0x40] ss:$16 sps:$4 sm:$0xff]  }
  0xf3   : > { %1101 = vmatpush1.bf16.msra.mxu0 %v11830_v8  ;;  %v11914_v8 = vld [vmem:[#allocation4 + $0x260] ss:$16 sps:$4 sm:$0xff]  }
  0xf4   : > { %1167 = vmatpush1.bf16.msra.mxu1 %v11827_v6  ;;  %1102 = vmatprep.subr.bf16.mxu0 %v11831_v9  ;;  %v11913_v6 = vld [vmem:[#allocation4 + $0x64] ss:$16 sps:$4 sm:$0xff]  }
  0xf5   : > { %1168 = vmatprep.subr.bf16.mxu1 %v11835_v10  ;;  %v11919_v9 = vld [vmem:[#allocation4 + $0x84] ss:$16 sps:$4 sm:$0xff]  }
  0xf6   : > { %v11922_v10 = vld [vmem:[#allocation4 + $0x284] ss:$16 sps:$4 sm:$0xff]  }
  0xf7   : > { %1103 = vmatpush1.bf16.msra.mxu0 %v11836_v13  ;;  %v11925_v13 = vld [vmem:[#allocation4 + $0xa4] ss:$16 sps:$4 sm:$0xff]  }
  0xf8   : > { %1169 = vmatpush1.bf16.msra.mxu1 %v11833_v11  ;;  %1104 = vmatprep.subr.bf16.mxu0 %v11837_v14  ;;  %v11917_v11 = vld [vmem:[#allocation4 + $0x80] ss:$16 sps:$4 sm:$0xff]   ;;  %v11928_v14 = vld [vmem:[#allocation4 + $0x2a4] ss:$16 sps:$4 sm:$0xff]  }
  0xf9   : > { %1170 = vmatprep.subr.bf16.mxu1 %v11841_v15  ;;  %v11923_v15 = vld [vmem:[#allocation4 + $0xa0] ss:$16 sps:$4 sm:$0xff]  }
  0xfb   : > { %1105 = vmatpush1.bf16.msra.mxu0 %v11842_v19  ;;  %v11929_v19 = vld [vmem:[#allocation4 + $0xc0] ss:$16 sps:$4 sm:$0xff]  }
  0xfc   : > { %1171 = vmatpush1.bf16.msra.mxu1 %v11839_v16  ;;  %1197 = vmatprep.subr.bf16.mxu0 %v11850_v21  ;;  %v11926_v16 = vld [vmem:[#allocation4 + $0x2a0] ss:$16 sps:$4 sm:$0xff]   ;;  %v11937_v21 = vld [vmem:[#allocation4 + $0xe4] ss:$16 sps:$4 sm:$0xff]  }
  0xfd   : > { %1172 = vmatprep.subr.bf16.mxu1 %v11847_v20  ;;  %v11932_v20 = vld [vmem:[#allocation4 + $0x2c0] ss:$16 sps:$4 sm:$0xff]  }
  0xfe   : > { %1107 = vmatmul.mubr.bf16.vlgmr.msra.gmra.mrb[0].mxu0 %v14210_v22 }
  0xff   : > { %1198 = vmatpush1.bf16.msra.mxu0 %v11848_v24  ;;  %1229 = vmatprep.mubr.bf16.mxu0 %v13926_v0  ;;  %v11938_v24 = vld [vmem:[#allocation4 + $0x2e0] ss:$16 sps:$4 sm:$0xff]  }
 0x100   : > { %1173 = vmatpush1.bf16.msra.mxu1 %v11845_v23  ;;  %1199 = vmatprep.subr.bf16.mxu0 %v11856_v26  ;;  %v11935_v23 = vld [vmem:[#allocation4 + $0xe0] ss:$16 sps:$4 sm:$0xff]   ;;  %v11947_v26 = vld [vmem:[#allocation4 + $0xc] ss:$16 sps:$4 sm:$0xff]  }
 0x101   : > { %1174 = vmatprep.subr.bf16.mxu1 %v11853_v25  ;;  %v11943_v25 = vld [vmem:[#allocation4 + $0x104] ss:$16 sps:$4 sm:$0xff]  }
 0x103   : > { %1200 = vmatpush1.bf16.msra.mxu0 %v11854_v29  ;;  %v14224_v29 = vcombine.low %v14197_v27, %v14197_v27  ;;  %v11954_v27 = vld [vmem:[#allocation4 + $0x140] ss:$16 sps:$4 sm:$0xff]  }
 0x104   : > { %1175 = vmatpush1.bf16.msra.mxu1 %v11851_v28  ;;  %1201 = vmatprep.subr.bf16.mxu0 %v11862_v31  ;;  %v11941_v28 = vld [vmem:[#allocation4 + $0x100] ss:$16 sps:$4 sm:$0xff]   ;;  %v11950_v31 = vld [vmem:[#allocation4 + $0x124] ss:$16 sps:$4 sm:$0xff]  }
 0x105   : > { %1176 = vmatprep.subr.bf16.mxu1 %v11859_v30  ;;  %v11945_v30 = vld [vmem:[#allocation4 + $0x8] ss:$16 sps:$4 sm:$0xff]  }
 0x107   : > { %1202 = vmatpush1.bf16.msra.mxu0 %v11860_v33  ;;  %v11948_v33 = vld [vmem:[#allocation4 + $0x120] ss:$16 sps:$4 sm:$0xff]  }
 0x108   : > { %1177 = vmatpush1.bf16.msra.mxu1 %v11857_v32  ;;  %1203 = vmatprep.subr.bf16.mxu0 %v11868_v35  ;;  %v11953_v32 = vld [vmem:[#allocation4 + $0x2c] ss:$16 sps:$4 sm:$0xff]   ;;  %v11956_v35 = vld [vmem:[#allocation4 + $0x144] ss:$16 sps:$4 sm:$0xff]  }
 0x109   : > { %1178 = vmatprep.subr.bf16.mxu1 %v11865_v34  ;;  %v11951_v34 = vld [vmem:[#allocation4 + $0x28] ss:$16 sps:$4 sm:$0xff]  }
 0x10b   : > { %1204 = vmatpush1.bf16.msra.mxu0 %v11866_v37  ;;  %v11957_v37 = vld [vmem:[#allocation4 + $0x48] ss:$16 sps:$4 sm:$0xff]  }
 0x10c   : > { %1179 = vmatpush1.bf16.msra.mxu1 %v11863_v36  ;;  %1205 = vmatprep.subr.bf16.mxu0 %v11874_v39  ;;  %v11959_v36 = vld [vmem:[#allocation4 + $0x4c] ss:$16 sps:$4 sm:$0xff]  }
 0x10d   : > { %1180 = vmatprep.subr.bf16.mxu1 %v11871_v38  ;;  %v11962_v38 = vld [vmem:[#allocation4 + $0x164] ss:$16 sps:$4 sm:$0xff]   ;;  %v11965_v39 = vld [vmem:[#allocation4 + $0x6c] ss:$16 sps:$4 sm:$0xff]  }
 0x10f   : > { %1206 = vmatpush1.bf16.msra.mxu0 %v11872_v42  ;;  %v11963_v42 = vld [vmem:[#allocation4 + $0x68] ss:$16 sps:$4 sm:$0xff]  }
 0x110   : > { %1181 = vmatpush1.bf16.msra.mxu1 %v11869_v40  ;;  %1207 = vmatprep.subr.bf16.mxu0 %v11880_v44  ;;  %v11960_v40 = vld [vmem:[#allocation4 + $0x160] ss:$16 sps:$4 sm:$0xff]   ;;  %v11971_v44 = vld [vmem:[#allocation4 + $0x8c] ss:$16 sps:$4 sm:$0xff]  }
 0x111   : > { %1182 = vmatprep.subr.bf16.mxu1 %v11877_v43  ;;  %v11968_v43 = vld [vmem:[#allocation4 + $0x184] ss:$16 sps:$4 sm:$0xff]  }
 0x113   : > { %1208 = vmatpush1.bf16.msra.mxu0 %v11878_v46  ;;  %v11969_v46 = vld [vmem:[#allocation4 + $0x88] ss:$16 sps:$4 sm:$0xff]  }
 0x114   : > { %1183 = vmatpush1.bf16.msra.mxu1 %v11875_v45  ;;  %1209 = vmatprep.subr.bf16.mxu0 %v11886_v48  ;;  %v11966_v45 = vld [vmem:[#allocation4 + $0x180] ss:$16 sps:$4 sm:$0xff]   ;;  %v11977_v48 = vld [vmem:[#allocation4 + $0xac] ss:$16 sps:$4 sm:$0xff]  }
 0x115   : > { %1184 = vmatprep.subr.bf16.mxu1 %v11883_v47  ;;  %v11974_v47 = vld [vmem:[#allocation4 + $0x1a4] ss:$16 sps:$4 sm:$0xff]  }
 0x117   : > { %1210 = vmatpush1.bf16.msra.mxu0 %v11884_v50  ;;  %v11975_v50 = vld [vmem:[#allocation4 + $0xa8] ss:$16 sps:$4 sm:$0xff]  }
 0x118   : > { %1185 = vmatpush1.bf16.msra.mxu1 %v11881_v49  ;;  %1211 = vmatprep.subr.bf16.mxu0 %v11892_v52  ;;  %v11972_v49 = vld [vmem:[#allocation4 + $0x1a0] ss:$16 sps:$4 sm:$0xff]   ;;  %v11983_v52 = vld [vmem:[#allocation4 + $0xcc] ss:$16 sps:$4 sm:$0xff]  }
 0x119   : > { %1186 = vmatprep.subr.bf16.mxu1 %v11889_v51  ;;  %v11980_v51 = vld [vmem:[#allocation4 + $0x1c4] ss:$16 sps:$4 sm:$0xff]  }
 0x11b   : > { %1212 = vmatpush1.bf16.msra.mxu0 %v11890_v54  ;;  %v11981_v54 = vld [vmem:[#allocation4 + $0xc8] ss:$16 sps:$4 sm:$0xff]  }
 0x11c   : > { %1187 = vmatpush1.bf16.msra.mxu1 %v11887_v53  ;;  %1724 = vmatprep.subr.bf16.mxu0 %v11895_v55  ;;  %v11978_v53 = vld [vmem:[#allocation4 + $0x1c0] ss:$16 sps:$4 sm:$0xff]   ;;  %v11986_v55 = vld [vmem:[#allocation4 + $0x1e4] ss:$16 sps:$4 sm:$0xff]  }
 0x11d   : > { %1765 = vmatprep.subr.bf16.mxu1 %v11898_v57  ;;  %v11989_v57 = vld [vmem:[#allocation4 + $0xec] ss:$16 sps:$4 sm:$0xff]  }
 0x11e   : > { %1230 = vmatmul.mubr.bf16.vlgmr.msra.gmra.mrb[4].mxu0 %v14201_v41  ;;  %v11916_v41 = vld [vmem:[#allocation4 + $0x264] ss:$16 sps:$4 sm:$0xff]  }
 0x11f   : > { %1189 = vmatmul.mubr.bf16.vlgmr.msra.gmra.mrb[4].mxu1 %v14210_v22  ;;  %1725 = vmatpush1.bf16.msra.mxu0 %v11893_v58  ;;  %v11940_v22 = vld [vmem:[#allocation4 + $0x2e4] ss:$16 sps:$4 sm:$0xff]   ;;  %v11984_v58 = vld [vmem:[#allocation4 + $0x1e0] ss:$16 sps:$4 sm:$0xff]  }
 0x120   : > { %1766 = vmatpush1.bf16.msra.mxu1 %v11896_v59  ;;  %1726 = vmatprep.subr.bf16.mxu0 %v11901_v60  ;;  %v11987_v59 = vld [vmem:[#allocation4 + $0xe8] ss:$16 sps:$4 sm:$0xff]   ;;  %v11994_v60 = vld [vmem:[#allocation4 + $0x10c] ss:$16 sps:$4 sm:$0xff]  }
 0x121   : > { %1767 = vmatprep.subr.bf16.mxu1 %v11904_v61  ;;  %1797 = vmatprep.mubr.bf16.mxu1 %v13926_v0  ;;  %v11997_v61 = vld [vmem:[#allocation4 + $0x20c] ss:$16 sps:$4 sm:$0xff]  }
 0x122   : > { %1756 = vmatprep.mubr.bf16.mxu0 %v14216_v62 }
 0x123   : > { %1727 = vmatpush1.bf16.msra.mxu0 %v11899_v63  ;;  %v11992_v63 = vld [vmem:[#allocation4 + $0x108] ss:$16 sps:$4 sm:$0xff]  }
 0x124   : > { %1768 = vmatpush1.bf16.msra.mxu1 %v11902_v1  ;;  %1728 = vmatprep.subr.bf16.mxu0 %v11907_v2  ;;  %v11995_v1 = vld [vmem:[#allocation4 + $0x208] ss:$16 sps:$4 sm:$0xff]   ;;  %v12000_v2 = vld [vmem:[#allocation4 + $0x12c] ss:$16 sps:$4 sm:$0xff]  }
 0x125   : > { %1769 = vmatprep.subr.bf16.mxu1 %v11910_v3  ;;  %v12003_v3 = vld [vmem:[#allocation4 + $0x22c] ss:$16 sps:$4 sm:$0xff]  }
 0x127   : > { %1729 = vmatpush1.bf16.msra.mxu0 %v11905_v4  ;;  %v11998_v4 = vld [vmem:[#allocation4 + $0x128] ss:$16 sps:$4 sm:$0xff]  }
 0x128   : > { %1770 = vmatpush1.bf16.msra.mxu1 %v11908_v5  ;;  %1730 = vmatprep.subr.bf16.mxu0 %v11913_v6  ;;  %v12001_v5 = vld [vmem:[#allocation4 + $0x228] ss:$16 sps:$4 sm:$0xff]   ;;  %v12006_v6 = vld [vmem:[#allocation4 + $0x14c] ss:$16 sps:$4 sm:$0xff]  }
 0x129   : > { %1771 = vmatprep.subr.bf16.mxu1 %v11916_v41  ;;  %v12009_v41 = vld [vmem:[#allocation4 + $0x24c] ss:$16 sps:$4 sm:$0xff]  }
 0x12b   : > { %1731 = vmatpush1.bf16.msra.mxu0 %v11911_v7  ;;  %v12007_v7 = vld [vmem:[#allocation4 + $0x248] ss:$16 sps:$4 sm:$0xff]  }
 0x12c   : > { %1772 = vmatpush1.bf16.msra.mxu1 %v11914_v8  ;;  %1732 = vmatprep.subr.bf16.mxu0 %v11919_v9  ;;  %v12012_v8 = vld [vmem:[#allocation4 + $0x16c] ss:$16 sps:$4 sm:$0xff]  }
 0x12d   : > { %1773 = vmatprep.subr.bf16.mxu1 %v11922_v10  ;;  %v12015_v9 = vld [vmem:[#allocation4 + $0x26c] ss:$16 sps:$4 sm:$0xff]   ;;  %v12010_v10 = vld [vmem:[#allocation4 + $0x168] ss:$16 sps:$4 sm:$0xff]  }
 0x12f   : > { %1733 = vmatpush1.bf16.msra.mxu0 %v11917_v11  ;;  %v12013_v11 = vld [vmem:[#allocation4 + $0x268] ss:$16 sps:$4 sm:$0xff]  }
 0x130   : > { %1774 = vmatpush1.bf16.msra.mxu1 %v11920_v12  ;;  %1734 = vmatprep.subr.bf16.mxu0 %v11925_v13  ;;  %v12018_v12 = vld [vmem:[#allocation4 + $0x18c] ss:$16 sps:$4 sm:$0xff]  }
 0x131   : > { %1775 = vmatprep.subr.bf16.mxu1 %v11928_v14  ;;  %v12021_v13 = vld [vmem:[#allocation4 + $0x28c] ss:$16 sps:$4 sm:$0xff]   ;;  %v12016_v14 = vld [vmem:[#allocation4 + $0x188] ss:$16 sps:$4 sm:$0xff]  }
 0x133   : > { %1735 = vmatpush1.bf16.msra.mxu0 %v11923_v15  ;;  %v12019_v15 = vld [vmem:[#allocation4 + $0x288] ss:$16 sps:$4 sm:$0xff]  }
 0x134   : > { %1776 = vmatpush1.bf16.msra.mxu1 %v11926_v16  ;;  %1736 = vmatprep.subr.bf16.mxu0 %v11931_v17  ;;  %v12024_v16 = vld [vmem:[#allocation4 + $0x1ac] ss:$16 sps:$4 sm:$0xff]  }
 0x135   : > { %1777 = vmatprep.subr.bf16.mxu1 %v11934_v18  ;;  %v12027_v17 = vld [vmem:[#allocation4 + $0x2ac] ss:$16 sps:$4 sm:$0xff]   ;;  %v12022_v18 = vld [vmem:[#allocation4 + $0x1a8] ss:$16 sps:$4 sm:$0xff]  }
 0x137   : > { %1737 = vmatpush1.bf16.msra.mxu0 %v11929_v19  ;;  %v12025_v19 = vld [vmem:[#allocation4 + $0x2a8] ss:$16 sps:$4 sm:$0xff]  }
 0x138   : > { %1778 = vmatpush1.bf16.msra.mxu1 %v11932_v20  ;;  %1738 = vmatprep.subr.bf16.mxu0 %v11937_v21  ;;  %v12030_v20 = vld [vmem:[#allocation4 + $0x1cc] ss:$16 sps:$4 sm:$0xff]  }
 0x139   : > { %1779 = vmatprep.subr.bf16.mxu1 %v11940_v22  ;;  %v12033_v21 = vld [vmem:[#allocation4 + $0x2cc] ss:$16 sps:$4 sm:$0xff]   ;;  %v12028_v22 = vld [vmem:[#allocation4 + $0x1c8] ss:$16 sps:$4 sm:$0xff]  }
 0x13b   : > { %1739 = vmatpush1.bf16.msra.mxu0 %v11935_v23  ;;  %v12031_v23 = vld [vmem:[#allocation4 + $0x2c8] ss:$16 sps:$4 sm:$0xff]  }
 0x13c   : > { %1780 = vmatpush1.bf16.msra.mxu1 %v11938_v24  ;;  %1740 = vmatprep.subr.bf16.mxu0 %v11943_v25  ;;  %v12036_v24 = vld [vmem:[#allocation4 + $0x1ec] ss:$16 sps:$4 sm:$0xff]  }
 0x13d   : > { %1806 = vmatprep.subr.bf16.mxu1 %v11947_v26  ;;  %v12039_v25 = vld [vmem:[#allocation4 + $0x2ec] ss:$16 sps:$4 sm:$0xff]   ;;  %v12034_v26 = vld [vmem:[#allocation4 + $0x1e8] ss:$16 sps:$4 sm:$0xff]  }
 0x13f   : > { %1798 = vmatmul.mubr.bf16.vlgmr.msra.gmra.mrb[8].mxu1 %v14224_v29  ;;  %1741 = vmatpush1.bf16.msra.mxu0 %v11941_v28  ;;  %v14235_v28 = vld [vmem:[%s14194_s19] sm:$0xee] }
 0x140   : > { %1807 = vmatpush1.bf16.msra.mxu1 %v11945_v30  ;;  %1742 = vmatprep.subr.bf16.mxu0 %v11950_v31  ;;  %v12037_v30 = vld [vmem:[#allocation4 + $0x2e8] ss:$16 sps:$4 sm:$0xff]   ;;  %v12042_v31 = vld [vmem:[#allocation4 + $0x604] ss:$16 sps:$4 sm:$0xff]  }
 0x141   : > { %1808 = vmatprep.subr.bf16.mxu1 %v11953_v32  ;;  %1838 = vmatprep.mubr.bf16.mxu1 %v14216_v62  ;;  %v14230_v62 = vcombine.low %v14205_v56, %v14205_v56  ;;  %v12004_v56 = vld [vmem:[#allocation4 + $0x148] ss:$16 sps:$4 sm:$0xff]   ;;  %v12045_v32 = vld [vmem:[#allocation4 + $0x804] ss:$16 sps:$4 sm:$0xff]  }
 0x143   : > { %1743 = vmatpush1.bf16.msra.mxu0 %v11948_v33  ;;  %v14238_v33 = vld [vmem:[%s14194_s19 + $0xc] sm:$0x11] }
 0x144   : > { %1809 = vmatpush1.bf16.msra.mxu1 %v11951_v34  ;;  %1744 = vmatprep.subr.bf16.mxu0 %v11956_v35  ;;  %v10536_v34 = vcombine.high %v14235_v28, %v14238_v33  ;;  %v12040_v35 = vld [vmem:[#allocation4 + $0x600] ss:$16 sps:$4 sm:$0xff]  }
 0x145   : > { %1810 = vmatprep.subr.bf16.mxu1 %v11959_v36  ;;  %v12043_v36 = vld [vmem:[#allocation4 + $0x800] ss:$16 sps:$4 sm:$0xff]  }
 0x147   : > { %1745 = vmatpush1.bf16.msra.mxu0 %v11954_v27  ;;  %v12048_v27 = vld [vmem:[#allocation4 + $0x624] ss:$16 sps:$4 sm:$0xff]  }
 0x148   : > { %1811 = vmatpush1.bf16.msra.mxu1 %v11957_v37  ;;  %1746 = vmatprep.subr.bf16.mxu0 %v11962_v38  ;;  %v12051_v37 = vld [vmem:[#allocation4 + $0x824] ss:$16 sps:$4 sm:$0xff]   ;;  %v14242_v38 = vrot.slane %v10536_v34, 1  ;;  %v12131_v34 = vld [vmem:[#allocation4 + $0x6cc] ss:$16 sps:$4 sm:$0xff]  }
 0x149   : > { %1812 = vmatprep.subr.bf16.mxu1 %v11965_v39  ;;  %v12046_v39 = vld [vmem:[#allocation4 + $0x620] ss:$16 sps:$4 sm:$0xff]  }
 0x14b   : > { %1747 = vmatpush1.bf16.msra.mxu0 %v11960_v40  ;;  %v12049_v40 = vld [vmem:[#allocation4 + $0x820] ss:$16 sps:$4 sm:$0xff]  }
 0x14c   : > { %1813 = vmatpush1.bf16.msra.mxu1 %v11963_v42  ;;  %1748 = vmatprep.subr.bf16.mxu0 %v11968_v43  ;;  %v12054_v42 = vld [vmem:[#allocation4 + $0x644] ss:$16 sps:$4 sm:$0xff]  }
 0x14d   : > { %1814 = vmatprep.subr.bf16.mxu1 %v11971_v44  ;;  %v12057_v43 = vld [vmem:[#allocation4 + $0x844] ss:$16 sps:$4 sm:$0xff]   ;;  %v12052_v44 = vld [vmem:[#allocation4 + $0x640] ss:$16 sps:$4 sm:$0xff]  }
 0x14f   : > { %1749 = vmatpush1.bf16.msra.mxu0 %v11966_v45  ;;  %v12055_v45 = vld [vmem:[#allocation4 + $0x840] ss:$16 sps:$4 sm:$0xff]  }
 0x150   : > { %1815 = vmatpush1.bf16.msra.mxu1 %v11969_v46  ;;  %1750 = vmatprep.subr.bf16.mxu0 %v11974_v47  ;;  %v12060_v46 = vld [vmem:[#allocation4 + $0x664] ss:$16 sps:$4 sm:$0xff]   ;;  %v12058_v47 = vld [vmem:[#allocation4 + $0x660] ss:$16 sps:$4 sm:$0xff]  }
 0x151   : > { %1816 = vmatprep.subr.bf16.mxu1 %v11977_v48  ;;  %v12061_v48 = vld [vmem:[#allocation4 + $0x860] ss:$16 sps:$4 sm:$0xff]  }
 0x153   : > { %1751 = vmatpush1.bf16.msra.mxu0 %v11972_v49  ;;  %v12066_v49 = vld [vmem:[#allocation4 + $0x684] ss:$16 sps:$4 sm:$0xff]  }
 0x154   : > { %1817 = vmatpush1.bf16.msra.mxu1 %v11975_v50  ;;  %1752 = vmatprep.subr.bf16.mxu0 %v11980_v51  ;;  %v12069_v50 = vld [vmem:[#allocation4 + $0x884] ss:$16 sps:$4 sm:$0xff]   ;;  %v12064_v51 = vld [vmem:[#allocation4 + $0x680] ss:$16 sps:$4 sm:$0xff]  }
 0x155   : > { %1818 = vmatprep.subr.bf16.mxu1 %v11983_v52  ;;  %v12067_v52 = vld [vmem:[#allocation4 + $0x880] ss:$16 sps:$4 sm:$0xff]  }
 0x157   : > { %1753 = vmatpush1.bf16.msra.mxu0 %v11978_v53  ;;  %v12072_v53 = vld [vmem:[#allocation4 + $0x6a4] ss:$16 sps:$4 sm:$0xff]  }
 0x158   : > { %1819 = vmatpush1.bf16.msra.mxu1 %v11981_v54  ;;  %1754 = vmatprep.subr.bf16.mxu0 %v11986_v55  ;;  %v12075_v54 = vld [vmem:[#allocation4 + $0x8a4] ss:$16 sps:$4 sm:$0xff]   ;;  %v12070_v55 = vld [vmem:[#allocation4 + $0x6a0] ss:$16 sps:$4 sm:$0xff]  }
 0x159   : > { %1820 = vmatprep.subr.bf16.mxu1 %v11989_v57  ;;  %v12073_v57 = vld [vmem:[#allocation4 + $0x8a0] ss:$16 sps:$4 sm:$0xff]  }
 0x15b   : > { %1755 = vmatpush1.bf16.msra.mxu0 %v11984_v58  ;;  %v12078_v58 = vld [vmem:[#allocation4 + $0x6c4] ss:$16 sps:$4 sm:$0xff]  }
 0x15c   : > { %1821 = vmatpush1.bf16.msra.mxu1 %v11987_v59  ;;  %1847 = vmatprep.subr.bf16.mxu0 %v11997_v61  ;;  %v12081_v59 = vld [vmem:[#allocation4 + $0x8c4] ss:$16 sps:$4 sm:$0xff]   ;;  %v12079_v61 = vld [vmem:[#allocation4 + $0x8c0] ss:$16 sps:$4 sm:$0xff]  }
 0x15d   : > { %1822 = vmatprep.subr.bf16.mxu1 %v11994_v60  ;;  %v12076_v60 = vld [vmem:[#allocation4 + $0x6c0] ss:$16 sps:$4 sm:$0xff]  }
 0x15e   : > { %1757 = vmatmul.mubr.bf16.vlgmr.msra.gmra.mrb[8].mxu0 %v14230_v62 }
 0x15f   : > { %1848 = vmatpush1.bf16.msra.mxu0 %v11995_v1  ;;  %1879 = vmatprep.mubr.bf16.mxu0 %v13926_v0  ;;  %v12087_v1 = vld [vmem:[#allocation4 + $0x8e4] ss:$16 sps:$4 sm:$0xff]  }
 0x160   : > { %1823 = vmatpush1.bf16.msra.mxu1 %v11992_v63  ;;  %1849 = vmatprep.subr.bf16.mxu0 %v12003_v3  ;;  %v14249_v63 = vld [vmem:[%s14194_s19 + $0x8] sm:$0xe]  ;;  %v13666_v3 = vld [vmem:[%s14194_s19 + $0x14] sm:$0x1] }
 0x161   : > { %1824 = vmatprep.subr.bf16.mxu1 %v12000_v2  ;;  %v12082_v2 = vld [vmem:[#allocation4 + $0x6e0] ss:$16 sps:$4 sm:$0xff]  }
 0x163   : > { %1850 = vmatpush1.bf16.msra.mxu0 %v12001_v5  ;;  %v12085_v5 = vld [vmem:[#allocation4 + $0x8e0] ss:$16 sps:$4 sm:$0xff]  }
 0x164   : > { %1825 = vmatpush1.bf16.msra.mxu1 %v11998_v4  ;;  %1851 = vmatprep.subr.bf16.mxu0 %v12009_v41  ;;  %v10537_v4 = vcombine.low %v14249_v63, %v13666_v3  ;;  %v12095_v41 = vld [vmem:[#allocation4 + $0x60c] ss:$16 sps:$4 sm:$0xff]   ;;  %v12167_v3 = vld [vmem:[#allocation4 + $0x888] ss:$16 sps:$4 sm:$0xff]  }
 0x165   : > { %1826 = vmatprep.subr.bf16.mxu1 %v12006_v6  ;;  %v12090_v6 = vld [vmem:[#allocation4 + $0x704] ss:$16 sps:$4 sm:$0xff]  }
 0x167   : > { %1852 = vmatpush1.bf16.msra.mxu0 %v12007_v7  ;;  %v14253_v7 = vrot.slane %v10537_v4, 1  ;;  %v12172_v4 = vld [vmem:[#allocation4 + $0x7ac] ss:$16 sps:$4 sm:$0xff]  }
 0x168   : > { %1827 = vmatpush1.bf16.msra.mxu1 %v12004_v56  ;;  %1853 = vmatprep.subr.bf16.mxu0 %v12015_v9  ;;  %v12088_v56 = vld [vmem:[#allocation4 + $0x700] ss:$16 sps:$4 sm:$0xff]   ;;  %v12098_v9 = vld [vmem:[#allocation4 + $0x724] ss:$16 sps:$4 sm:$0xff]  }
 0x169   : > { %1828 = vmatprep.subr.bf16.mxu1 %v12012_v8  ;;  %v12093_v8 = vld [vmem:[#allocation4 + $0x608] ss:$16 sps:$4 sm:$0xff]  }
 0x16b   : > { %1854 = vmatpush1.bf16.msra.mxu0 %v12013_v11  ;;  %v12096_v11 = vld [vmem:[#allocation4 + $0x720] ss:$16 sps:$4 sm:$0xff]  }
 0x16c   : > { %1829 = vmatpush1.bf16.msra.mxu1 %v12010_v10  ;;  %1855 = vmatprep.subr.bf16.mxu0 %v12021_v13  ;;  %v12101_v10 = vld [vmem:[#allocation4 + $0x62c] ss:$16 sps:$4 sm:$0xff]   ;;  %v12104_v13 = vld [vmem:[#allocation4 + $0x744] ss:$16 sps:$4 sm:$0xff]  }
 0x16d   : > { %1830 = vmatprep.subr.bf16.mxu1 %v12018_v12  ;;  %v12099_v12 = vld [vmem:[#allocation4 + $0x628] ss:$16 sps:$4 sm:$0xff]  }
 0x16f   : > { %1856 = vmatpush1.bf16.msra.mxu0 %v12019_v15  ;;  %v12102_v15 = vld [vmem:[#allocation4 + $0x740] ss:$16 sps:$4 sm:$0xff]  }
 0x170   : > { %1831 = vmatpush1.bf16.msra.mxu1 %v12016_v14  ;;  %1857 = vmatprep.subr.bf16.mxu0 %v12027_v17  ;;  %v12107_v14 = vld [vmem:[#allocation4 + $0x64c] ss:$16 sps:$4 sm:$0xff]   ;;  %v12110_v17 = vld [vmem:[#allocation4 + $0x764] ss:$16 sps:$4 sm:$0xff]  }
 0x171   : > { %1832 = vmatprep.subr.bf16.mxu1 %v12024_v16  ;;  %v12105_v16 = vld [vmem:[#allocation4 + $0x648] ss:$16 sps:$4 sm:$0xff]  }
 0x173   : > { %1858 = vmatpush1.bf16.msra.mxu0 %v12025_v19  ;;  %v12108_v19 = vld [vmem:[#allocation4 + $0x760] ss:$16 sps:$4 sm:$0xff]  }
 0x174   : > { %1833 = vmatpush1.bf16.msra.mxu1 %v12022_v18  ;;  %1859 = vmatprep.subr.bf16.mxu0 %v12033_v21  ;;  %v12113_v18 = vld [vmem:[#allocation4 + $0x66c] ss:$16 sps:$4 sm:$0xff]   ;;  %v12116_v21 = vld [vmem:[#allocation4 + $0x784] ss:$16 sps:$4 sm:$0xff]  }
 0x175   : > { %1834 = vmatprep.subr.bf16.mxu1 %v12030_v20  ;;  %v12111_v20 = vld [vmem:[#allocation4 + $0x668] ss:$16 sps:$4 sm:$0xff]  }
 0x177   : > { %1860 = vmatpush1.bf16.msra.mxu0 %v12031_v23  ;;  %v12114_v23 = vld [vmem:[#allocation4 + $0x780] ss:$16 sps:$4 sm:$0xff]  }
 0x178   : > { %1835 = vmatpush1.bf16.msra.mxu1 %v12028_v22  ;;  %1861 = vmatprep.subr.bf16.mxu0 %v12039_v25  ;;  %v12119_v22 = vld [vmem:[#allocation4 + $0x68c] ss:$16 sps:$4 sm:$0xff]   ;;  %v12122_v25 = vld [vmem:[#allocation4 + $0x7a4] ss:$16 sps:$4 sm:$0xff]  }
 0x179   : > { %1836 = vmatprep.subr.bf16.mxu1 %v12036_v24  ;;  %v12117_v24 = vld [vmem:[#allocation4 + $0x688] ss:$16 sps:$4 sm:$0xff]  }
 0x17b   : > { %1862 = vmatpush1.bf16.msra.mxu0 %v12037_v30  ;;  %v12120_v30 = vld [vmem:[#allocation4 + $0x7a0] ss:$16 sps:$4 sm:$0xff]  }
 0x17c   : > { %1837 = vmatpush1.bf16.msra.mxu1 %v12034_v26  ;;  %2481 = vmatprep.subr.bf16.mxu0 %v12042_v31  ;;  %v12125_v26 = vld [vmem:[#allocation4 + $0x6ac] ss:$16 sps:$4 sm:$0xff]   ;;  %v12123_v31 = vld [vmem:[#allocation4 + $0x6a8] ss:$16 sps:$4 sm:$0xff]  }
 0x17d   : > { %2522 = vmatprep.subr.bf16.mxu1 %v12045_v32  ;;  %v12128_v32 = vld [vmem:[#allocation4 + $0x7c4] ss:$16 sps:$4 sm:$0xff]  }
 0x17e   : > { %1880 = vmatmul.mubr.bf16.vlgmr.msra.gmra.mrb[12].mxu0 %v14224_v29  ;;  %v12063_v29 = vld [vmem:[#allocation4 + $0x864] ss:$16 sps:$4 sm:$0xff]  }
 0x17f   : > { %1839 = vmatmul.mubr.bf16.vlgmr.msra.gmra.mrb[12].mxu1 %v14230_v62  ;;  %2482 = vmatpush1.bf16.msra.mxu0 %v12040_v35  ;;  %v12084_v62 = vld [vmem:[#allocation4 + $0x6e4] ss:$16 sps:$4 sm:$0xff]  }
 0x180   : > { %2523 = vmatpush1.bf16.msra.mxu1 %v12043_v36  ;;  %2483 = vmatprep.subr.bf16.mxu0 %v12048_v27  ;;  %v12126_v27 = vld [vmem:[#allocation4 + $0x7c0] ss:$16 sps:$4 sm:$0xff]  }
 0x181   : > { %2524 = vmatprep.subr.bf16.mxu1 %v12051_v37  ;;  %2554 = vmatprep.mubr.bf16.mxu1 %v13926_v0  ;;  %v12129_v37 = vld [vmem:[#allocation4 + $0x6c8] ss:$16 sps:$4 sm:$0xff]  }
 0x182   : > { %2513 = vmatprep.mubr.bf16.mxu0 %v14242_v38 }
 0x183   : > { %2484 = vmatpush1.bf16.msra.mxu0 %v12046_v39  ;;  %v12134_v39 = vld [vmem:[#allocation4 + $0x7e4] ss:$16 sps:$4 sm:$0xff]  }
 0x184   : > { %2525 = vmatpush1.bf16.msra.mxu1 %v12049_v40  ;;  %2485 = vmatprep.subr.bf16.mxu0 %v12054_v42  ;;  %v12137_v42 = vld [vmem:[#allocation4 + $0x6ec] ss:$16 sps:$4 sm:$0xff]  }
 0x185   : > { %2526 = vmatprep.subr.bf16.mxu1 %v12057_v43  ;;  %v12132_v43 = vld [vmem:[#allocation4 + $0x7e0] ss:$16 sps:$4 sm:$0xff]  }
 0x187   : > { %2486 = vmatpush1.bf16.msra.mxu0 %v12052_v44  ;;  %v12135_v44 = vld [vmem:[#allocation4 + $0x6e8] ss:$16 sps:$4 sm:$0xff]  }
 0x188   : > { %2527 = vmatpush1.bf16.msra.mxu1 %v12055_v45  ;;  %2487 = vmatprep.subr.bf16.mxu0 %v12060_v46  ;;  %v10535_v45 = vcombine.low %v14235_v28, %v14238_v33  ;;  %v12142_v46 = vld [vmem:[#allocation4 + $0x70c] ss:$16 sps:$4 sm:$0xff]   ;;  %v12149_v33 = vld [vmem:[#allocation4 + $0x828] ss:$16 sps:$4 sm:$0xff]  }
 0x189   : > { %2528 = vmatprep.subr.bf16.mxu1 %v12063_v29  ;;  %v12145_v29 = vld [vmem:[#allocation4 + $0x80c] ss:$16 sps:$4 sm:$0xff]  }
 0x18b   : > { %2488 = vmatpush1.bf16.msra.mxu0 %v12058_v47  ;;  %v14263_v47 = vrot.slane %v10535_v45, 1  ;;  %v12206_v45 = vld [vmem:[#allocation4 + $0x960] ss:$16 sps:$4 sm:$0xff]  }
 0x18c   : > { %2529 = vmatpush1.bf16.msra.mxu1 %v12061_v48  ;;  %2489 = vmatprep.subr.bf16.mxu0 %v12066_v49  ;;  %v12140_v48 = vld [vmem:[#allocation4 + $0x708] ss:$16 sps:$4 sm:$0xff]  }
 0x18d   : > { %2530 = vmatprep.subr.bf16.mxu1 %v12069_v50  ;;  %v12143_v49 = vld [vmem:[#allocation4 + $0x808] ss:$16 sps:$4 sm:$0xff]   ;;  %v12148_v50 = vld [vmem:[#allocation4 + $0x72c] ss:$16 sps:$4 sm:$0xff]  }
 0x18f   : > { %2490 = vmatpush1.bf16.msra.mxu0 %v12064_v51  ;;  %v12151_v51 = vld [vmem:[#allocation4 + $0x82c] ss:$16 sps:$4 sm:$0xff]  }
 0x190   : > { %2531 = vmatpush1.bf16.msra.mxu1 %v12067_v52  ;;  %2491 = vmatprep.subr.bf16.mxu0 %v12072_v53  ;;  %v12146_v52 = vld [vmem:[#allocation4 + $0x728] ss:$16 sps:$4 sm:$0xff]   ;;  %v12154_v53 = vld [vmem:[#allocation4 + $0x74c] ss:$16 sps:$4 sm:$0xff]  }
 0x191   : > { %2532 = vmatprep.subr.bf16.mxu1 %v12075_v54  ;;  %v12157_v54 = vld [vmem:[#allocation4 + $0x84c] ss:$16 sps:$4 sm:$0xff]  }
 0x193   : > { %2492 = vmatpush1.bf16.msra.mxu0 %v12070_v55  ;;  %v12152_v55 = vld [vmem:[#allocation4 + $0x748] ss:$16 sps:$4 sm:$0xff]  }
 0x194   : > { %2533 = vmatpush1.bf16.msra.mxu1 %v12073_v57  ;;  %2493 = vmatprep.subr.bf16.mxu0 %v12078_v58  ;;  %v12155_v57 = vld [vmem:[#allocation4 + $0x848] ss:$16 sps:$4 sm:$0xff]   ;;  %v12160_v58 = vld [vmem:[#allocation4 + $0x76c] ss:$16 sps:$4 sm:$0xff]  }
 0x195   : > { %2534 = vmatprep.subr.bf16.mxu1 %v12081_v59  ;;  %v12163_v59 = vld [vmem:[#allocation4 + $0x86c] ss:$16 sps:$4 sm:$0xff]  }
 0x197   : > { %2494 = vmatpush1.bf16.msra.mxu0 %v12076_v60  ;;  %v12158_v60 = vld [vmem:[#allocation4 + $0x768] ss:$16 sps:$4 sm:$0xff]  }
 0x198   : > { %2535 = vmatpush1.bf16.msra.mxu1 %v12079_v61  ;;  %2495 = vmatprep.subr.bf16.mxu0 %v12084_v62  ;;  %v12161_v61 = vld [vmem:[#allocation4 + $0x868] ss:$16 sps:$4 sm:$0xff]   ;;  %v12166_v62 = vld [vmem:[#allocation4 + $0x78c] ss:$16 sps:$4 sm:$0xff]  }
 0x199   : > { %2536 = vmatprep.subr.bf16.mxu1 %v12087_v1  ;;  %v12169_v1 = vld [vmem:[#allocation4 + $0x88c] ss:$16 sps:$4 sm:$0xff]  }
 0x19b   : > { %2496 = vmatpush1.bf16.msra.mxu0 %v12082_v2  ;;  %v12164_v2 = vld [vmem:[#allocation4 + $0x788] ss:$16 sps:$4 sm:$0xff]  }
 0x19c   : > { %2537 = vmatpush1.bf16.msra.mxu1 %v12085_v5  ;;  %2497 = vmatprep.subr.bf16.mxu0 %v12090_v6  ;;  %v12175_v5 = vld [vmem:[#allocation4 + $0x8ac] ss:$16 sps:$4 sm:$0xff]   ;;  %v12170_v6 = vld [vmem:[#allocation4 + $0x7a8] ss:$16 sps:$4 sm:$0xff]  }
 0x19d   : > { %2563 = vmatprep.subr.bf16.mxu1 %v12095_v41  ;;  %v12173_v41 = vld [vmem:[#allocation4 + $0x8a8] ss:$16 sps:$4 sm:$0xff]  }
 0x19f   : > { %2555 = vmatmul.mubr.bf16.vlgmr.msra.gmra.mrb[16].mxu1 %v14253_v7  ;;  %2498 = vmatpush1.bf16.msra.mxu0 %v12088_v56  ;;  %v14268_v56 = vld [vmem:[%s14194_s19 + $0xc] sm:$0x33] }
 0x1a0   : > { %2564 = vmatpush1.bf16.msra.mxu1 %v12093_v8  ;;  %2499 = vmatprep.subr.bf16.mxu0 %v12098_v9  ;;  %v12178_v8 = vld [vmem:[#allocation4 + $0x7cc] ss:$16 sps:$4 sm:$0xff]  }
 0x1a1   : > { %2565 = vmatprep.subr.bf16.mxu1 %v12101_v10  ;;  %2595 = vmatprep.mubr.bf16.mxu1 %v14242_v38  ;;  %v12181_v9 = vld [vmem:[#allocation4 + $0x8cc] ss:$16 sps:$4 sm:$0xff]  }
 0x1a3   : > { %2500 = vmatpush1.bf16.msra.mxu0 %v12096_v11  ;;  %v12176_v11 = vld [vmem:[#allocation4 + $0x7c8] ss:$16 sps:$4 sm:$0xff]  }
 0x1a4   : > { %2566 = vmatpush1.bf16.msra.mxu1 %v12099_v12  ;;  %2501 = vmatprep.subr.bf16.mxu0 %v12104_v13  ;;  %v12179_v12 = vld [vmem:[#allocation4 + $0x8c8] ss:$16 sps:$4 sm:$0xff]   ;;  %v10635_v13 = vcombine.high %v14235_v28, %v14268_v56 }
 0x1a5   : > { %2567 = vmatprep.subr.bf16.mxu1 %v12107_v14  ;;  %v12182_v28 = vld [vmem:[#allocation4 + $0x7e8] ss:$16 sps:$4 sm:$0xff]  }
 0x1a7   : > { %2502 = vmatpush1.bf16.msra.mxu0 %v12102_v15 }
 0x1a8   : > { %2568 = vmatpush1.bf16.msra.mxu1 %v12105_v16  ;;  %2503 = vmatprep.subr.bf16.mxu0 %v12110_v17 }
 0x1a9   : > { %2569 = vmatprep.subr.bf16.mxu1 %v12113_v18 }
 0x1ab   : > { %2504 = vmatpush1.bf16.msra.mxu0 %v12108_v19  ;;  %v12184_v19 = vld [vmem:[#allocation4 + $0x7ec] ss:$16 sps:$4 sm:$0xff]  }
 0x1ac   : > { %2570 = vmatpush1.bf16.msra.mxu1 %v12111_v20  ;;  %2505 = vmatprep.subr.bf16.mxu0 %v12116_v21  ;;  %v12187_v20 = vld [vmem:[#allocation4 + $0x8ec] ss:$16 sps:$4 sm:$0xff]   ;;  %v2765_v21 = vshrl.u32 %v10635_v13, 16 }
 0x1ad   : > { %2571 = vmatprep.subr.bf16.mxu1 %v12119_v22  ;;  %v2768_v22 = vshll.u32 %v10635_v13, 16  ;;  %v12233_v13 = vld [vmem:[#allocation4 + $0xbe0] ss:$16 sps:$4 sm:$0xff]  }
 0x1af   : > { %2506 = vmatpush1.bf16.msra.mxu0 %v12114_v23  ;;  %v12185_v23 = vld [vmem:[#allocation4 + $0x8e8] ss:$16 sps:$4 sm:$0xff]  }
 0x1b0   : > { %2572 = vmatpush1.bf16.msra.mxu1 %v12117_v24  ;;  %2507 = vmatprep.subr.bf16.mxu0 %v12122_v25  ;;  %v12190_v24 = vld [vmem:[#allocation4 + $0x904] ss:$16 sps:$4 sm:$0xff]  }
 0x1b1   : > { %2573 = vmatprep.subr.bf16.mxu1 %v12125_v26  ;;  %v12193_v25 = vld [vmem:[#allocation4 + $0xb04] ss:$16 sps:$4 sm:$0xff]   ;;  %v12188_v26 = vld [vmem:[#allocation4 + $0x900] ss:$16 sps:$4 sm:$0xff]  }
 0x1b2   : > { %v14257_v35 = vpop.f32.mrb[0].mxu1 }
 0x1b3   : > { %v14259_v36 = vpop.f32.mrb[1].mxu1  ;;  %2508 = vmatpush1.bf16.msra.mxu0 %v12120_v30  ;;  %v2767_v30 = vrot.slane %v2765_v21, 1  ;;  %v12244_v21 = vld [vmem:[#allocation4 + $0xa24] ss:$16 sps:$4 sm:$0xff]  }
 0x1b4   : > { %v1153_v38 = vpop.f32.mrb[2].mxu1  ;;  %2574 = vmatpush1.bf16.msra.mxu1 %v12123_v31  ;;  %2509 = vmatprep.subr.bf16.mxu0 %v12128_v32  ;;  %v2770_v31 = vrot.slane %v2768_v22, 2  ;;  %v12191_v32 = vld [vmem:[#allocation4 + $0xb00] ss:$16 sps:$4 sm:$0xff]   ;;  %v12247_v22 = vld [vmem:[#allocation4 + $0x92c] ss:$16 sps:$4 sm:$0xff]  }
 0x1b5   : > { %v1154_v40 = vpop.f32.mrb[3].mxu1  ;;  %2575 = vmatprep.subr.bf16.mxu1 %v12131_v34  ;;  %v12196_v34 = vld [vmem:[#allocation4 + $0x924] ss:$16 sps:$4 sm:$0xff]  }
 0x1b6   : > { %v12202_v38 = vld [vmem:[#allocation4 + $0x944] ss:$16 sps:$4 sm:$0xff]   ;;  %v12200_v40 = vld [vmem:[#allocation4 + $0x940] ss:$16 sps:$4 sm:$0xff]  }
 0x1b7   : > { %2510 = vmatpush1.bf16.msra.mxu0 %v12126_v27  ;;  %v12194_v27 = vld [vmem:[#allocation4 + $0x920] ss:$16 sps:$4 sm:$0xff]  }
 0x1b8   : > { %2576 = vmatpush1.bf16.msra.mxu1 %v12129_v37  ;;  %2511 = vmatprep.subr.bf16.mxu0 %v12134_v39  ;;  %v12197_v37 = vld [vmem:[#allocation4 + $0xb20] ss:$16 sps:$4 sm:$0xff]   ;;  %v12205_v39 = vld [vmem:[#allocation4 + $0xb44] ss:$16 sps:$4 sm:$0xff]  }
 0x1b9   : > { %2577 = vmatprep.subr.bf16.mxu1 %v12137_v42  ;;  %v12203_v42 = vld [vmem:[#allocation4 + $0xb40] ss:$16 sps:$4 sm:$0xff]  }
 0x1bb   : > { %2512 = vmatpush1.bf16.msra.mxu0 %v12132_v43  ;;  %v12211_v43 = vld [vmem:[#allocation4 + $0xb64] ss:$16 sps:$4 sm:$0xff]  }
 0x1bc   : > { %2578 = vmatpush1.bf16.msra.mxu1 %v12135_v44  ;;  %2604 = vmatprep.subr.bf16.mxu0 %v12145_v29  ;;  %v2650_v44 = vld [vmem:[%s14194_s19 + $0x14] sm:$0x3] }
 0x1bd   : > { %2579 = vmatprep.subr.bf16.mxu1 %v12142_v46  ;;  %v12209_v46 = vld [vmem:[#allocation4 + $0xb60] ss:$16 sps:$4 sm:$0xff]   ;;  %v12214_v29 = vld [vmem:[#allocation4 + $0x984] ss:$16 sps:$4 sm:$0xff]  }
 0x1be   : > { %2514 = vmatmul.mubr.bf16.vlgmr.msra.gmra.mrb[16].mxu0 %v14263_v47 }
 0x1bf   : > { %2605 = vmatpush1.bf16.msra.mxu0 %v12143_v49  ;;  %2636 = vmatprep.mubr.bf16.mxu0 %v13926_v0  ;;  %v12215_v49 = vld [vmem:[#allocation4 + $0xb80] ss:$16 sps:$4 sm:$0xff]  }
 0x1c0   : > { %2580 = vmatpush1.bf16.msra.mxu1 %v12140_v48  ;;  %2606 = vmatprep.subr.bf16.mxu0 %v12151_v51  ;;  %v12212_v48 = vld [vmem:[#allocation4 + $0x980] ss:$16 sps:$4 sm:$0xff]   ;;  %v12220_v51 = vld [vmem:[#allocation4 + $0x9a4] ss:$16 sps:$4 sm:$0xff]  }
 0x1c1   : > { %2581 = vmatprep.subr.bf16.mxu1 %v12148_v50  ;;  %v10636_v50 = vcombine.low %v14249_v63, %v2650_v44 }
 0x1c3   : > { %2607 = vmatpush1.bf16.msra.mxu0 %v12149_v33  ;;  %v12218_v33 = vld [vmem:[#allocation4 + $0x9a0] ss:$16 sps:$4 sm:$0xff]  }
 0x1c4   : > { %2582 = vmatpush1.bf16.msra.mxu1 %v12146_v52  ;;  %2608 = vmatprep.subr.bf16.mxu0 %v12157_v54  ;;  %v12223_v52 = vld [vmem:[#allocation4 + $0xba4] ss:$16 sps:$4 sm:$0xff]  }
 0x1c5   : > { %2583 = vmatprep.subr.bf16.mxu1 %v12154_v53  ;;  %v12221_v53 = vld [vmem:[#allocation4 + $0xba0] ss:$16 sps:$4 sm:$0xff]   ;;  %v12226_v54 = vld [vmem:[#allocation4 + $0x9c4] ss:$16 sps:$4 sm:$0xff]  }
 0x1c7   : > { %2609 = vmatpush1.bf16.msra.mxu0 %v12155_v57  ;;  %v2773_v57 = vshrl.u32 %v10636_v50, 16 }
 0x1c8   : > { %2584 = vmatpush1.bf16.msra.mxu1 %v12152_v55  ;;  %2610 = vmatprep.subr.bf16.mxu0 %v12163_v59  ;;  %v12229_v55 = vld [vmem:[#allocation4 + $0xbc4] ss:$16 sps:$4 sm:$0xff]  }
 0x1c9   : > { %2585 = vmatprep.subr.bf16.mxu1 %v12160_v58 }
 0x1cb   : > { %2611 = vmatpush1.bf16.msra.mxu0 %v12161_v61  ;;  %v12227_v61 = vld [vmem:[#allocation4 + $0xbc0] ss:$16 sps:$4 sm:$0xff]  }
 0x1cc   : > { %2586 = vmatpush1.bf16.msra.mxu1 %v12158_v60  ;;  %2612 = vmatprep.subr.bf16.mxu0 %v12169_v1  ;;  %v12224_v60 = vld [vmem:[#allocation4 + $0x9c0] ss:$16 sps:$4 sm:$0xff]  }
 0x1cd   : > { %2587 = vmatprep.subr.bf16.mxu1 %v12166_v62 }
 0x1cf   : > { %2613 = vmatpush1.bf16.msra.mxu0 %v12167_v3 }
 0x1d0   : > { %2588 = vmatpush1.bf16.msra.mxu1 %v12164_v2  ;;  %2614 = vmatprep.subr.bf16.mxu0 %v12175_v5  ;;  %v2776_v2 = vshll.u32 %v10636_v50, 16 }
 0x1d1   : > { %2589 = vmatprep.subr.bf16.mxu1 %v12172_v4  ;;  %v1108_v10 = vpop.f32.mrb[0].mxu0 }
 0x1d2   : > { %v14273_v14 = vadd.f32 %v14257_v35, %v1108_v10  ;;  %v1110_v15 = vpop.f32.mrb[1].mxu0  ;;  %v12199_v35 = vld [vmem:[#allocation4 + $0xb24] ss:$16 sps:$4 sm:$0xff]   ;;  %v2775_v10 = vrot.slane %v2773_v57, 1  ;;  %v12278_v57 = vld [vmem:[#allocation4 + $0xae0] ss:$16 sps:$4 sm:$0xff]  }
 0x1d3   : > { %v14276_v16 = vadd.f32 %v14259_v36, %v1110_v15  ;;  %v1112_v17 = vpop.f32.mrb[2].mxu0  ;;  %2615 = vmatpush1.bf16.msra.mxu0 %v12173_v41  ;;  %v14278_v36 = vor.u32 %v2770_v31, %v2767_v30  ;;  %v12238_v15 = vld [vmem:[#allocation4 + $0xa04] ss:$16 sps:$4 sm:$0xff]   ;;  %v12251_v30 = vld [vmem:[#allocation4 + $0x948] ss:$16 sps:$4 sm:$0xff]  }
 0x1d4   : > { %2590 = vmatpush1.bf16.msra.mxu1 %v12170_v6  ;;  %v1113_v18 = vpop.f32.mrb[3].mxu0  ;;  %2616 = vmatprep.subr.bf16.mxu0 %v12181_v9  ;;  %v12235_v9 = vld [vmem:[#allocation4 + $0xbe4] ss:$16 sps:$4 sm:$0xff]   ;;  %v12241_v17 = vld [vmem:[#allocation4 + $0x90c] ss:$16 sps:$4 sm:$0xff]  }
 0x1d5   : > { %2591 = vmatprep.subr.bf16.mxu1 %v12178_v8  ;;  %v12232_v8 = vld [vmem:[#allocation4 + $0x9e4] ss:$16 sps:$4 sm:$0xff]   ;;  %v12236_v18 = vld [vmem:[#allocation4 + $0xa00] ss:$16 sps:$4 sm:$0xff]  }
 0x1d6   : > { %v12256_v31 = vld [vmem:[#allocation4 + $0xa64] ss:$16 sps:$4 sm:$0xff]  }
 0x1d7   : > { %2617 = vmatpush1.bf16.msra.mxu0 %v12179_v12  ;;  %v12230_v12 = vld [vmem:[#allocation4 + $0x9e0] ss:$16 sps:$4 sm:$0xff]  }
 0x1d8   : > { %2592 = vmatpush1.bf16.msra.mxu1 %v12176_v11  ;;  %2618 = vmatprep.subr.bf16.mxu0 %v12187_v20  ;;  %v2778_v11 = vrot.slane %v2776_v2, 2  ;;  %v12294_v2 = vld [vmem:[#allocation4 + $0xa2c] ss:$16 sps:$4 sm:$0xff]  }
 0x1d9   : > { %2593 = vmatprep.subr.bf16.mxu1 %v12184_v19  ;;  %v12239_v19 = vld [vmem:[#allocation4 + $0x908] ss:$16 sps:$4 sm:$0xff]  }
 0x1da   : > { %v14290_v20 = vor.u32 %v2778_v11, %v2775_v10  ;;  %v12301_v10 = vld [vmem:[#allocation4 + $0xb48] ss:$16 sps:$4 sm:$0xff]   ;;  %v12306_v11 = vld [vmem:[#allocation4 + $0xa6c] ss:$16 sps:$4 sm:$0xff]  }
 0x1db   : > { %2619 = vmatpush1.bf16.msra.mxu0 %v12185_v23  ;;  %v12245_v23 = vld [vmem:[#allocation4 + $0x928] ss:$16 sps:$4 sm:$0xff]  }
 0x1dc   : > { %2594 = vmatpush1.bf16.msra.mxu1 %v12182_v28  ;;  %3263 = vmatprep.subr.bf16.mxu0 %v12190_v24  ;;  %v12242_v28 = vld [vmem:[#allocation4 + $0xa20] ss:$16 sps:$4 sm:$0xff]   ;;  %v12250_v24 = vld [vmem:[#allocation4 + $0xa44] ss:$16 sps:$4 sm:$0xff]  }
 0x1dd   : > { %3304 = vmatprep.subr.bf16.mxu1 %v12193_v25  ;;  %v12253_v25 = vld [vmem:[#allocation4 + $0x94c] ss:$16 sps:$4 sm:$0xff]  }
 0x1de   : > { %2637 = vmatmul.mubr.bf16.vlgmr.msra.gmra.mrb[20].mxu0 %v14253_v7  ;;  %v12208_v7 = vld [vmem:[#allocation4 + $0x964] ss:$16 sps:$4 sm:$0xff]  }
 0x1df   : > { %2596 = vmatmul.mubr.bf16.vlgmr.msra.gmra.mrb[20].mxu1 %v14263_v47  ;;  %3264 = vmatpush1.bf16.msra.mxu0 %v12188_v26  ;;  %v12217_v47 = vld [vmem:[#allocation4 + $0xb84] ss:$16 sps:$4 sm:$0xff]   ;;  %v12248_v26 = vld [vmem:[#allocation4 + $0xa40] ss:$16 sps:$4 sm:$0xff]  }
 0x1e0   : > { %3305 = vmatpush1.bf16.msra.mxu1 %v12191_v32  ;;  %3265 = vmatprep.subr.bf16.mxu0 %v12196_v34  ;;  %v12259_v32 = vld [vmem:[#allocation4 + $0x96c] ss:$16 sps:$4 sm:$0xff]   ;;  %v12254_v34 = vld [vmem:[#allocation4 + $0xa60] ss:$16 sps:$4 sm:$0xff]  }
 0x1e1   : > { %3306 = vmatprep.subr.bf16.mxu1 %v12199_v35  ;;  %3336 = vmatprep.mubr.bf16.mxu1 %v13926_v0  ;;  %v12257_v35 = vld [vmem:[#allocation4 + $0x968] ss:$16 sps:$4 sm:$0xff]  }
 0x1e2   : > { %3295 = vmatprep.mubr.bf16.mxu0 %v14278_v36 }
 0x1e3   : > { %3266 = vmatpush1.bf16.msra.mxu0 %v12194_v27  ;;  %v12262_v27 = vld [vmem:[#allocation4 + $0xa84] ss:$16 sps:$4 sm:$0xff]  }
 0x1e4   : > { %3307 = vmatpush1.bf16.msra.mxu1 %v12197_v37  ;;  %3267 = vmatprep.subr.bf16.mxu0 %v12202_v38  ;;  %v12265_v37 = vld [vmem:[#allocation4 + $0x98c] ss:$16 sps:$4 sm:$0xff]   ;;  %v12263_v38 = vld [vmem:[#allocation4 + $0x988] ss:$16 sps:$4 sm:$0xff]  }
 0x1e5   : > { %3308 = vmatprep.subr.bf16.mxu1 %v12205_v39  ;;  %v12268_v39 = vld [vmem:[#allocation4 + $0xaa4] ss:$16 sps:$4 sm:$0xff]  }
 0x1e7   : > { %3268 = vmatpush1.bf16.msra.mxu0 %v12200_v40  ;;  %v12271_v40 = vld [vmem:[#allocation4 + $0x9ac] ss:$16 sps:$4 sm:$0xff]  }
 0x1e8   : > { %3309 = vmatpush1.bf16.msra.mxu1 %v12203_v42  ;;  %3269 = vmatprep.subr.bf16.mxu0 %v12208_v7  ;;  %v12266_v42 = vld [vmem:[#allocation4 + $0xaa0] ss:$16 sps:$4 sm:$0xff]   ;;  %v12269_v7 = vld [vmem:[#allocation4 + $0x9a8] ss:$16 sps:$4 sm:$0xff]  }
 0x1e9   : > { %3310 = vmatprep.subr.bf16.mxu1 %v12211_v43  ;;  %v13667_v43 = vld [vmem:[%s14194_s19] sm:$0xee] }
 0x1ea   : > { %v10634_v44 = vcombine.low %v13667_v43, %v14268_v56  ;;  %v12280_v56 = vld [vmem:[#allocation4 + $0xae4] ss:$16 sps:$4 sm:$0xff]   ;;  %v12331_v43 = vld [vmem:[#allocation4 + $0xbe8] ss:$16 sps:$4 sm:$0xff]  }
 0x1eb   : > { %3270 = vmatpush1.bf16.msra.mxu0 %v12206_v45  ;;  %v12274_v45 = vld [vmem:[#allocation4 + $0xac4] ss:$16 sps:$4 sm:$0xff]  }
 0x1ec   : > { %3311 = vmatpush1.bf16.msra.mxu1 %v12209_v46  ;;  %3271 = vmatprep.subr.bf16.mxu0 %v12214_v29  ;;  %v12277_v46 = vld [vmem:[#allocation4 + $0x9cc] ss:$16 sps:$4 sm:$0xff]   ;;  %v2757_v50 = vshrl.u32 %v10634_v44, 16 }
 0x1ed   : > { %3312 = vmatprep.subr.bf16.mxu1 %v12217_v47  ;;  %v12272_v47 = vld [vmem:[#allocation4 + $0xac0] ss:$16 sps:$4 sm:$0xff]  }
 0x1ef   : > { %3272 = vmatpush1.bf16.msra.mxu0 %v12212_v48  ;;  %v12275_v48 = vld [vmem:[#allocation4 + $0x9c8] ss:$16 sps:$4 sm:$0xff]  }
 0x1f0   : > { %3313 = vmatpush1.bf16.msra.mxu1 %v12215_v49  ;;  %3273 = vmatprep.subr.bf16.mxu0 %v12220_v51  ;;  %v2760_v51 = vshll.u32 %v10634_v44, 16  ;;  %v12336_v44 = vld [vmem:[#allocation4 + $0xc04] ss:$16 sps:$4 sm:$0xff]  }
 0x1f1   : > { %3314 = vmatprep.subr.bf16.mxu1 %v12223_v52  ;;  %v1231_v59 = vpop.f32.mrb[4].mxu0 }
 0x1f2   : > { %v1190_v58 = vpop.f32.mrb[4].mxu1  ;;  %v1233_v1 = vpop.f32.mrb[5].mxu0 }
 0x1f3   : > { %v14286_v62 = vadd.f32 %v1231_v59, %v1190_v58  ;;  %v1192_v63 = vpop.f32.mrb[5].mxu1  ;;  %v1235_v5 = vpop.f32.mrb[6].mxu0  ;;  %3274 = vmatpush1.bf16.msra.mxu0 %v12218_v33  ;;  %v12281_v58 = vld [vmem:[#allocation4 + $0x9e8] ss:$16 sps:$4 sm:$0xff]   ;;  %v12288_v59 = vld [vmem:[#allocation4 + $0xa0c] ss:$16 sps:$4 sm:$0xff]  }
 0x1f4   : > { %v14288_v3 = vadd.f32 %v1233_v1, %v1192_v63  ;;  %v1194_v4 = vpop.f32.mrb[6].mxu1  ;;  %3315 = vmatpush1.bf16.msra.mxu1 %v12221_v53  ;;  %v1236_v41 = vpop.f32.mrb[7].mxu0  ;;  %3275 = vmatprep.subr.bf16.mxu0 %v12226_v54  ;;  %v12283_v53 = vld [vmem:[#allocation4 + $0x9ec] ss:$16 sps:$4 sm:$0xff]   ;;  %v2759_v54 = vrot.slane %v2757_v50, 1 }
 0x1f5   : > { %v1195_v6 = vpop.f32.mrb[7].mxu1  ;;  %3316 = vmatprep.subr.bf16.mxu1 %v12229_v55  ;;  %v2762_v55 = vrot.slane %v2760_v51, 2  ;;  %v12289_v63 = vld [vmem:[#allocation4 + $0xb08] ss:$16 sps:$4 sm:$0xff]   ;;  %v12297_v4 = vld [vmem:[#allocation4 + $0xb2c] ss:$16 sps:$4 sm:$0xff]  }
 0x1f6   : > { %v12292_v5 = vld [vmem:[#allocation4 + $0xa28] ss:$16 sps:$4 sm:$0xff]   ;;  %v12300_v41 = vld [vmem:[#allocation4 + $0xa4c] ss:$16 sps:$4 sm:$0xff]   ;;  %v12345_v50 = vld [vmem:[#allocation4 + $0xe24] ss:$16 sps:$4 sm:$0xff]  }
 0x1f7   : > { %3276 = vmatpush1.bf16.msra.mxu0 %v12224_v60  ;;  %v12291_v60 = vld [vmem:[#allocation4 + $0xb0c] ss:$16 sps:$4 sm:$0xff]   ;;  %v14300_v1 = vor.u32 %v2762_v55, %v2759_v54  ;;  %v12295_v6 = vld [vmem:[#allocation4 + $0xb28] ss:$16 sps:$4 sm:$0xff]   ;;  %v12343_v51 = vld [vmem:[#allocation4 + $0xe20] ss:$16 sps:$4 sm:$0xff]  }
 0x1f8   : > { %3317 = vmatpush1.bf16.msra.mxu1 %v12227_v61  ;;  %3277 = vmatprep.subr.bf16.mxu0 %v12232_v8  ;;  %v12286_v61 = vld [vmem:[#allocation4 + $0xa08] ss:$16 sps:$4 sm:$0xff]   ;;  %v12303_v8 = vld [vmem:[#allocation4 + $0xb4c] ss:$16 sps:$4 sm:$0xff]   ;;  %v12349_v54 = vld [vmem:[#allocation4 + $0xe40] ss:$16 sps:$4 sm:$0xff]  }
 0x1f9   : > { %3318 = vmatprep.subr.bf16.mxu1 %v12235_v9  ;;  %v12298_v9 = vld [vmem:[#allocation4 + $0xa48] ss:$16 sps:$4 sm:$0xff]   ;;  %v12354_v55 = vld [vmem:[#allocation4 + $0xc64] ss:$16 sps:$4 sm:$0xff]  }
 0x1fb   : > { %3278 = vmatpush1.bf16.msra.mxu0 %v12230_v12  ;;  %v12309_v12 = vld [vmem:[#allocation4 + $0xb6c] ss:$16 sps:$4 sm:$0xff]  }
 0x1fc   : > { %3319 = vmatpush1.bf16.msra.mxu1 %v12233_v13  ;;  %3279 = vmatprep.subr.bf16.mxu0 %v12238_v15  ;;  %v12304_v13 = vld [vmem:[#allocation4 + $0xa68] ss:$16 sps:$4 sm:$0xff]  }
 0x1fd   : > { %3345 = vmatprep.subr.bf16.mxu1 %v12241_v17  ;;  %v12307_v15 = vld [vmem:[#allocation4 + $0xb68] ss:$16 sps:$4 sm:$0xff]   ;;  %v12312_v17 = vld [vmem:[#allocation4 + $0xa8c] ss:$16 sps:$4 sm:$0xff]  }
 0x1ff   : > { %3337 = vmatmul.mubr.bf16.vlgmr.msra.gmra.mrb[24].mxu1 %v14290_v20  ;;  %3280 = vmatpush1.bf16.msra.mxu0 %v12236_v18  ;;  %v12315_v18 = vld [vmem:[#allocation4 + $0xb8c] ss:$16 sps:$4 sm:$0xff]  }
 0x200   : > { %3346 = vmatpush1.bf16.msra.mxu1 %v12239_v19  ;;  %3281 = vmatprep.subr.bf16.mxu0 %v12244_v21  ;;  %v12310_v19 = vld [vmem:[#allocation4 + $0xa88] ss:$16 sps:$4 sm:$0xff]  }
 0x201   : > { %3347 = vmatprep.subr.bf16.mxu1 %v12247_v22  ;;  %3377 = vmatprep.mubr.bf16.mxu1 %v14278_v36  ;;  %v12260_v36 = vld [vmem:[#allocation4 + $0xa80] ss:$16 sps:$4 sm:$0xff]   ;;  %v12313_v21 = vld [vmem:[#allocation4 + $0xb88] ss:$16 sps:$4 sm:$0xff]   ;;  %v12318_v22 = vld [vmem:[#allocation4 + $0xaac] ss:$16 sps:$4 sm:$0xff]  }
 0x203   : > { %3282 = vmatpush1.bf16.msra.mxu0 %v12242_v28  ;;  %v12321_v28 = vld [vmem:[#allocation4 + $0xbac] ss:$16 sps:$4 sm:$0xff]  }
 0x204   : > { %3348 = vmatpush1.bf16.msra.mxu1 %v12245_v23  ;;  %3283 = vmatprep.subr.bf16.mxu0 %v12250_v24  ;;  %v12316_v23 = vld [vmem:[#allocation4 + $0xaa8] ss:$16 sps:$4 sm:$0xff]  }
 0x205   : > { %3349 = vmatprep.subr.bf16.mxu1 %v12253_v25  ;;  %v12319_v24 = vld [vmem:[#allocation4 + $0xba8] ss:$16 sps:$4 sm:$0xff]   ;;  %v12324_v25 = vld [vmem:[#allocation4 + $0xacc] ss:$16 sps:$4 sm:$0xff]  }
 0x207   : > { %3284 = vmatpush1.bf16.msra.mxu0 %v12248_v26  ;;  %v12327_v26 = vld [vmem:[#allocation4 + $0xbcc] ss:$16 sps:$4 sm:$0xff]  }
 0x208   : > { %3350 = vmatpush1.bf16.msra.mxu1 %v12251_v30  ;;  %3285 = vmatprep.subr.bf16.mxu0 %v12256_v31  ;;  %v12322_v31 = vld [vmem:[#allocation4 + $0xac8] ss:$16 sps:$4 sm:$0xff]  }
 0x209   : > { %3351 = vmatprep.subr.bf16.mxu1 %v12259_v32  ;;  %v12325_v32 = vld [vmem:[#allocation4 + $0xbc8] ss:$16 sps:$4 sm:$0xff]  }
 0x20b   : > { %3286 = vmatpush1.bf16.msra.mxu0 %v12254_v34 }
 0x20c   : > { %3352 = vmatpush1.bf16.msra.mxu1 %v12257_v35  ;;  %3287 = vmatprep.subr.bf16.mxu0 %v12262_v27  ;;  %v12330_v27 = vld [vmem:[#allocation4 + $0xaec] ss:$16 sps:$4 sm:$0xff]  }
 0x20d   : > { %3353 = vmatprep.subr.bf16.mxu1 %v12265_v37  ;;  %v12333_v37 = vld [vmem:[#allocation4 + $0xbec] ss:$16 sps:$4 sm:$0xff]  }
 0x20f   : > { %3288 = vmatpush1.bf16.msra.mxu0 %v12260_v36 }
 0x210   : > { %3354 = vmatpush1.bf16.msra.mxu1 %v12263_v38  ;;  %3289 = vmatprep.subr.bf16.mxu0 %v12268_v39 }
 0x211   : > { %3355 = vmatprep.subr.bf16.mxu1 %v12271_v40 }
 0x212   : > { %v14296_v29 = vpop.f32.mrb[8].mxu1 }
 0x213   : > { %v14298_v49 = vpop.f32.mrb[9].mxu1  ;;  %3290 = vmatpush1.bf16.msra.mxu0 %v12266_v42  ;;  %v14310_v42 = vld [vmem:[%s14194_s19] sm:$0xcc] }
 0x214   : > { %v1803_v52 = vpop.f32.mrb[10].mxu1  ;;  %3356 = vmatpush1.bf16.msra.mxu1 %v12269_v7  ;;  %3291 = vmatprep.subr.bf16.mxu0 %v12274_v45  ;;  %v12339_v45 = vld [vmem:[#allocation4 + $0xe04] ss:$16 sps:$4 sm:$0xff]  }
 0x215   : > { %v1804_v33 = vpop.f32.mrb[11].mxu1  ;;  %3357 = vmatprep.subr.bf16.mxu1 %v12277_v46  ;;  %v12337_v46 = vld [vmem:[#allocation4 + $0xe00] ss:$16 sps:$4 sm:$0xff]  }
 0x216   : > { %v12348_v33 = vld [vmem:[#allocation4 + $0xc44] ss:$16 sps:$4 sm:$0xff]  }
 0x217   : > { %3292 = vmatpush1.bf16.msra.mxu0 %v12272_v47 }
 0x218   : > { %3358 = vmatpush1.bf16.msra.mxu1 %v12275_v48  ;;  %3293 = vmatprep.subr.bf16.mxu0 %v12280_v56  ;;  %v12342_v48 = vld [vmem:[#allocation4 + $0xc24] ss:$16 sps:$4 sm:$0xff]  }
 0x219   : > { %3359 = vmatprep.subr.bf16.mxu1 %v12283_v53  ;;  %v12351_v56 = vld [vmem:[#allocation4 + $0xe44] ss:$16 sps:$4 sm:$0xff]   ;;  %v12346_v53 = vld [vmem:[#allocation4 + $0xc40] ss:$16 sps:$4 sm:$0xff]  }
 0x21b   : > { %3294 = vmatpush1.bf16.msra.mxu0 %v12278_v57  ;;  %v12357_v57 = vld [vmem:[#allocation4 + $0xe64] ss:$16 sps:$4 sm:$0xff]  }
 0x21c   : > { %3360 = vmatpush1.bf16.msra.mxu1 %v12281_v58  ;;  %3386 = vmatprep.subr.bf16.mxu0 %v12291_v60  ;;  %v12352_v58 = vld [vmem:[#allocation4 + $0xc60] ss:$16 sps:$4 sm:$0xff]   ;;  %v12363_v60 = vld [vmem:[#allocation4 + $0xe84] ss:$16 sps:$4 sm:$0xff]  }
 0x21d   : > { %3361 = vmatprep.subr.bf16.mxu1 %v12288_v59  ;;  %v12360_v59 = vld [vmem:[#allocation4 + $0xc84] ss:$16 sps:$4 sm:$0xff]  }
 0x21e   : > { %3296 = vmatmul.mubr.bf16.vlgmr.msra.gmra.mrb[24].mxu0 %v14300_v1 }
 0x21f   : > { %3387 = vmatpush1.bf16.msra.mxu0 %v12289_v63  ;;  %3418 = vmatprep.mubr.bf16.mxu0 %v13926_v0  ;;  %v12361_v63 = vld [vmem:[#allocation4 + $0xe80] ss:$16 sps:$4 sm:$0xff]  }
 0x220   : > { %3362 = vmatpush1.bf16.msra.mxu1 %v12286_v61  ;;  %3388 = vmatprep.subr.bf16.mxu0 %v12297_v4  ;;  %v12358_v61 = vld [vmem:[#allocation4 + $0xc80] ss:$16 sps:$4 sm:$0xff]  }
 0x221   : > { %3363 = vmatprep.subr.bf16.mxu1 %v12294_v2  ;;  %v12369_v2 = vld [vmem:[#allocation4 + $0xea4] ss:$16 sps:$4 sm:$0xff]   ;;  %v12364_v4 = vld [vmem:[#allocation4 + $0xca0] ss:$16 sps:$4 sm:$0xff]  }
 0x223   : > { %3389 = vmatpush1.bf16.msra.mxu0 %v12295_v6  ;;  %v12372_v6 = vld [vmem:[#allocation4 + $0xcc4] ss:$16 sps:$4 sm:$0xff]  }
 0x224   : > { %3364 = vmatpush1.bf16.msra.mxu1 %v12292_v5  ;;  %3390 = vmatprep.subr.bf16.mxu0 %v12303_v8  ;;  %v12367_v5 = vld [vmem:[#allocation4 + $0xea0] ss:$16 sps:$4 sm:$0xff]  }
 0x225   : > { %3365 = vmatprep.subr.bf16.mxu1 %v12300_v41  ;;  %v12375_v41 = vld [vmem:[#allocation4 + $0xec4] ss:$16 sps:$4 sm:$0xff]  }
 0x227   : > { %3391 = vmatpush1.bf16.msra.mxu0 %v12301_v10  ;;  %v12370_v10 = vld [vmem:[#allocation4 + $0xcc0] ss:$16 sps:$4 sm:$0xff]  }
 0x228   : > { %3366 = vmatpush1.bf16.msra.mxu1 %v12298_v9  ;;  %3392 = vmatprep.subr.bf16.mxu0 %v12309_v12  ;;  %v3432_v12 = vld [vmem:[%s14194_s19 + $0x8] sm:$0xc] }
 0x229   : > { %3367 = vmatprep.subr.bf16.mxu1 %v12306_v11  ;;  %v12373_v11 = vld [vmem:[#allocation4 + $0xec0] ss:$16 sps:$4 sm:$0xff]  }
 0x22b   : > { %3393 = vmatpush1.bf16.msra.mxu0 %v12307_v15 }
 0x22c   : > { %3368 = vmatpush1.bf16.msra.mxu1 %v12304_v13  ;;  %3394 = vmatprep.subr.bf16.mxu0 %v12315_v18  ;;  %v12378_v18 = vld [vmem:[#allocation4 + $0xce4] ss:$16 sps:$4 sm:$0xff]  }
 0x22d   : > { %3369 = vmatprep.subr.bf16.mxu1 %v12312_v17 }
 0x22f   : > { %3395 = vmatpush1.bf16.msra.mxu0 %v12313_v21 }
 0x230   : > { %3370 = vmatpush1.bf16.msra.mxu1 %v12310_v19  ;;  %3396 = vmatprep.subr.bf16.mxu0 %v12321_v28  ;;  %v12381_v19 = vld [vmem:[#allocation4 + $0xee4] ss:$16 sps:$4 sm:$0xff]  }
 0x231   : > { %3371 = vmatprep.subr.bf16.mxu1 %v12318_v22  ;;  %v1758_v30 = vpop.f32.mrb[8].mxu0 }
 0x232   : > { %v1759_v34 = vadd.f32 %v1758_v30, %v14273_v14  ;;  %v1760_v35 = vpop.f32.mrb[9].mxu0  ;;  %v12328_v14 = vld [vmem:[#allocation4 + $0xae8] ss:$16 sps:$4 sm:$0xff]   ;;  %v12379_v30 = vld [vmem:[#allocation4 + $0xee0] ss:$16 sps:$4 sm:$0xff]  }
 0x233   : > { %v1761_v36 = vadd.f32 %v1760_v35, %v14276_v16  ;;  %v1762_v38 = vpop.f32.mrb[10].mxu0  ;;  %3397 = vmatpush1.bf16.msra.mxu0 %v12319_v24  ;;  %v12334_v16 = vld [vmem:[#allocation4 + $0xc00] ss:$16 sps:$4 sm:$0xff]   ;;  %v12388_v35 = vld [vmem:[#allocation4 + $0xc0c] ss:$16 sps:$4 sm:$0xff]  }
 0x234   : > { %3372 = vmatpush1.bf16.msra.mxu1 %v12316_v23  ;;  %v14307_v39 = vadd.f32 %v14296_v29, %v1759_v34  ;;  %v1763_v40 = vpop.f32.mrb[11].mxu0  ;;  %3398 = vmatprep.subr.bf16.mxu0 %v12327_v26  ;;  %v14316_v29 = vld [vmem:[%s14194_s19 + $0xc] sm:$0x33] }
 0x235   : > { %3373 = vmatprep.subr.bf16.mxu1 %v12324_v25  ;;  %v14313_v7 = vadd.f32 %v14298_v49, %v1761_v36  ;;  %v10734_v47 = vcombine.high %v14310_v42, %v14316_v29  ;;  %v12340_v49 = vld [vmem:[#allocation4 + $0xc20] ss:$16 sps:$4 sm:$0xff]   ;;  %v12391_v36 = vld [vmem:[#allocation4 + $0xd24] ss:$16 sps:$4 sm:$0xff]   ;;  %v12394_v38 = vld [vmem:[#allocation4 + $0xc2c] ss:$16 sps:$4 sm:$0xff]  }
 0x236   : > { %v12389_v40 = vld [vmem:[#allocation4 + $0xd20] ss:$16 sps:$4 sm:$0xff]  }
 0x237   : > { %3399 = vmatpush1.bf16.msra.mxu0 %v12325_v32  ;;  %v14320_v52 = vrot.slane %v10734_v47, 2  ;;  %v13669_v32 = vld [vmem:[%s14194_s19 + $0x14] sm:$0x3]  ;;  %v12406_v47 = vld [vmem:[#allocation4 + $0xc6c] ss:$16 sps:$4 sm:$0xff]  }
 0x238   : > { %3374 = vmatpush1.bf16.msra.mxu1 %v12322_v31  ;;  %3400 = vmatprep.subr.bf16.mxu0 %v12333_v37  ;;  %v12384_v31 = vld [vmem:[#allocation4 + $0xd04] ss:$16 sps:$4 sm:$0xff]   ;;  %v10735_v34 = vcombine.low %v3432_v12, %v13669_v32  ;;  %v12460_v32 = vld [vmem:[#allocation4 + $0xe88] ss:$16 sps:$4 sm:$0xff]  }
 0x239   : > { %3375 = vmatprep.subr.bf16.mxu1 %v12330_v27  ;;  %v12386_v27 = vld [vmem:[#allocation4 + $0xc08] ss:$16 sps:$4 sm:$0xff]  }
 0x23a   : > { %v14334_v37 = vrot.slane %v10735_v34, 2  ;;  %v12465_v34 = vld [vmem:[#allocation4 + $0xdac] ss:$16 sps:$4 sm:$0xff]  }
 0x23b   : > { %3401 = vmatpush1.bf16.msra.mxu0 %v12331_v43  ;;  %v12397_v43 = vld [vmem:[#allocation4 + $0xd44] ss:$16 sps:$4 sm:$0xff]  }
 0x23c   : > { %3376 = vmatpush1.bf16.msra.mxu1 %v12328_v14  ;;  %4024 = vmatprep.subr.bf16.mxu0 %v12336_v44  ;;  %v12392_v14 = vld [vmem:[#allocation4 + $0xc28] ss:$16 sps:$4 sm:$0xff]   ;;  %v12400_v44 = vld [vmem:[#allocation4 + $0xc4c] ss:$16 sps:$4 sm:$0xff]  }
 0x23d   : > { %4065 = vmatprep.subr.bf16.mxu1 %v12339_v45  ;;  %v12395_v45 = vld [vmem:[#allocation4 + $0xd40] ss:$16 sps:$4 sm:$0xff]  }
 0x23e   : > { %3419 = vmatmul.mubr.bf16.vlgmr.msra.gmra.mrb[28].mxu0 %v14290_v20  ;;  %v12355_v20 = vld [vmem:[#allocation4 + $0xe60] ss:$16 sps:$4 sm:$0xff]  }
 0x23f   : > { %3378 = vmatmul.mubr.bf16.vlgmr.msra.gmra.mrb[28].mxu1 %v14300_v1  ;;  %4025 = vmatpush1.bf16.msra.mxu0 %v12334_v16  ;;  %v12366_v1 = vld [vmem:[#allocation4 + $0xca4] ss:$16 sps:$4 sm:$0xff]   ;;  %v12398_v16 = vld [vmem:[#allocation4 + $0xc48] ss:$16 sps:$4 sm:$0xff]  }
 0x240   : > { %4066 = vmatpush1.bf16.msra.mxu1 %v12337_v46  ;;  %4026 = vmatprep.subr.bf16.mxu0 %v12342_v48  ;;  %v12403_v46 = vld [vmem:[#allocation4 + $0xd64] ss:$16 sps:$4 sm:$0xff]   ;;  %v12401_v48 = vld [vmem:[#allocation4 + $0xd60] ss:$16 sps:$4 sm:$0xff]  }
 0x241   : > { %4067 = vmatprep.subr.bf16.mxu1 %v12345_v50  ;;  %4097 = vmatprep.mubr.bf16.mxu1 %v13926_v0  ;;  %v12404_v50 = vld [vmem:[#allocation4 + $0xc68] ss:$16 sps:$4 sm:$0xff]  }
 0x242   : > { %4056 = vmatprep.mubr.bf16.mxu0 %v14320_v52 }
 0x243   : > { %4027 = vmatpush1.bf16.msra.mxu0 %v12340_v49  ;;  %v12409_v49 = vld [vmem:[#allocation4 + $0xd84] ss:$16 sps:$4 sm:$0xff]  }
 0x244   : > { %4068 = vmatpush1.bf16.msra.mxu1 %v12343_v51  ;;  %4028 = vmatprep.subr.bf16.mxu0 %v12348_v33  ;;  %v12412_v51 = vld [vmem:[#allocation4 + $0xc8c] ss:$16 sps:$4 sm:$0xff]   ;;  %v12407_v33 = vld [vmem:[#allocation4 + $0xd80] ss:$16 sps:$4 sm:$0xff]  }
 0x245   : > { %4069 = vmatprep.subr.bf16.mxu1 %v12351_v56  ;;  %v12410_v56 = vld [vmem:[#allocation4 + $0xc88] ss:$16 sps:$4 sm:$0xff]  }
 0x247   : > { %4029 = vmatpush1.bf16.msra.mxu0 %v12346_v53  ;;  %v12415_v53 = vld [vmem:[#allocation4 + $0xda4] ss:$16 sps:$4 sm:$0xff]  }
 0x248   : > { %4070 = vmatpush1.bf16.msra.mxu1 %v12349_v54  ;;  %4030 = vmatprep.subr.bf16.mxu0 %v12354_v55  ;;  %v12418_v54 = vld [vmem:[#allocation4 + $0xcac] ss:$16 sps:$4 sm:$0xff]   ;;  %v12416_v55 = vld [vmem:[#allocation4 + $0xca8] ss:$16 sps:$4 sm:$0xff]  }
 0x249   : > { %4071 = vmatprep.subr.bf16.mxu1 %v12357_v57  ;;  %v12421_v57 = vld [vmem:[#allocation4 + $0xdc4] ss:$16 sps:$4 sm:$0xff]  }
 0x24b   : > { %4031 = vmatpush1.bf16.msra.mxu0 %v12352_v58  ;;  %v12424_v58 = vld [vmem:[#allocation4 + $0xccc] ss:$16 sps:$4 sm:$0xff]  }
 0x24c   : > { %4072 = vmatpush1.bf16.msra.mxu1 %v12355_v20  ;;  %4032 = vmatprep.subr.bf16.mxu0 %v12360_v59  ;;  %v12419_v59 = vld [vmem:[#allocation4 + $0xdc0] ss:$16 sps:$4 sm:$0xff]  }
 0x24d   : > { %4073 = vmatprep.subr.bf16.mxu1 %v12363_v60  ;;  %v12422_v60 = vld [vmem:[#allocation4 + $0xcc8] ss:$16 sps:$4 sm:$0xff]  }
 0x24f   : > { %4033 = vmatpush1.bf16.msra.mxu0 %v12358_v61 }
 0x250   : > { %4074 = vmatpush1.bf16.msra.mxu1 %v12361_v63  ;;  %4034 = vmatprep.subr.bf16.mxu0 %v12366_v1  ;;  %v12427_v63 = vld [vmem:[#allocation4 + $0xde4] ss:$16 sps:$4 sm:$0xff]   ;;  %v12430_v1 = vld [vmem:[#allocation4 + $0xcec] ss:$16 sps:$4 sm:$0xff]  }
 0x251   : > { %4075 = vmatprep.subr.bf16.mxu1 %v12369_v2  ;;  %v1881_v9 = vpop.f32.mrb[12].mxu0 }
 0x252   : > { %v1840_v8 = vpop.f32.mrb[12].mxu1  ;;  %v1883_v17 = vpop.f32.mrb[13].mxu0 }
 0x253   : > { %v1841_v13 = vadd.f32 %v1840_v8, %v14286_v62  ;;  %v1842_v15 = vpop.f32.mrb[13].mxu1  ;;  %v1885_v28 = vpop.f32.mrb[14].mxu0  ;;  %4035 = vmatpush1.bf16.msra.mxu0 %v12364_v4  ;;  %v12376_v62 = vld [vmem:[#allocation4 + $0xce0] ss:$16 sps:$4 sm:$0xff]   ;;  %v12435_v8 = vld [vmem:[#allocation4 + $0xd0c] ss:$16 sps:$4 sm:$0xff]  }
 0x254   : > { %v1843_v21 = vadd.f32 %v1842_v15, %v14288_v3  ;;  %v1844_v22 = vpop.f32.mrb[14].mxu1  ;;  %4076 = vmatpush1.bf16.msra.mxu1 %v12367_v5  ;;  %v1886_v25 = vpop.f32.mrb[15].mxu0  ;;  %4036 = vmatprep.subr.bf16.mxu0 %v12372_v6  ;;  %v12382_v3 = vld [vmem:[#allocation4 + $0xd00] ss:$16 sps:$4 sm:$0xff]   ;;  %v12428_v6 = vld [vmem:[#allocation4 + $0xce8] ss:$16 sps:$4 sm:$0xff]  }
 0x255   : > { %v14329_v23 = vadd.f32 %v1881_v9, %v1841_v13  ;;  %v1845_v24 = vpop.f32.mrb[15].mxu1  ;;  %4077 = vmatprep.subr.bf16.mxu1 %v12375_v41  ;;  %v12425_v5 = vld [vmem:[#allocation4 + $0xde0] ss:$16 sps:$4 sm:$0xff]   ;;  %v10733_v41 = vcombine.low %v14310_v42, %v14316_v29  ;;  %v12438_v9 = vld [vmem:[#allocation4 + $0xe0c] ss:$16 sps:$4 sm:$0xff]  }
 0x256   : > { %v14331_v26 = vadd.f32 %v1883_v17, %v1843_v21  ;;  %v12441_v13 = vld [vmem:[#allocation4 + $0xd2c] ss:$16 sps:$4 sm:$0xff]   ;;  %v12439_v17 = vld [vmem:[#allocation4 + $0xd28] ss:$16 sps:$4 sm:$0xff]  }
 0x257   : > { %4037 = vmatpush1.bf16.msra.mxu0 %v12370_v10  ;;  %v12433_v10 = vld [vmem:[#allocation4 + $0xd08] ss:$16 sps:$4 sm:$0xff]   ;;  %v14344_v12 = vrot.slane %v10733_v41, 2  ;;  %v12444_v15 = vld [vmem:[#allocation4 + $0xe2c] ss:$16 sps:$4 sm:$0xff]  }
 0x258   : > { %4078 = vmatpush1.bf16.msra.mxu1 %v12373_v11  ;;  %4038 = vmatprep.subr.bf16.mxu0 %v12378_v18  ;;  %v12436_v11 = vld [vmem:[#allocation4 + $0xe08] ss:$16 sps:$4 sm:$0xff]   ;;  %v12447_v42 = vld [vmem:[#allocation4 + $0xd4c] ss:$16 sps:$4 sm:$0xff]  }
 0x259   : > { %4079 = vmatprep.subr.bf16.mxu1 %v12381_v19  ;;  %v12442_v18 = vld [vmem:[#allocation4 + $0xe28] ss:$16 sps:$4 sm:$0xff]   ;;  %v12450_v29 = vld [vmem:[#allocation4 + $0xe4c] ss:$16 sps:$4 sm:$0xff]  }
 0x25a   : > { %v12445_v19 = vld [vmem:[#allocation4 + $0xd48] ss:$16 sps:$4 sm:$0xff]   ;;  %v12453_v22 = vld [vmem:[#allocation4 + $0xd6c] ss:$16 sps:$4 sm:$0xff]  }
 0x25b   : > { %4039 = vmatpush1.bf16.msra.mxu0 %v12376_v62  ;;  %v12448_v21 = vld [vmem:[#allocation4 + $0xe48] ss:$16 sps:$4 sm:$0xff]   ;;  %v12456_v28 = vld [vmem:[#allocation4 + $0xe6c] ss:$16 sps:$4 sm:$0xff]  }
 0x25c   : > { %4080 = vmatpush1.bf16.msra.mxu1 %v12379_v30  ;;  %4040 = vmatprep.subr.bf16.mxu0 %v12384_v31  ;;  %v12451_v24 = vld [vmem:[#allocation4 + $0xd68] ss:$16 sps:$4 sm:$0xff]   ;;  %v12459_v62 = vld [vmem:[#allocation4 + $0xd8c] ss:$16 sps:$4 sm:$0xff]  }
 0x25d   : > { %4106 = vmatprep.subr.bf16.mxu1 %v12388_v35  ;;  %v12454_v25 = vld [vmem:[#allocation4 + $0xe68] ss:$16 sps:$4 sm:$0xff]   ;;  %v12462_v30 = vld [vmem:[#allocation4 + $0xe8c] ss:$16 sps:$4 sm:$0xff]  }
 0x25e   : > { %v12457_v31 = vld [vmem:[#allocation4 + $0xd88] ss:$16 sps:$4 sm:$0xff]   ;;  %v12468_v35 = vld [vmem:[#allocation4 + $0xeac] ss:$16 sps:$4 sm:$0xff]  }
 0x25f   : > { %4098 = vmatmul.mubr.bf16.vlgmr.msra.gmra.mrb[32].mxu1 %v14334_v37  ;;  %4041 = vmatpush1.bf16.msra.mxu0 %v12382_v3  ;;  %v12466_v3 = vld [vmem:[#allocation4 + $0xea8] ss:$16 sps:$4 sm:$0xff]  }
 0x260   : > { %4107 = vmatpush1.bf16.msra.mxu1 %v12386_v27  ;;  %4042 = vmatprep.subr.bf16.mxu0 %v12391_v36  ;;  %v12471_v27 = vld [vmem:[#allocation4 + $0xdcc] ss:$16 sps:$4 sm:$0xff]   ;;  %v12495_v41 = vld [vmem:[#allocation9 + $0x484] ss:$16 sps:$4 sm:$0xff]  }
 0x261   : > { %4108 = vmatprep.subr.bf16.mxu1 %v12394_v38  ;;  %4138 = vmatprep.mubr.bf16.mxu1 %v14320_v52  ;;  %v12413_v52 = vld [vmem:[#allocation4 + $0xda0] ss:$16 sps:$4 sm:$0xff]   ;;  %v12474_v36 = vld [vmem:[#allocation4 + $0xecc] ss:$16 sps:$4 sm:$0xff]  }
 0x263   : > { %4043 = vmatpush1.bf16.msra.mxu0 %v12389_v40  ;;  %v12469_v40 = vld [vmem:[#allocation4 + $0xdc8] ss:$16 sps:$4 sm:$0xff]  }
 0x264   : > { %4109 = vmatpush1.bf16.msra.mxu1 %v12392_v14  ;;  %4044 = vmatprep.subr.bf16.mxu0 %v12397_v43  ;;  %v12472_v14 = vld [vmem:[#allocation4 + $0xec8] ss:$16 sps:$4 sm:$0xff]  }
 0x265   : > { %4110 = vmatprep.subr.bf16.mxu1 %v12400_v44 }
 0x267   : > { %4045 = vmatpush1.bf16.msra.mxu0 %v12395_v45  ;;  %v12477_v45 = vld [vmem:[#allocation4 + $0xdec] ss:$16 sps:$4 sm:$0xff]  }
 0x268   : > { %4111 = vmatpush1.bf16.msra.mxu1 %v12398_v16  ;;  %4046 = vmatprep.subr.bf16.mxu0 %v12403_v46  ;;  %v12480_v16 = vld [vmem:[#allocation4 + $0xeec] ss:$16 sps:$4 sm:$0xff]  }
 0x269   : > { %4112 = vmatprep.subr.bf16.mxu1 %v12406_v47 }
 0x26b   : > { %4047 = vmatpush1.bf16.msra.mxu0 %v12401_v48 }
 0x26c   : > { %4113 = vmatpush1.bf16.msra.mxu1 %v12404_v50  ;;  %4048 = vmatprep.subr.bf16.mxu0 %v12409_v49 }
 0x26d   : > { %4114 = vmatprep.subr.bf16.mxu1 %v12412_v51  ;;  %v12475_v51 = vld [vmem:[#allocation4 + $0xde8] ss:$16 sps:$4 sm:$0xff]  }
 0x26f   : > { %4049 = vmatpush1.bf16.msra.mxu0 %v12407_v33  ;;  %v12478_v33 = vld [vmem:[#allocation4 + $0xee8] ss:$16 sps:$4 sm:$0xff]  }
 0x270   : > { %4115 = vmatpush1.bf16.msra.mxu1 %v12410_v56  ;;  %4050 = vmatprep.subr.bf16.mxu0 %v12415_v53  ;;  %v12483_v56 = vld [vmem:[#allocation9 + $0x404] ss:$16 sps:$4 sm:$0xff]   ;;  %v12481_v53 = vld [vmem:[#allocation9 + $0x400] ss:$16 sps:$4 sm:$0xff]  }
 0x271   : > { %4116 = vmatprep.subr.bf16.mxu1 %v12418_v54  ;;  %v12484_v54 = vld [vmem:[#allocation9 + $0x420] ss:$16 sps:$4 sm:$0xff]  }
 0x272   : > { %v14338_v20 = vpop.f32.mrb[16].mxu1 }
 0x273   : > { %v14340_v61 = vpop.f32.mrb[17].mxu1  ;;  %4051 = vmatpush1.bf16.msra.mxu0 %v12413_v52 }
 0x274   : > { %v2560_v2 = vpop.f32.mrb[18].mxu1  ;;  %4117 = vmatpush1.bf16.msra.mxu1 %v12416_v55  ;;  %4052 = vmatprep.subr.bf16.mxu0 %v12421_v57 }
 0x275   : > { %v2561_v4 = vpop.f32.mrb[19].mxu1  ;;  %4118 = vmatprep.subr.bf16.mxu1 %v12424_v58 }
 0x276   : > { %v12492_v4 = vld [vmem:[#allocation9 + $0x464] ss:$16 sps:$4 sm:$0xff]  }
 0x277   : > { %4053 = vmatpush1.bf16.msra.mxu0 %v12419_v59 }
 0x278   : > { %4119 = vmatpush1.bf16.msra.mxu1 %v12422_v60  ;;  %4054 = vmatprep.subr.bf16.mxu0 %v12427_v63  ;;  %v12487_v63 = vld [vmem:[#allocation9 + $0x440] ss:$16 sps:$4 sm:$0xff]  }
 0x279   : > { %4120 = vmatprep.subr.bf16.mxu1 %v12430_v1 }
 0x27b   : > { %4055 = vmatpush1.bf16.msra.mxu0 %v12425_v5 }
 0x27c   : > { %4121 = vmatpush1.bf16.msra.mxu1 %v12428_v6  ;;  %4147 = vmatprep.subr.bf16.mxu0 %v12438_v9  ;;  %v12490_v6 = vld [vmem:[#allocation9 + $0x460] ss:$16 sps:$4 sm:$0xff]   ;;  %v12498_v9 = vld [vmem:[#allocation9 + $0x4a4] ss:$16 sps:$4 sm:$0xff]  }
 0x27d   : > { %4122 = vmatprep.subr.bf16.mxu1 %v12435_v8  ;;  %v12493_v8 = vld [vmem:[#allocation9 + $0x480] ss:$16 sps:$4 sm:$0xff]  }
 0x27e   : > { %4057 = vmatmul.mubr.bf16.vlgmr.msra.gmra.mrb[32].mxu0 %v14344_v12 }
 0x27f   : > { %4148 = vmatpush1.bf16.msra.mxu0 %v12436_v11  ;;  %4179 = vmatprep.mubr.bf16.mxu0 %v13926_v0  ;;  %v12463_v0 = vld [vmem:[#allocation4 + $0xda8] ss:$16 sps:$4 sm:$0xff]  }
 0x280   : > { %4123 = vmatpush1.bf16.msra.mxu1 %v12433_v10  ;;  %4149 = vmatprep.subr.bf16.mxu0 %v12444_v15  ;;  %v12508_v10 = vld [vmem:[#allocation9 + $0x600] ss:$16 sps:$4 sm:$0xff]   ;;  %v12510_v11 = vld [vmem:[#allocation9 + $0x604] ss:$16 sps:$4 sm:$0xff]  }
 0x281   : > { %4124 = vmatprep.subr.bf16.mxu1 %v12441_v13  ;;  %v12499_v13 = vld [vmem:[#allocation9 + $0x4c0] ss:$16 sps:$4 sm:$0xff]   ;;  %v12504_v15 = vld [vmem:[#allocation9 + $0x4e4] ss:$16 sps:$4 sm:$0xff]  }
 0x283   : > { %4150 = vmatpush1.bf16.msra.mxu0 %v12442_v18  ;;  %v12505_v18 = vld [vmem:[#allocation9 + $0x500] ss:$16 sps:$4 sm:$0xff]  }
 0x284   : > { %4125 = vmatpush1.bf16.msra.mxu1 %v12439_v17  ;;  %4151 = vmatprep.subr.bf16.mxu0 %v12450_v29  ;;  %v12507_v17 = vld [vmem:[#allocation9 + $0x504] ss:$16 sps:$4 sm:$0xff]  }
 0x285   : > { %4126 = vmatprep.subr.bf16.mxu1 %v12447_v42  ;;  %v12513_v42 = vld [vmem:[#allocation9 + $0x524] ss:$16 sps:$4 sm:$0xff]  }
 0x286   : > { %v12516_v29 = vld [vmem:[#allocation9 + $0x624] ss:$16 sps:$4 sm:$0xff]  }
 0x287   : > { %4152 = vmatpush1.bf16.msra.mxu0 %v12448_v21  ;;  %v12514_v21 = vld [vmem:[#allocation9 + $0x620] ss:$16 sps:$4 sm:$0xff]  }
 0x288   : > { %4127 = vmatpush1.bf16.msra.mxu1 %v12445_v19  ;;  %4153 = vmatprep.subr.bf16.mxu0 %v12456_v28  ;;  %v12511_v19 = vld [vmem:[#allocation9 + $0x520] ss:$16 sps:$4 sm:$0xff]  }
 0x289   : > { %4128 = vmatprep.subr.bf16.mxu1 %v12453_v22 }
 0x28b   : > { %4154 = vmatpush1.bf16.msra.mxu0 %v12454_v25  ;;  %v12522_v25 = vld [vmem:[#allocation9 + $0x644] ss:$16 sps:$4 sm:$0xff]  }
 0x28c   : > { %4129 = vmatpush1.bf16.msra.mxu1 %v12451_v24  ;;  %4155 = vmatprep.subr.bf16.mxu0 %v12462_v30  ;;  %v12519_v24 = vld [vmem:[#allocation9 + $0x544] ss:$16 sps:$4 sm:$0xff]   ;;  %v12517_v30 = vld [vmem:[#allocation9 + $0x540] ss:$16 sps:$4 sm:$0xff]  }
 0x28d   : > { %4130 = vmatprep.subr.bf16.mxu1 %v12459_v62 }
 0x28f   : > { %4156 = vmatpush1.bf16.msra.mxu0 %v12460_v32  ;;  %v12520_v32 = vld [vmem:[#allocation9 + $0x640] ss:$16 sps:$4 sm:$0xff]  }
 0x290   : > { %4131 = vmatpush1.bf16.msra.mxu1 %v12457_v31  ;;  %4157 = vmatprep.subr.bf16.mxu0 %v12468_v35  ;;  %v12528_v35 = vld [vmem:[#allocation9 + $0x664] ss:$16 sps:$4 sm:$0xff]  }
 0x291   : > { %4132 = vmatprep.subr.bf16.mxu1 %v12465_v34  ;;  %v2515_v38 = vpop.f32.mrb[16].mxu0  ;;  %v12525_v34 = vld [vmem:[#allocation9 + $0x564] ss:$16 sps:$4 sm:$0xff]  }
 0x292   : > { %v2557_v43 = vadd.f32 %v14338_v20, %v2515_v38  ;;  %v2517_v44 = vpop.f32.mrb[17].mxu0  ;;  %v12489_v20 = vld [vmem:[#allocation9 + $0x444] ss:$16 sps:$4 sm:$0xff]   ;;  %v12529_v38 = vld [vmem:[#allocation9 + $0x580] ss:$16 sps:$4 sm:$0xff]  }
 0x293   : > { %v2559_v46 = vadd.f32 %v14340_v61, %v2517_v44  ;;  %v2519_v47 = vpop.f32.mrb[18].mxu0  ;;  %4158 = vmatpush1.bf16.msra.mxu0 %v12466_v3  ;;  %v12526_v3 = vld [vmem:[#allocation9 + $0x660] ss:$16 sps:$4 sm:$0xff]  }
 0x294   : > { %4133 = vmatpush1.bf16.msra.mxu1 %v12463_v0  ;;  %v14351_v48 = vadd.f32 %v2557_v43, %v14307_v39  ;;  %v2520_v50 = vpop.f32.mrb[19].mxu0  ;;  %4159 = vmatprep.subr.bf16.mxu0 %v12474_v36  ;;  %v12486_v39 = vld [vmem:[#allocation9 + $0x424] ss:$16 sps:$4 sm:$0xff]   ;;  %v12523_v0 = vld [vmem:[#allocation9 + $0x560] ss:$16 sps:$4 sm:$0xff]  }
 0x295   : > { %4134 = vmatprep.subr.bf16.mxu1 %v12471_v27  ;;  %v14354_v49 = vadd.f32 %v2559_v46, %v14313_v7  ;;  %v12531_v27 = vld [vmem:[#allocation9 + $0x584] ss:$16 sps:$4 sm:$0xff]   ;;  %v12535_v44 = vld [vmem:[#allocation9 + $0x5a0] ss:$16 sps:$4 sm:$0xff]  }
 0x296   : > { %v12534_v36 = vld [vmem:[#allocation9 + $0x684] ss:$16 sps:$4 sm:$0xff]   ;;  %v12544_v47 = vld [vmem:[#allocation9 + $0x6c0] ss:$16 sps:$4 sm:$0xff]  }
 0x297   : > { %4160 = vmatpush1.bf16.msra.mxu0 %v12472_v14  ;;  %v12537_v14 = vld [vmem:[#allocation9 + $0x5a4] ss:$16 sps:$4 sm:$0xff]  }
 0x298   : > { %4135 = vmatpush1.bf16.msra.mxu1 %v12469_v40  ;;  %4161 = vmatprep.subr.bf16.mxu0 %v12480_v16  ;;  %v12532_v40 = vld [vmem:[#allocation9 + $0x680] ss:$16 sps:$4 sm:$0xff]   ;;  %v12540_v43 = vld [vmem:[#allocation9 + $0x6a4] ss:$16 sps:$4 sm:$0xff]  }
 0x299   : > { %4136 = vmatprep.subr.bf16.mxu1 %v12477_v45  ;;  %v12538_v45 = vld [vmem:[#allocation9 + $0x6a0] ss:$16 sps:$4 sm:$0xff]   ;;  %v12543_v46 = vld [vmem:[#allocation9 + $0x5c4] ss:$16 sps:$4 sm:$0xff]  }
 0x29a   : > { %v12541_v16 = vld [vmem:[#allocation9 + $0x5c0] ss:$16 sps:$4 sm:$0xff]   ;;  %v12546_v50 = vld [vmem:[#allocation9 + $0x6c4] ss:$16 sps:$4 sm:$0xff]  }
 0x29b   : > { %4162 = vmatpush1.bf16.msra.mxu0 %v12478_v33  ;;  %v12547_v33 = vld [vmem:[#allocation9 + $0x5e0] ss:$16 sps:$4 sm:$0xff]  }
 0x29c   : > { %4137 = vmatpush1.bf16.msra.mxu1 %v12475_v51  ;;  %5179 = vmatprep.subr.bf16.mxu0 %v12483_v56  ;;  %v12549_v51 = vld [vmem:[#allocation9 + $0x5e4] ss:$16 sps:$4 sm:$0xff]  }
 0x29d   : > { %5220 = vmatprep.subr.bf16.mxu1 %v12510_v11  ;;  %v12552_v56 = vld [vmem:[#allocation9 + $0x6e4] ss:$16 sps:$4 sm:$0xff]   ;;  %v12586_v11 = vld [vmem:[#allocation9 + $0x7a0] ss:$16 sps:$4 sm:$0xff]  }
 0x29e   : > { %4180 = vmatmul.mubr.bf16.vlgmr.msra.gmra.mrb[36].mxu0 %v14334_v37 }
 0x29f   : > { %4139 = vmatmul.mubr.bf16.vlgmr.msra.gmra.mrb[36].mxu1 %v14344_v12  ;;  %5180 = vmatpush1.bf16.msra.mxu0 %v12481_v53  ;;  %v12501_v12 = vld [vmem:[#allocation9 + $0x4c4] ss:$16 sps:$4 sm:$0xff]   ;;  %v12550_v53 = vld [vmem:[#allocation9 + $0x6e0] ss:$16 sps:$4 sm:$0xff]  }
 0x2a0   : > { %5181 = vmatprep.subr.bf16.mxu0 %v12486_v39  ;;  %5221 = vmatpush1.bf16.msra.mxu1 %v12508_v10  ;;  %v12558_v39 = vld [vmem:[#allocation9 + $0x704] ss:$16 sps:$4 sm:$0xff]  }
 0x2a1   : > { %5222 = vmatprep.subr.bf16.mxu1 %v12516_v29  ;;  %v12588_v10 = vld [vmem:[#allocation9 + $0x7a4] ss:$16 sps:$4 sm:$0xff]  }
 0x2a3   : > { %5182 = vmatpush1.bf16.msra.mxu0 %v12484_v54  ;;  %v12561_v54 = vld [vmem:[#allocation9 + $0x40c] ss:$16 sps:$4 sm:$0xff]  }
 0x2a4   : > { %5183 = vmatprep.subr.bf16.mxu0 %v12489_v20  ;;  %5223 = vmatpush1.bf16.msra.mxu1 %v12514_v21 }
 0x2a5   : > { %5224 = vmatprep.subr.bf16.mxu1 %v12522_v25 }
 0x2a7   : > { %5184 = vmatpush1.bf16.msra.mxu0 %v12487_v63 }
 0x2a8   : > { %5185 = vmatprep.subr.bf16.mxu0 %v12492_v4  ;;  %5225 = vmatpush1.bf16.msra.mxu1 %v12520_v32  ;;  %v12568_v4 = vld [vmem:[#allocation9 + $0x740] ss:$16 sps:$4 sm:$0xff]  }
 0x2a9   : > { %5226 = vmatprep.subr.bf16.mxu1 %v12528_v35 }
 0x2ab   : > { %5186 = vmatpush1.bf16.msra.mxu0 %v12490_v6  ;;  %v12576_v6 = vld [vmem:[#allocation9 + $0x764] ss:$16 sps:$4 sm:$0xff]  }
 0x2ac   : > { %5187 = vmatprep.subr.bf16.mxu0 %v12495_v41  ;;  %5227 = vmatpush1.bf16.msra.mxu1 %v12526_v3  ;;  %v12574_v41 = vld [vmem:[#allocation9 + $0x760] ss:$16 sps:$4 sm:$0xff]   ;;  %v4192_v3 = vld [vmem:[#allocation7] sm:$0xf] }
 0x2ad   : > { %5228 = vmatprep.subr.bf16.mxu1 %v12534_v36 }
 0x2af   : > { %5188 = vmatpush1.bf16.msra.mxu0 %v12493_v8  ;;  %v12582_v8 = vld [vmem:[#allocation9 + $0x784] ss:$16 sps:$4 sm:$0xff]  }
 0x2b0   : > { %5189 = vmatprep.subr.bf16.mxu0 %v12498_v9  ;;  %5229 = vmatpush1.bf16.msra.mxu1 %v12532_v40  ;;  %v12580_v9 = vld [vmem:[#allocation9 + $0x780] ss:$16 sps:$4 sm:$0xff]  }
 0x2b1   : > { %v2638_v52 = vpop.f32.mrb[20].mxu0  ;;  %5230 = vmatprep.subr.bf16.mxu1 %v12540_v43 }
 0x2b2   : > { %v2597_v7 = vpop.f32.mrb[20].mxu1  ;;  %v2640_v58 = vpop.f32.mrb[21].mxu0 }
 0x2b3   : > { %v2639_v55 = vadd.f32 %v2638_v52, %v2597_v7  ;;  %v2599_v57 = vpop.f32.mrb[21].mxu1  ;;  %v2642_v61 = vpop.f32.mrb[22].mxu0  ;;  %v12556_v7 = vld [vmem:[#allocation9 + $0x700] ss:$16 sps:$4 sm:$0xff]   ;;  %v12564_v52 = vld [vmem:[#allocation9 + $0x724] ss:$16 sps:$4 sm:$0xff]  }
 0x2b4   : > { %v2641_v59 = vadd.f32 %v2640_v58, %v2599_v57  ;;  %v2601_v60 = vpop.f32.mrb[22].mxu1  ;;  %v2643_v37 = vpop.f32.mrb[23].mxu0  ;;  %5231 = vmatpush1.bf16.msra.mxu1 %v12538_v45  ;;  %v12562_v57 = vld [vmem:[#allocation9 + $0x720] ss:$16 sps:$4 sm:$0xff]  }
 0x2b5   : > { %v14359_v1 = vadd.f32 %v2639_v55, %v14329_v23  ;;  %v2602_v2 = vpop.f32.mrb[23].mxu1  ;;  %v12496_v23 = vld [vmem:[#allocation9 + $0x4a0] ss:$16 sps:$4 sm:$0xff]   ;;  %5232 = vmatprep.subr.bf16.mxu1 %v12546_v50 }
 0x2b6   : > { %v14362_v5 = vadd.f32 %v2641_v59, %v14331_v26  ;;  %5190 = vmatpush1.bf16.msra.mxu0 %v12496_v23  ;;  %v12502_v26 = vld [vmem:[#allocation9 + $0x4e0] ss:$16 sps:$4 sm:$0xff]   ;;  %v12570_v2 = vld [vmem:[#allocation9 + $0x744] ss:$16 sps:$4 sm:$0xff]  }
 0x2b7   : > { %5191 = vmatprep.subr.bf16.mxu0 %v12501_v12  ;;  %v12594_v23 = vld [vmem:[#allocation9 + $0x7c4] ss:$16 sps:$4 sm:$0xff]  }
 0x2b8   : > { %5233 = vmatpush1.bf16.msra.mxu1 %v12544_v47  ;;  %v12600_v12 = vld [vmem:[#allocation9 + $0x7e4] ss:$16 sps:$4 sm:$0xff]  }
 0x2b9   : > { %5234 = vmatprep.subr.bf16.mxu1 %v12552_v56 }
 0x2ba   : > { %5192 = vmatpush1.bf16.msra.mxu0 %v12499_v13  ;;  %v12612_v13 = vld [vmem:[#allocation9 + $0x60c] ss:$16 sps:$4 sm:$0xff]  }
 0x2bb   : > { %5193 = vmatprep.subr.bf16.mxu0 %v12504_v15 }
 0x2bc   : > { %5235 = vmatpush1.bf16.msra.mxu1 %v12550_v53 }
 0x2bd   : > { %5236 = vmatprep.subr.bf16.mxu1 %v12558_v39 }
 0x2be   : > { %5194 = vmatpush1.bf16.msra.mxu0 %v12502_v26 }
 0x2bf   : > { %5195 = vmatprep.subr.bf16.mxu0 %v12507_v17 }
 0x2c0   : > { %5237 = vmatpush1.bf16.msra.mxu1 %v12556_v7 }
 0x2c1   : > { %5238 = vmatprep.subr.bf16.mxu1 %v12564_v52 }
 0x2c2   : > { %5196 = vmatpush1.bf16.msra.mxu0 %v12505_v18 }
 0x2c3   : > { %5197 = vmatprep.subr.bf16.mxu0 %v12513_v42 }
 0x2c4   : > { %5239 = vmatpush1.bf16.msra.mxu1 %v12562_v57  ;;  %v12567_v57 = vld [vmem:[#allocation9 + $0x42c] ss:$16 sps:$4 sm:$0xff]  }
 0x2c5   : > { %5240 = vmatprep.subr.bf16.mxu1 %v12570_v2 }
 0x2c6   : > { %5198 = vmatpush1.bf16.msra.mxu0 %v12511_v19 }
 0x2c7   : > { %5199 = vmatprep.subr.bf16.mxu0 %v12519_v24 }
 0x2c8   : > { %5241 = vmatpush1.bf16.msra.mxu1 %v12568_v4 }
 0x2c9   : > { %5242 = vmatprep.subr.bf16.mxu1 %v12576_v6 }
 0x2ca   : > { %5200 = vmatpush1.bf16.msra.mxu0 %v12517_v30 }
 0x2cb   : > { %5201 = vmatprep.subr.bf16.mxu0 %v12525_v34  ;;  %v4194_v34 = vlaneseq }
 0x2cc   : > { %5243 = vmatpush1.bf16.msra.mxu1 %v12574_v41 }
 0x2cd   : > { %5244 = vmatprep.subr.bf16.mxu1 %v12582_v8  ;;  %v4195_v35 = vshrl.u32 %v4194_v34, 7  ;;  %v12609_v34 = vld [vmem:[#allocation9 + $0x50c] ss:$16 sps:$4 sm:$0xff]  }
 0x2ce   : > { %5202 = vmatpush1.bf16.msra.mxu0 %v12523_v0 }
 0x2cf   : > { %5203 = vmatprep.subr.bf16.mxu0 %v12531_v27  ;;  %v14374_v0 = vsub.s32 0, %v4195_v35  ;;  %v14376_v27 = vsub.s32 1, %v4195_v35 }
 0x2d0   : > { %5245 = vmatpush1.bf16.msra.mxu1 %v12580_v9 }
 0x2d1   : > { %5246 = vmatprep.subr.bf16.mxu1 %v12588_v10  ;;  %v4197_v40 = vrot.slane %v4192_v3, %v14374_v0  ;;  %v4201_v43 = vrot.slane %v4192_v3, %v14376_v27 }
 0x2d2   : > { %v14364_v22 = vpop.f32.mrb[24].mxu1  ;;  %5204 = vmatpush1.bf16.msra.mxu0 %v12529_v38 }
 0x2d3   : > { %v14366_v28 = vpop.f32.mrb[25].mxu1  ;;  %5205 = vmatprep.subr.bf16.mxu0 %v12537_v14 }
 0x2d4   : > { %v3342_v62 = vpop.f32.mrb[26].mxu1  ;;  %5247 = vmatpush1.bf16.msra.mxu1 %v12586_v11  ;;  %v12571_v11 = vld [vmem:[#allocation9 + $0x448] ss:$16 sps:$4 sm:$0xff]  }
 0x2d5   : > { %v3343_v31 = vpop.f32.mrb[27].mxu1  ;;  %5248 = vmatprep.subr.bf16.mxu1 %v12594_v23 }
 0x2d6   : > { %5206 = vmatpush1.bf16.msra.mxu0 %v12535_v44 }
 0x2d7   : > { %5207 = vmatprep.subr.bf16.mxu0 %v12543_v46 }
 0x2da   : > { %5208 = vmatpush1.bf16.msra.mxu0 %v12541_v16 }
 0x2db   : > { %5209 = vmatprep.subr.bf16.mxu0 %v12549_v51 }
 0x2de   : > { %5210 = vmatpush1.bf16.msra.mxu0 %v12547_v33 }
 0x2df   : > { %5261 = vmatprep.subr.bf16.mxu0 %v12561_v54 }
 0x2f1   : > { %v3297_v55 = vpop.f32.mrb[24].mxu0 }
 0x2f2   : > { %v3339_v58 = vadd.f32 %v14364_v22, %v3297_v55  ;;  %v3299_v20 = vpop.f32.mrb[25].mxu0  ;;  %v12559_v55 = vld [vmem:[#allocation9 + $0x408] ss:$16 sps:$4 sm:$0xff]  }
 0x2f3   : > { %v3341_v59 = vadd.f32 %v14366_v28, %v3299_v20  ;;  %v3301_v60 = vpop.f32.mrb[26].mxu0  ;;  %v12565_v20 = vld [vmem:[#allocation9 + $0x428] ss:$16 sps:$4 sm:$0xff]  }
 0x2f4   : > { %v3427_v61 = vadd.f32 %v3339_v58, %v14351_v48  ;;  %v3302_v63 = vpop.f32.mrb[27].mxu0  ;;  %v12592_v48 = vld [vmem:[#allocation9 + $0x7c0] ss:$16 sps:$4 sm:$0xff]   ;;  %v14385_v58 = vsub.s32 2, %v4195_v35  ;;  %v12573_v60 = vld [vmem:[#allocation9 + $0x44c] ss:$16 sps:$4 sm:$0xff]  }
 0x2f5   : > { %v3428_v37 = vadd.f32 %v3341_v59, %v14354_v49  ;;  %5249 = vmatpush1.bf16.msra.mxu1 %v12592_v48  ;;  %v12598_v49 = vld [vmem:[#allocation9 + $0x7e0] ss:$16 sps:$4 sm:$0xff]   ;;  %v14387_v59 = vsub.s32 3, %v4195_v35 }
 0x2f6   : > { %5250 = vmatprep.subr.bf16.mxu1 %v12600_v12  ;;  %v12579_v12 = vld [vmem:[#allocation9 + $0x46c] ss:$16 sps:$4 sm:$0xff]  }
 0x2f7   : > { %v4209_v8 = vrot.slane %v4192_v3, %v14387_v59 }
 0x2f9   : > { %5251 = vmatpush1.bf16.msra.mxu1 %v12598_v49 }
 0x2fa   : > { %5302 = vmatprep.subr.bf16.mxu1 %v12612_v13 }
 0x311   : > { %v3420_v26 = vpop.f32.mrb[28].mxu0 }
 0x312   : > { %v3379_v15 = vpop.f32.mrb[28].mxu1  ;;  %v3422_v42 = vpop.f32.mrb[29].mxu0 }
 0x313   : > { %v3421_v17 = vadd.f32 %v3420_v26, %v3379_v15  ;;  %v3381_v18 = vpop.f32.mrb[29].mxu1  ;;  %v3424_v21 = vpop.f32.mrb[30].mxu0 }
 0x314   : > { %v3423_v29 = vadd.f32 %v3422_v42, %v3381_v18  ;;  %v3383_v19 = vpop.f32.mrb[30].mxu1  ;;  %v3425_v24 = vpop.f32.mrb[31].mxu0  ;;  %v12585_v42 = vld [vmem:[#allocation9 + $0x48c] ss:$16 sps:$4 sm:$0xff]   ;;  %v12583_v21 = vld [vmem:[#allocation9 + $0x488] ss:$16 sps:$4 sm:$0xff]  }
 0x315   : > { %v3429_v22 = vadd.f32 %v3421_v17, %v14359_v1  ;;  %v3384_v28 = vpop.f32.mrb[31].mxu1  ;;  %v12577_v17 = vld [vmem:[#allocation9 + $0x468] ss:$16 sps:$4 sm:$0xff]  }
 0x316   : > { %v3430_v25 = vadd.f32 %v3423_v29, %v14362_v5  ;;  %v12591_v28 = vld [vmem:[#allocation9 + $0x4ac] ss:$16 sps:$4 sm:$0xff]  }
 0x332   : > { %v4099_v62 = vpop.f32.mrb[32].mxu1 }
 0x333   : > { %v4101_v30 = vpop.f32.mrb[33].mxu1 }
 0x334   : > { %v4103_v31 = vpop.f32.mrb[34].mxu1 }
 0x335   : > { %v4104_v32 = vpop.f32.mrb[35].mxu1  ;;  %v12603_v31 = vld [vmem:[#allocation9 + $0x4ec] ss:$16 sps:$4 sm:$0xff]  }
 0x336   : > { %v12601_v32 = vld [vmem:[#allocation9 + $0x4e8] ss:$16 sps:$4 sm:$0xff]  }
 0x351   : > { %v4058_v36 = vpop.f32.mrb[32].mxu0 }
 0x352   : > { %v4100_v38 = vadd.f32 %v4099_v62, %v4058_v36  ;;  %v4060_v1 = vpop.f32.mrb[33].mxu0  ;;  %v12589_v62 = vld [vmem:[#allocation9 + $0x4a8] ss:$16 sps:$4 sm:$0xff]  }
 0x353   : > { %v4102_v14 = vadd.f32 %v4101_v30, %v4060_v1  ;;  %v4062_v5 = vpop.f32.mrb[34].mxu0  ;;  %v12595_v30 = vld [vmem:[#allocation9 + $0x4c8] ss:$16 sps:$4 sm:$0xff]  }
 0x354   : > { %v4188_v44 = vadd.f32 %v4100_v38, %v3427_v61  ;;  %v4063_v45 = vpop.f32.mrb[35].mxu0  ;;  %v12610_v1 = vld [vmem:[#allocation9 + $0x608] ss:$16 sps:$4 sm:$0xff]  }
 0x355   : > { %v4189_v16 = vadd.f32 %v4102_v14, %v3428_v37  ;;  %v4205_v37 = vrot.slane %v4192_v3, %v14385_v58  ;;  %v12615_v14 = vld [vmem:[#allocation9 + $0x52c] ss:$16 sps:$4 sm:$0xff]   ;;  %v12613_v5 = vld [vmem:[#allocation9 + $0x528] ss:$16 sps:$4 sm:$0xff]  }
 0x356   : > { %v4214_v46 = vadd.f32 %v4197_v40, %v4188_v44  ;;  %v12607_v40 = vld [vmem:[#allocation9 + $0x508] ss:$16 sps:$4 sm:$0xff]   ;;  %v12621_v45 = vld [vmem:[#allocation9 + $0x54c] ss:$16 sps:$4 sm:$0xff]  }
 0x357   : > { %v4215_v47 = vadd.f32 %v4201_v43, %v4189_v16  ;;  %v12618_v43 = vld [vmem:[#allocation9 + $0x62c] ss:$16 sps:$4 sm:$0xff]   ;;  %v12616_v44 = vld [vmem:[#allocation9 + $0x628] ss:$16 sps:$4 sm:$0xff]  }
 0x358   : > { %v4218_v50 = vmax.f32 %v4214_v46, 0.0  ;;  %v12624_v16 = vld [vmem:[#allocation9 + $0x64c] ss:$16 sps:$4 sm:$0xff]   ;;  %v12619_v46 = vld [vmem:[#allocation9 + $0x548] ss:$16 sps:$4 sm:$0xff]  }
 0x359   : > { %v4219_v51 = vmax.f32 %v4215_v47, 0.0  ;;  %v12622_v47 = vld [vmem:[#allocation9 + $0x648] ss:$16 sps:$4 sm:$0xff]  }
 0x35b   : > { %v11635_v33 = vpack.c.bf16 %v4219_v51, %v4218_v50  ;;  %v12627_v50 = vld [vmem:[#allocation9 + $0x56c] ss:$16 sps:$4 sm:$0xff]  }
 0x35c   : > { %v12630_v51 = vld [vmem:[#allocation9 + $0x66c] ss:$16 sps:$4 sm:$0xff]  }
 0x35d   : > { %v4240_v56 = vrot.slane %v11635_v33, 7  ;;  %v12625_v33 = vld [vmem:[#allocation9 + $0x568] ss:$16 sps:$4 sm:$0xff]  }
 0x35f   : > { %v4242_v53 = vrot.slane %v4240_v56, 4  ;;  %4248 = vst [vmem:[#allocation2] sm:$0xee] %v4240_v56  ;;  %v12628_v56 = vld [vmem:[#allocation9 + $0x668] ss:$16 sps:$4 sm:$0xff]  }
 0x361   : > { %4250 = vst [vmem:[#allocation2 + $0x10] sm:$0x11] %v4242_v53  ;;  %v12633_v53 = vld [vmem:[#allocation9 + $0x58c] ss:$16 sps:$4 sm:$0xff]  }
 0x368   : > { %v14380_v39 = vld [vmem:[#allocation2] ss:$16 sps:$4 sm:$0x1e]   ;;  %v12555_v54 = vld [vmem:[#allocation2 + $0x4] ss:$16 sps:$4 sm:$0x1e]  }
 0x369   : > { %v4531_v7 = vrot.slane %v14380_v39, 1  ;;  %v4532_v52 = vrot.slane %v12555_v54, 1  ;;  %v12636_v54 = vld [vmem:[#allocation9 + $0x68c] ss:$16 sps:$4 sm:$0xff]  }
 0x36a   : > { %v12677_v39 = vld [vmem:[#allocation9 + $0x76c] ss:$16 sps:$4 sm:$0xff]  }
 0x36b   : > { %5211 = vmatprep.mubr.bf16.mxu0 %v4532_v52 }
 0x36c   : > { %5212 = vmatmul.mubr.bf16.vlgmr.msra.gmra.mrb[40].mxu0 %v4531_v7 }
 0x36d   : > { %5262 = vmatpush1.bf16.msra.mxu0 %v12559_v55  ;;  %5293 = vmatprep.mubr.bf16.mxu0 %v4532_v52  ;;  %v12631_v52 = vld [vmem:[#allocation9 + $0x588] ss:$16 sps:$4 sm:$0xff]  }
 0x36e   : > { %5263 = vmatprep.subr.bf16.mxu0 %v12567_v57  ;;  %v12634_v55 = vld [vmem:[#allocation9 + $0x688] ss:$16 sps:$4 sm:$0xff]   ;;  %v12639_v57 = vld [vmem:[#allocation9 + $0x5ac] ss:$16 sps:$4 sm:$0xff]  }
 0x371   : > { %v4181_v63 = vpop.f32.mrb[36].mxu0  ;;  %5264 = vmatpush1.bf16.msra.mxu0 %v12565_v20  ;;  %v12642_v20 = vld [vmem:[#allocation9 + $0x6ac] ss:$16 sps:$4 sm:$0xff]  }
 0x372   : > { %v4140_v61 = vpop.f32.mrb[36].mxu1  ;;  %v4183_v6 = vpop.f32.mrb[37].mxu0  ;;  %5265 = vmatprep.subr.bf16.mxu0 %v12573_v60  ;;  %v12637_v60 = vld [vmem:[#allocation9 + $0x5a8] ss:$16 sps:$4 sm:$0xff]  }
 0x373   : > { %v4182_v2 = vadd.f32 %v4181_v63, %v4140_v61  ;;  %v4142_v4 = vpop.f32.mrb[37].mxu1  ;;  %v4185_v10 = vpop.f32.mrb[38].mxu0  ;;  %v12640_v61 = vld [vmem:[#allocation9 + $0x6a8] ss:$16 sps:$4 sm:$0xff]   ;;  %v12645_v63 = vld [vmem:[#allocation9 + $0x5cc] ss:$16 sps:$4 sm:$0xff]  }
 0x374   : > { %v4184_v41 = vadd.f32 %v4183_v6, %v4142_v4  ;;  %v4144_v9 = vpop.f32.mrb[38].mxu1  ;;  %v4186_v49 = vpop.f32.mrb[39].mxu0  ;;  %v12646_v4 = vld [vmem:[#allocation9 + $0x6c8] ss:$16 sps:$4 sm:$0xff]   ;;  %v12651_v6 = vld [vmem:[#allocation9 + $0x5ec] ss:$16 sps:$4 sm:$0xff]  }
 0x375   : > { %v4190_v48 = vadd.f32 %v4182_v2, %v3429_v22  ;;  %v4145_v23 = vpop.f32.mrb[39].mxu1  ;;  %5266 = vmatpush1.bf16.msra.mxu0 %v12571_v11  ;;  %v12648_v2 = vld [vmem:[#allocation9 + $0x6cc] ss:$16 sps:$4 sm:$0xff]   ;;  %v12652_v9 = vld [vmem:[#allocation9 + $0x6e8] ss:$16 sps:$4 sm:$0xff]  }
 0x376   : > { %v4191_v13 = vadd.f32 %v4184_v41, %v3430_v25  ;;  %5267 = vmatprep.subr.bf16.mxu0 %v12579_v12  ;;  %v12597_v25 = vld [vmem:[#allocation9 + $0x4cc] ss:$16 sps:$4 sm:$0xff]   ;;  %v12660_v11 = vld [vmem:[#allocation9 + $0x4] ss:$16 sps:$4 sm:$0xff]   ;;  %v12658_v23 = vld [vmem:[#allocation9] ss:$16 sps:$4 sm:$0xff]  }
 0x377   : > { %v4216_v15 = vadd.f32 %v4205_v37, %v4190_v48  ;;  %v12643_v37 = vld [vmem:[#allocation9 + $0x5c8] ss:$16 sps:$4 sm:$0xff]   ;;  %v12654_v41 = vld [vmem:[#allocation9 + $0x6ec] ss:$16 sps:$4 sm:$0xff]  }
 0x378   : > { %v4217_v26 = vadd.f32 %v4209_v8, %v4191_v13  ;;  %v12649_v8 = vld [vmem:[#allocation9 + $0x5e8] ss:$16 sps:$4 sm:$0xff]   ;;  %v12657_v10 = vld [vmem:[#allocation9 + $0x70c] ss:$16 sps:$4 sm:$0xff]   ;;  %v12668_v13 = vld [vmem:[#allocation9 + $0x24] ss:$16 sps:$4 sm:$0xff]  }
 0x379   : > { %v4220_v18 = vmax.f32 %v4216_v15, 0.0  ;;  %5268 = vmatpush1.bf16.msra.mxu0 %v12577_v17  ;;  %v12655_v48 = vld [vmem:[#allocation9 + $0x708] ss:$16 sps:$4 sm:$0xff]   ;;  %v14396_v49 = vld [vmem:[#allocation2] sm:$0xff] }
 0x37a   : > { %v4221_v29 = vmax.f32 %v4217_v26, 0.0  ;;  %5269 = vmatprep.subr.bf16.mxu0 %v12585_v42  ;;  %v12665_v12 = vld [vmem:[#allocation9 + $0x72c] ss:$16 sps:$4 sm:$0xff]   ;;  %v14402_v15 = vcombine.high %v14396_v49, %v14396_v49  ;;  %v12663_v26 = vld [vmem:[#allocation9 + $0x728] ss:$16 sps:$4 sm:$0xff]  }
 0x37b   : > { %v12666_v17 = vld [vmem:[#allocation9 + $0x20] ss:$16 sps:$4 sm:$0xff]   ;;  %v12674_v42 = vld [vmem:[#allocation9 + $0x44] ss:$16 sps:$4 sm:$0xff]  }
 0x37c   : > { %v11636_v19 = vpack.c.bf16 %v4221_v29, %v4220_v18  ;;  %v12671_v18 = vld [vmem:[#allocation9 + $0x74c] ss:$16 sps:$4 sm:$0xff]   ;;  %v12669_v29 = vld [vmem:[#allocation9 + $0x748] ss:$16 sps:$4 sm:$0xff]  }
 0x37d   : > { %5270 = vmatpush1.bf16.msra.mxu0 %v12583_v21  ;;  %v12675_v21 = vld [vmem:[#allocation9 + $0x768] ss:$16 sps:$4 sm:$0xff]  }
 0x37e   : > { %v4241_v24 = vrot.slane %v11636_v19, 7  ;;  %5271 = vmatprep.subr.bf16.mxu0 %v12591_v28  ;;  %v12672_v19 = vld [vmem:[#allocation9 + $0x40] ss:$16 sps:$4 sm:$0xff]  }
 0x37f   : > { %v12678_v28 = vld [vmem:[#allocation9 + $0x60] ss:$16 sps:$4 sm:$0xff]  }
 0x380   : > { %v4243_v22 = vrot.slane %v4241_v24, 4  ;;  %4249 = vst [vmem:[#allocation2 + $0x8] sm:$0xee] %v4241_v24  ;;  %v12683_v24 = vld [vmem:[#allocation9 + $0x78c] ss:$16 sps:$4 sm:$0xff]  }
 0x381   : > { %5272 = vmatpush1.bf16.msra.mxu0 %v12589_v62  ;;  %v12681_v62 = vld [vmem:[#allocation9 + $0x788] ss:$16 sps:$4 sm:$0xff]  }
 0x382   : > { %4251 = vst [vmem:[#allocation2 + $0x18] sm:$0x11] %v4243_v22  ;;  %5273 = vmatprep.subr.bf16.mxu0 %v12597_v25  ;;  %v12686_v22 = vld [vmem:[#allocation9 + $0x84] ss:$16 sps:$4 sm:$0xff]   ;;  %v12684_v25 = vld [vmem:[#allocation9 + $0x80] ss:$16 sps:$4 sm:$0xff]  }
 0x385   : > { %5274 = vmatpush1.bf16.msra.mxu0 %v12595_v30  ;;  %v12689_v30 = vld [vmem:[#allocation9 + $0x7ac] ss:$16 sps:$4 sm:$0xff]  }
 0x386   : > { %5275 = vmatprep.subr.bf16.mxu0 %v12603_v31  ;;  %v12692_v31 = vld [vmem:[#allocation9 + $0xa4] ss:$16 sps:$4 sm:$0xff]  }
 0x389   : > { %v14391_v35 = vld [vmem:[#allocation2 + $0x8] ss:$16 sps:$4 sm:$0x1e]   ;;  %v12606_v3 = vld [vmem:[#allocation2 + $0xc] ss:$16 sps:$4 sm:$0x1e]   ;;  %5276 = vmatpush1.bf16.msra.mxu0 %v12601_v32 }
 0x38a   : > { %v4533_v36 = vrot.slane %v14391_v35, 1  ;;  %v4534_v38 = vrot.slane %v12606_v3, 1  ;;  %5277 = vmatprep.subr.bf16.mxu0 %v12609_v34  ;;  %v12687_v32 = vld [vmem:[#allocation9 + $0x7a8] ss:$16 sps:$4 sm:$0xff]   ;;  %v12690_v34 = vld [vmem:[#allocation9 + $0xa0] ss:$16 sps:$4 sm:$0xff]  }
 0x38b   : > { %v12695_v3 = vld [vmem:[#allocation9 + $0x7cc] ss:$16 sps:$4 sm:$0xff]   ;;  %v12727_v35 = vld [vmem:[#allocation9 + $0x164] ss:$16 sps:$4 sm:$0xff]  }
 0x38c   : > { %5252 = vmatprep.mubr.bf16.mxu1 %v4534_v38 }
 0x38d   : > { %5253 = vmatmul.mubr.bf16.vlgmr.msra.gmra.mrb[40].mxu1 %v4533_v36  ;;  %5278 = vmatpush1.bf16.msra.mxu0 %v12607_v40  ;;  %v12693_v40 = vld [vmem:[#allocation9 + $0x7c8] ss:$16 sps:$4 sm:$0xff]  }
 0x38e   : > { %5303 = vmatpush1.bf16.msra.mxu1 %v12610_v1  ;;  %5334 = vmatprep.mubr.bf16.mxu1 %v4534_v38  ;;  %v12698_v38 = vld [vmem:[#allocation9 + $0xc4] ss:$16 sps:$4 sm:$0xff]   ;;  %v12696_v1 = vld [vmem:[#allocation9 + $0xc0] ss:$16 sps:$4 sm:$0xff]  }
 0x38f   : > { %5279 = vmatprep.subr.bf16.mxu0 %v12615_v14  ;;  %5304 = vmatprep.subr.bf16.mxu1 %v12618_v43  ;;  %v12701_v14 = vld [vmem:[#allocation9 + $0x7ec] ss:$16 sps:$4 sm:$0xff]   ;;  %v12704_v43 = vld [vmem:[#allocation9 + $0xe4] ss:$16 sps:$4 sm:$0xff]  }
 0x391   : > { %5280 = vmatpush1.bf16.msra.mxu0 %v12613_v5  ;;  %v12699_v5 = vld [vmem:[#allocation9 + $0x7e8] ss:$16 sps:$4 sm:$0xff]  }
 0x392   : > { %5305 = vmatpush1.bf16.msra.mxu1 %v12616_v44  ;;  %5281 = vmatprep.subr.bf16.mxu0 %v12621_v45  ;;  %v12702_v44 = vld [vmem:[#allocation9 + $0xe0] ss:$16 sps:$4 sm:$0xff]   ;;  %v12707_v45 = vld [vmem:[#allocation9 + $0x104] ss:$16 sps:$4 sm:$0xff]  }
 0x393   : > { %5306 = vmatprep.subr.bf16.mxu1 %v12624_v16  ;;  %v12710_v16 = vld [vmem:[#allocation9 + $0x204] ss:$16 sps:$4 sm:$0xff]  }
 0x395   : > { %5282 = vmatpush1.bf16.msra.mxu0 %v12619_v46  ;;  %v12705_v46 = vld [vmem:[#allocation9 + $0x100] ss:$16 sps:$4 sm:$0xff]  }
 0x396   : > { %5307 = vmatpush1.bf16.msra.mxu1 %v12622_v47  ;;  %5283 = vmatprep.subr.bf16.mxu0 %v12627_v50  ;;  %v12708_v47 = vld [vmem:[#allocation9 + $0x200] ss:$16 sps:$4 sm:$0xff]   ;;  %v14405_v50 = vld [vmem:[#allocation2 + $0x8] sm:$0xff] }
 0x397   : > { %5308 = vmatprep.subr.bf16.mxu1 %v12630_v51  ;;  %v12715_v51 = vld [vmem:[#allocation9 + $0x124] ss:$16 sps:$4 sm:$0xff]  }
 0x399   : > { %5284 = vmatpush1.bf16.msra.mxu0 %v12625_v33  ;;  %v12718_v33 = vld [vmem:[#allocation9 + $0x224] ss:$16 sps:$4 sm:$0xff]  }
 0x39a   : > { %5309 = vmatpush1.bf16.msra.mxu1 %v12628_v56  ;;  %5285 = vmatprep.subr.bf16.mxu0 %v12633_v53  ;;  %v14411_v56 = vcombine.high %v14405_v50, %v14405_v50  ;;  %v12713_v53 = vld [vmem:[#allocation9 + $0x120] ss:$16 sps:$4 sm:$0xff]  }
 0x39b   : > { %5310 = vmatprep.subr.bf16.mxu1 %v12636_v54  ;;  %v12716_v54 = vld [vmem:[#allocation9 + $0x220] ss:$16 sps:$4 sm:$0xff]  }
 0x39d   : > { %5286 = vmatpush1.bf16.msra.mxu0 %v12631_v52  ;;  %v12721_v52 = vld [vmem:[#allocation9 + $0x144] ss:$16 sps:$4 sm:$0xff]  }
 0x39e   : > { %5311 = vmatpush1.bf16.msra.mxu1 %v12634_v55  ;;  %5287 = vmatprep.subr.bf16.mxu0 %v12639_v57  ;;  %v12724_v55 = vld [vmem:[#allocation9 + $0x244] ss:$16 sps:$4 sm:$0xff]   ;;  %v12719_v57 = vld [vmem:[#allocation9 + $0x140] ss:$16 sps:$4 sm:$0xff]  }
 0x39f   : > { %5312 = vmatprep.subr.bf16.mxu1 %v12642_v20  ;;  %v12722_v20 = vld [vmem:[#allocation9 + $0x240] ss:$16 sps:$4 sm:$0xff]  }
 0x3a1   : > { %5288 = vmatpush1.bf16.msra.mxu0 %v12637_v60  ;;  %v12725_v60 = vld [vmem:[#allocation9 + $0x160] ss:$16 sps:$4 sm:$0xff]  }
 0x3a2   : > { %5313 = vmatpush1.bf16.msra.mxu1 %v12640_v61  ;;  %5289 = vmatprep.subr.bf16.mxu0 %v12645_v63  ;;  %v12728_v61 = vld [vmem:[#allocation9 + $0x260] ss:$16 sps:$4 sm:$0xff]   ;;  %v12733_v63 = vld [vmem:[#allocation9 + $0x184] ss:$16 sps:$4 sm:$0xff]  }
 0x3a3   : > { %5314 = vmatprep.subr.bf16.mxu1 %v12648_v2  ;;  %v12736_v2 = vld [vmem:[#allocation9 + $0x284] ss:$16 sps:$4 sm:$0xff]  }
 0x3a5   : > { %5290 = vmatpush1.bf16.msra.mxu0 %v12643_v37  ;;  %v12731_v37 = vld [vmem:[#allocation9 + $0x180] ss:$16 sps:$4 sm:$0xff]  }
 0x3a6   : > { %5315 = vmatpush1.bf16.msra.mxu1 %v12646_v4  ;;  %5291 = vmatprep.subr.bf16.mxu0 %v12651_v6  ;;  %v12734_v4 = vld [vmem:[#allocation9 + $0x280] ss:$16 sps:$4 sm:$0xff]   ;;  %v12739_v6 = vld [vmem:[#allocation9 + $0x1a4] ss:$16 sps:$4 sm:$0xff]  }
 0x3a7   : > { %5316 = vmatprep.subr.bf16.mxu1 %v12654_v41  ;;  %v12742_v41 = vld [vmem:[#allocation9 + $0x2a4] ss:$16 sps:$4 sm:$0xff]  }
 0x3a9   : > { %5292 = vmatpush1.bf16.msra.mxu0 %v12649_v8  ;;  %v12737_v8 = vld [vmem:[#allocation9 + $0x1a0] ss:$16 sps:$4 sm:$0xff]  }
 0x3aa   : > { %5317 = vmatpush1.bf16.msra.mxu1 %v12652_v9  ;;  %5997 = vmatprep.subr.bf16.mxu0 %v12660_v11  ;;  %v12740_v9 = vld [vmem:[#allocation9 + $0x2a0] ss:$16 sps:$4 sm:$0xff]   ;;  %v12748_v11 = vld [vmem:[#allocation9 + $0x2c4] ss:$16 sps:$4 sm:$0xff]  }
 0x3ab   : > { %5318 = vmatprep.subr.bf16.mxu1 %v12657_v10  ;;  %v12745_v10 = vld [vmem:[#allocation9 + $0x1c4] ss:$16 sps:$4 sm:$0xff]  }
 0x3ac   : > { %5294 = vmatmul.mubr.bf16.vlgmr.msra.gmra.mrb[44].mxu0 %v4531_v7  ;;  %v12680_v7 = vld [vmem:[#allocation9 + $0x64] ss:$16 sps:$4 sm:$0xff]  }
 0x3ad   : > { %5998 = vmatpush1.bf16.msra.mxu0 %v12658_v23  ;;  %6029 = vmatprep.mubr.bf16.mxu0 %v14402_v15  ;;  %v12746_v23 = vld [vmem:[#allocation9 + $0x2c0] ss:$16 sps:$4 sm:$0xff]  }
 0x3ae   : > { %5319 = vmatpush1.bf16.msra.mxu1 %v12655_v48  ;;  %5999 = vmatprep.subr.bf16.mxu0 %v12668_v13  ;;  %v12743_v48 = vld [vmem:[#allocation9 + $0x1c0] ss:$16 sps:$4 sm:$0xff]   ;;  %v12754_v13 = vld [vmem:[#allocation9 + $0x2e4] ss:$16 sps:$4 sm:$0xff]  }
 0x3af   : > { %5320 = vmatprep.subr.bf16.mxu1 %v12665_v12  ;;  %v12751_v12 = vld [vmem:[#allocation9 + $0x1e4] ss:$16 sps:$4 sm:$0xff]  }
 0x3b1   : > { %6000 = vmatpush1.bf16.msra.mxu0 %v12666_v17  ;;  %v12752_v17 = vld [vmem:[#allocation9 + $0x2e0] ss:$16 sps:$4 sm:$0xff]  }
 0x3b2   : > { %5321 = vmatpush1.bf16.msra.mxu1 %v12663_v26  ;;  %6001 = vmatprep.subr.bf16.mxu0 %v12674_v42  ;;  %v12749_v26 = vld [vmem:[#allocation9 + $0x1e0] ss:$16 sps:$4 sm:$0xff]   ;;  %v12760_v42 = vld [vmem:[#allocation9 + $0xc] ss:$16 sps:$4 sm:$0xff]  }
 0x3b3   : > { %5322 = vmatprep.subr.bf16.mxu1 %v12671_v18  ;;  %v12757_v18 = vld [vmem:[#allocation9 + $0x304] ss:$16 sps:$4 sm:$0xff]  }
 0x3b5   : > { %6002 = vmatpush1.bf16.msra.mxu0 %v12672_v19  ;;  %v12758_v19 = vld [vmem:[#allocation9 + $0x8] ss:$16 sps:$4 sm:$0xff]  }
 0x3b6   : > { %5323 = vmatpush1.bf16.msra.mxu1 %v12669_v29  ;;  %6003 = vmatprep.subr.bf16.mxu0 %v12680_v7  ;;  %v12755_v29 = vld [vmem:[#allocation9 + $0x300] ss:$16 sps:$4 sm:$0xff]   ;;  %v12763_v7 = vld [vmem:[#allocation9 + $0x324] ss:$16 sps:$4 sm:$0xff]  }
 0x3b7   : > { %5324 = vmatprep.subr.bf16.mxu1 %v12677_v39  ;;  %v14416_v39 = vcombine.low %v14396_v49, %v14396_v49  ;;  %v12767_v49 = vld [vmem:[#allocation9 + $0x340] ss:$16 sps:$4 sm:$0xff]  }
 0x3b9   : > { %6004 = vmatpush1.bf16.msra.mxu0 %v12678_v28  ;;  %v12761_v28 = vld [vmem:[#allocation9 + $0x320] ss:$16 sps:$4 sm:$0xff]  }
 0x3ba   : > { %5325 = vmatpush1.bf16.msra.mxu1 %v12675_v21  ;;  %6005 = vmatprep.subr.bf16.mxu0 %v12686_v22  ;;  %v12766_v21 = vld [vmem:[#allocation9 + $0x2c] ss:$16 sps:$4 sm:$0xff]   ;;  %v12769_v22 = vld [vmem:[#allocation9 + $0x344] ss:$16 sps:$4 sm:$0xff]  }
 0x3bb   : > { %5326 = vmatprep.subr.bf16.mxu1 %v12683_v24  ;;  %v12764_v24 = vld [vmem:[#allocation9 + $0x28] ss:$16 sps:$4 sm:$0xff]  }
 0x3bd   : > { %6006 = vmatpush1.bf16.msra.mxu0 %v12684_v25  ;;  %v12770_v25 = vld [vmem:[#allocation9 + $0x48] ss:$16 sps:$4 sm:$0xff]  }
 0x3be   : > { %5327 = vmatpush1.bf16.msra.mxu1 %v12681_v62  ;;  %6007 = vmatprep.subr.bf16.mxu0 %v12692_v31  ;;  %v12772_v62 = vld [vmem:[#allocation9 + $0x4c] ss:$16 sps:$4 sm:$0xff]  }
 0x3bf   : > { %5328 = vmatprep.subr.bf16.mxu1 %v12689_v30  ;;  %v12775_v30 = vld [vmem:[#allocation9 + $0x364] ss:$16 sps:$4 sm:$0xff]   ;;  %v12778_v31 = vld [vmem:[#allocation9 + $0x6c] ss:$16 sps:$4 sm:$0xff]  }
 0x3c1   : > { %6008 = vmatpush1.bf16.msra.mxu0 %v12690_v34  ;;  %v12776_v34 = vld [vmem:[#allocation9 + $0x68] ss:$16 sps:$4 sm:$0xff]  }
 0x3c2   : > { %5329 = vmatpush1.bf16.msra.mxu1 %v12687_v32  ;;  %6009 = vmatprep.subr.bf16.mxu0 %v12698_v38  ;;  %v12773_v32 = vld [vmem:[#allocation9 + $0x360] ss:$16 sps:$4 sm:$0xff]  }
 0x3c3   : > { %5330 = vmatprep.subr.bf16.mxu1 %v12695_v3  ;;  %v12781_v3 = vld [vmem:[#allocation9 + $0x384] ss:$16 sps:$4 sm:$0xff]   ;;  %v12779_v38 = vld [vmem:[#allocation9 + $0x380] ss:$16 sps:$4 sm:$0xff]  }
 0x3c5   : > { %6010 = vmatpush1.bf16.msra.mxu0 %v12696_v1  ;;  %v12787_v1 = vld [vmem:[#allocation9 + $0x3a4] ss:$16 sps:$4 sm:$0xff]  }
 0x3c6   : > { %5331 = vmatpush1.bf16.msra.mxu1 %v12693_v40  ;;  %6011 = vmatprep.subr.bf16.mxu0 %v12704_v43  ;;  %v12782_v40 = vld [vmem:[#allocation9 + $0x88] ss:$16 sps:$4 sm:$0xff]   ;;  %v12785_v43 = vld [vmem:[#allocation9 + $0x3a0] ss:$16 sps:$4 sm:$0xff]  }
 0x3c7   : > { %5332 = vmatprep.subr.bf16.mxu1 %v12701_v14  ;;  %v12790_v14 = vld [vmem:[#allocation9 + $0xac] ss:$16 sps:$4 sm:$0xff]  }
 0x3c9   : > { %6012 = vmatpush1.bf16.msra.mxu0 %v12702_v44  ;;  %v12793_v44 = vld [vmem:[#allocation9 + $0x3c4] ss:$16 sps:$4 sm:$0xff]  }
 0x3ca   : > { %5333 = vmatpush1.bf16.msra.mxu1 %v12699_v5  ;;  %6013 = vmatprep.subr.bf16.mxu0 %v12707_v45  ;;  %v12788_v5 = vld [vmem:[#allocation9 + $0xa8] ss:$16 sps:$4 sm:$0xff]   ;;  %v12796_v45 = vld [vmem:[#allocation9 + $0xcc] ss:$16 sps:$4 sm:$0xff]  }
 0x3cb   : > { %6038 = vmatprep.subr.bf16.mxu1 %v12710_v16  ;;  %v12791_v16 = vld [vmem:[#allocation9 + $0x3c0] ss:$16 sps:$4 sm:$0xff]  }
 0x3cd   : > { %5335 = vmatmul.mubr.bf16.vlgmr.msra.gmra.mrb[44].mxu1 %v4533_v36  ;;  %6014 = vmatpush1.bf16.msra.mxu0 %v12705_v46  ;;  %v12730_v36 = vld [vmem:[#allocation9 + $0x264] ss:$16 sps:$4 sm:$0xff]   ;;  %v12794_v46 = vld [vmem:[#allocation9 + $0xc8] ss:$16 sps:$4 sm:$0xff]  }
 0x3ce   : > { %6039 = vmatpush1.bf16.msra.mxu1 %v12708_v47  ;;  %6070 = vmatprep.mubr.bf16.mxu1 %v14411_v56  ;;  %v12799_v47 = vld [vmem:[#allocation9 + $0x3e4] ss:$16 sps:$4 sm:$0xff]  }
 0x3cf   : > { %6015 = vmatprep.subr.bf16.mxu0 %v12715_v51  ;;  %6040 = vmatprep.subr.bf16.mxu1 %v12718_v33  ;;  %v12802_v51 = vld [vmem:[#allocation9 + $0xec] ss:$16 sps:$4 sm:$0xff]   ;;  %v12797_v33 = vld [vmem:[#allocation9 + $0x3e0] ss:$16 sps:$4 sm:$0xff]  }
 0x3d1   : > { %6016 = vmatpush1.bf16.msra.mxu0 %v12713_v53  ;;  %v12800_v53 = vld [vmem:[#allocation9 + $0xe8] ss:$16 sps:$4 sm:$0xff]  }
 0x3d2   : > { %6041 = vmatpush1.bf16.msra.mxu1 %v12716_v54  ;;  %6017 = vmatprep.subr.bf16.mxu0 %v12721_v52  ;;  %v12805_v54 = vld [vmem:[#allocation9 + $0x10c] ss:$16 sps:$4 sm:$0xff]  }
 0x3d3   : > { %6042 = vmatprep.subr.bf16.mxu1 %v12724_v55  ;;  %v12808_v52 = vld [vmem:[#allocation9 + $0x20c] ss:$16 sps:$4 sm:$0xff]   ;;  %v12803_v55 = vld [vmem:[#allocation9 + $0x108] ss:$16 sps:$4 sm:$0xff]  }
 0x3d5   : > { %6018 = vmatpush1.bf16.msra.mxu0 %v12719_v57  ;;  %v12806_v57 = vld [vmem:[#allocation9 + $0x208] ss:$16 sps:$4 sm:$0xff]  }
 0x3d6   : > { %6043 = vmatpush1.bf16.msra.mxu1 %v12722_v20  ;;  %6019 = vmatprep.subr.bf16.mxu0 %v12727_v35  ;;  %v14422_v20 = vcombine.low %v14405_v50, %v14405_v50  ;;  %v12811_v35 = vld [vmem:[#allocation9 + $0x12c] ss:$16 sps:$4 sm:$0xff]   ;;  %v12815_v50 = vld [vmem:[#allocation9 + $0x148] ss:$16 sps:$4 sm:$0xff]  }
 0x3d7   : > { %6044 = vmatprep.subr.bf16.mxu1 %v12730_v36  ;;  %v12814_v36 = vld [vmem:[#allocation9 + $0x22c] ss:$16 sps:$4 sm:$0xff]  }
 0x3d9   : > { %6020 = vmatpush1.bf16.msra.mxu0 %v12725_v60  ;;  %v12809_v60 = vld [vmem:[#allocation9 + $0x128] ss:$16 sps:$4 sm:$0xff]  }
 0x3da   : > { %6045 = vmatpush1.bf16.msra.mxu1 %v12728_v61  ;;  %6021 = vmatprep.subr.bf16.mxu0 %v12733_v63  ;;  %v12812_v61 = vld [vmem:[#allocation9 + $0x228] ss:$16 sps:$4 sm:$0xff]   ;;  %v12817_v63 = vld [vmem:[#allocation9 + $0x14c] ss:$16 sps:$4 sm:$0xff]  }
 0x3db   : > { %6046 = vmatprep.subr.bf16.mxu1 %v12736_v2  ;;  %v12820_v2 = vld [vmem:[#allocation9 + $0x24c] ss:$16 sps:$4 sm:$0xff]  }
 0x3dd   : > { %6022 = vmatpush1.bf16.msra.mxu0 %v12731_v37  ;;  %v12818_v37 = vld [vmem:[#allocation9 + $0x248] ss:$16 sps:$4 sm:$0xff]  }
 0x3de   : > { %6047 = vmatpush1.bf16.msra.mxu1 %v12734_v4  ;;  %6023 = vmatprep.subr.bf16.mxu0 %v12739_v6  ;;  %v12823_v4 = vld [vmem:[#allocation9 + $0x16c] ss:$16 sps:$4 sm:$0xff]  }
 0x3df   : > { %6048 = vmatprep.subr.bf16.mxu1 %v12742_v41  ;;  %v12826_v6 = vld [vmem:[#allocation9 + $0x26c] ss:$16 sps:$4 sm:$0xff]   ;;  %v12821_v41 = vld [vmem:[#allocation9 + $0x168] ss:$16 sps:$4 sm:$0xff]  }
 0x3e1   : > { %6024 = vmatpush1.bf16.msra.mxu0 %v12737_v8  ;;  %v12824_v8 = vld [vmem:[#allocation9 + $0x268] ss:$16 sps:$4 sm:$0xff]  }
 0x3e2   : > { %6049 = vmatpush1.bf16.msra.mxu1 %v12740_v9  ;;  %6025 = vmatprep.subr.bf16.mxu0 %v12745_v10  ;;  %v12829_v9 = vld [vmem:[#allocation9 + $0x18c] ss:$16 sps:$4 sm:$0xff]   ;;  %v12827_v10 = vld [vmem:[#allocation9 + $0x188] ss:$16 sps:$4 sm:$0xff]  }
 0x3e3   : > { %6050 = vmatprep.subr.bf16.mxu1 %v12748_v11  ;;  %v12830_v11 = vld [vmem:[#allocation9 + $0x288] ss:$16 sps:$4 sm:$0xff]  }
 0x3e5   : > { %6026 = vmatpush1.bf16.msra.mxu0 %v12743_v48  ;;  %v12835_v48 = vld [vmem:[#allocation9 + $0x1ac] ss:$16 sps:$4 sm:$0xff]  }
 0x3e6   : > { %6051 = vmatpush1.bf16.msra.mxu1 %v12746_v23  ;;  %6027 = vmatprep.subr.bf16.mxu0 %v12751_v12  ;;  %v12838_v23 = vld [vmem:[#allocation9 + $0x2ac] ss:$16 sps:$4 sm:$0xff]   ;;  %v12833_v12 = vld [vmem:[#allocation9 + $0x1a8] ss:$16 sps:$4 sm:$0xff]  }
 0x3e7   : > { %6052 = vmatprep.subr.bf16.mxu1 %v12754_v13  ;;  %v12836_v13 = vld [vmem:[#allocation9 + $0x2a8] ss:$16 sps:$4 sm:$0xff]  }
 0x3e9   : > { %6028 = vmatpush1.bf16.msra.mxu0 %v12749_v26  ;;  %v12841_v26 = vld [vmem:[#allocation9 + $0x1cc] ss:$16 sps:$4 sm:$0xff]  }
 0x3ea   : > { %6053 = vmatpush1.bf16.msra.mxu1 %v12752_v17  ;;  %6079 = vmatprep.subr.bf16.mxu0 %v12760_v42  ;;  %v12844_v17 = vld [vmem:[#allocation9 + $0x2cc] ss:$16 sps:$4 sm:$0xff]   ;;  %v12842_v42 = vld [vmem:[#allocation9 + $0x2c8] ss:$16 sps:$4 sm:$0xff]  }
 0x3eb   : > { %6054 = vmatprep.subr.bf16.mxu1 %v12757_v18  ;;  %v12839_v18 = vld [vmem:[#allocation9 + $0x1c8] ss:$16 sps:$4 sm:$0xff]  }
 0x3ec   : > { %6030 = vmatmul.mubr.bf16.vlgmr.msra.gmra.mrb[48].mxu0 %v14416_v39 }
 0x3ed   : > { %6080 = vmatpush1.bf16.msra.mxu0 %v12758_v19  ;;  %6111 = vmatprep.mubr.bf16.mxu0 %v14402_v15  ;;  %v12784_v15 = vld [vmem:[#allocation9 + $0x8c] ss:$16 sps:$4 sm:$0xff]  }
 0x3ee   : > { %6055 = vmatpush1.bf16.msra.mxu1 %v12755_v29  ;;  %6081 = vmatprep.subr.bf16.mxu0 %v12766_v21  ;;  %v12847_v29 = vld [vmem:[#allocation9 + $0x1ec] ss:$16 sps:$4 sm:$0xff]   ;;  %v12848_v21 = vld [vmem:[#allocation9 + $0x2e8] ss:$16 sps:$4 sm:$0xff]  }
 0x3ef   : > { %6056 = vmatprep.subr.bf16.mxu1 %v12763_v7  ;;  %v12850_v19 = vld [vmem:[#allocation9 + $0x2ec] ss:$16 sps:$4 sm:$0xff]   ;;  %v12845_v7 = vld [vmem:[#allocation9 + $0x1e8] ss:$16 sps:$4 sm:$0xff]  }
 0x3f1   : > { %6082 = vmatpush1.bf16.msra.mxu0 %v12764_v24  ;;  %v12856_v24 = vld [vmem:[#allocation9 + $0x804] ss:$16 sps:$4 sm:$0xff]  }
 0x3f2   : > { %6057 = vmatpush1.bf16.msra.mxu1 %v12761_v28  ;;  %6083 = vmatprep.subr.bf16.mxu0 %v12772_v62  ;;  %v12853_v28 = vld [vmem:[#allocation9 + $0x30c] ss:$16 sps:$4 sm:$0xff]   ;;  %v12851_v62 = vld [vmem:[#allocation9 + $0x308] ss:$16 sps:$4 sm:$0xff]  }
 0x3f3   : > { %6058 = vmatprep.subr.bf16.mxu1 %v12769_v22  ;;  %v14426_v22 = vld [vmem:[#allocation2 + $0x4] ss:$16 sps:$4 sm:$0x3c]  }
 0x3f5   : > { %6084 = vmatpush1.bf16.msra.mxu0 %v12770_v25  ;;  %v12862_v25 = vld [vmem:[#allocation9 + $0x32c] ss:$16 sps:$4 sm:$0xff]  }
 0x3f6   : > { %6059 = vmatpush1.bf16.msra.mxu1 %v12767_v49  ;;  %6085 = vmatprep.subr.bf16.mxu0 %v12778_v31  ;;  %v12854_v49 = vld [vmem:[#allocation9 + $0x800] ss:$16 sps:$4 sm:$0xff]   ;;  %v6311_v31 = vrot.slane %v14426_v22, 2  ;;  %v12979_v22 = vld [vmem:[#allocation9 + $0xb84] ss:$16 sps:$4 sm:$0xff]  }
 0x3f7   : > { %6060 = vmatprep.subr.bf16.mxu1 %v12775_v30  ;;  %v12865_v30 = vld [vmem:[#allocation9 + $0x824] ss:$16 sps:$4 sm:$0xff]  }
 0x3f9   : > { %6086 = vmatpush1.bf16.msra.mxu0 %v12776_v34  ;;  %v12863_v34 = vld [vmem:[#allocation9 + $0x820] ss:$16 sps:$4 sm:$0xff]  }
 0x3fa   : > { %6061 = vmatpush1.bf16.msra.mxu1 %v12773_v32  ;;  %6087 = vmatprep.subr.bf16.mxu0 %v12784_v15  ;;  %v12860_v32 = vld [vmem:[#allocation9 + $0x328] ss:$16 sps:$4 sm:$0xff]   ;;  %v12871_v15 = vld [vmem:[#allocation9 + $0x844] ss:$16 sps:$4 sm:$0xff]  }
 0x3fb   : > { %6062 = vmatprep.subr.bf16.mxu1 %v12781_v3  ;;  %v12868_v3 = vld [vmem:[#allocation9 + $0x34c] ss:$16 sps:$4 sm:$0xff]  }
 0x3fd   : > { %6088 = vmatpush1.bf16.msra.mxu0 %v12782_v40  ;;  %v12869_v40 = vld [vmem:[#allocation9 + $0x840] ss:$16 sps:$4 sm:$0xff]  }
 0x3fe   : > { %6063 = vmatpush1.bf16.msra.mxu1 %v12779_v38  ;;  %6089 = vmatprep.subr.bf16.mxu0 %v12790_v14  ;;  %v12866_v38 = vld [vmem:[#allocation9 + $0x348] ss:$16 sps:$4 sm:$0xff]  }
 0x3ff   : > { %6064 = vmatprep.subr.bf16.mxu1 %v12787_v1  ;;  %v12877_v1 = vld [vmem:[#allocation9 + $0x864] ss:$16 sps:$4 sm:$0xff]   ;;  %v12872_v14 = vld [vmem:[#allocation9 + $0x368] ss:$16 sps:$4 sm:$0xff]  }
 0x401   : > { %6090 = vmatpush1.bf16.msra.mxu0 %v12788_v5  ;;  %v12880_v5 = vld [vmem:[#allocation9 + $0x38c] ss:$16 sps:$4 sm:$0xff]  }
 0x402   : > { %6065 = vmatpush1.bf16.msra.mxu1 %v12785_v43  ;;  %6091 = vmatprep.subr.bf16.mxu0 %v12796_v45  ;;  %v12875_v43 = vld [vmem:[#allocation9 + $0x860] ss:$16 sps:$4 sm:$0xff]   ;;  %v12878_v45 = vld [vmem:[#allocation9 + $0x388] ss:$16 sps:$4 sm:$0xff]  }
 0x403   : > { %6066 = vmatprep.subr.bf16.mxu1 %v12793_v44  ;;  %v12883_v44 = vld [vmem:[#allocation9 + $0x884] ss:$16 sps:$4 sm:$0xff]  }
 0x405   : > { %6092 = vmatpush1.bf16.msra.mxu0 %v12794_v46  ;;  %v12886_v46 = vld [vmem:[#allocation9 + $0x3ac] ss:$16 sps:$4 sm:$0xff]  }
 0x406   : > { %6067 = vmatpush1.bf16.msra.mxu1 %v12791_v16  ;;  %6093 = vmatprep.subr.bf16.mxu0 %v12802_v51  ;;  %v12881_v16 = vld [vmem:[#allocation9 + $0x880] ss:$16 sps:$4 sm:$0xff]   ;;  %v12884_v51 = vld [vmem:[#allocation9 + $0x3a8] ss:$16 sps:$4 sm:$0xff]  }
 0x407   : > { %6068 = vmatprep.subr.bf16.mxu1 %v12799_v47  ;;  %v12889_v47 = vld [vmem:[#allocation9 + $0x8a4] ss:$16 sps:$4 sm:$0xff]  }
 0x409   : > { %6094 = vmatpush1.bf16.msra.mxu0 %v12800_v53  ;;  %v12892_v53 = vld [vmem:[#allocation9 + $0x3cc] ss:$16 sps:$4 sm:$0xff]  }
 0x40a   : > { %6069 = vmatpush1.bf16.msra.mxu1 %v12797_v33  ;;  %6095 = vmatprep.subr.bf16.mxu0 %v12805_v54  ;;  %v12887_v33 = vld [vmem:[#allocation9 + $0x8a0] ss:$16 sps:$4 sm:$0xff]   ;;  %v12895_v54 = vld [vmem:[#allocation9 + $0x8c4] ss:$16 sps:$4 sm:$0xff]  }
 0x40b   : > { %6120 = vmatprep.subr.bf16.mxu1 %v12808_v52 }
 0x40d   : > { %6071 = vmatmul.mubr.bf16.vlgmr.msra.gmra.mrb[48].mxu1 %v14422_v20  ;;  %6096 = vmatpush1.bf16.msra.mxu0 %v12803_v55 }
 0x40e   : > { %6121 = vmatpush1.bf16.msra.mxu1 %v12806_v57  ;;  %6152 = vmatprep.mubr.bf16.mxu1 %v14411_v56  ;;  %v12832_v56 = vld [vmem:[#allocation9 + $0x28c] ss:$16 sps:$4 sm:$0xff]  }
 0x40f   : > { %6097 = vmatprep.subr.bf16.mxu0 %v12811_v35  ;;  %6122 = vmatprep.subr.bf16.mxu1 %v12814_v36  ;;  %v12890_v35 = vld [vmem:[#allocation9 + $0x3c8] ss:$16 sps:$4 sm:$0xff]   ;;  %v12893_v36 = vld [vmem:[#allocation9 + $0x8c0] ss:$16 sps:$4 sm:$0xff]  }
 0x411   : > { %6098 = vmatpush1.bf16.msra.mxu0 %v12809_v60 }
 0x412   : > { %6123 = vmatpush1.bf16.msra.mxu1 %v12812_v61  ;;  %6099 = vmatprep.subr.bf16.mxu0 %v12817_v63  ;;  %v12898_v61 = vld [vmem:[#allocation9 + $0x3ec] ss:$16 sps:$4 sm:$0xff]   ;;  %v12901_v63 = vld [vmem:[#allocation9 + $0x8e4] ss:$16 sps:$4 sm:$0xff]  }
 0x413   : > { %6124 = vmatprep.subr.bf16.mxu1 %v12820_v2  ;;  %v12896_v2 = vld [vmem:[#allocation9 + $0x3e8] ss:$16 sps:$4 sm:$0xff]  }
 0x415   : > { %6100 = vmatpush1.bf16.msra.mxu0 %v12815_v50  ;;  %v12899_v50 = vld [vmem:[#allocation9 + $0x8e0] ss:$16 sps:$4 sm:$0xff]  }
 0x416   : > { %6125 = vmatpush1.bf16.msra.mxu1 %v12818_v37  ;;  %6101 = vmatprep.subr.bf16.mxu0 %v12823_v4  ;;  %v12904_v37 = vld [vmem:[#allocation9 + $0x904] ss:$16 sps:$4 sm:$0xff]  }
 0x417   : > { %6126 = vmatprep.subr.bf16.mxu1 %v12826_v6  ;;  %v12907_v4 = vld [vmem:[#allocation9 + $0xa04] ss:$16 sps:$4 sm:$0xff]   ;;  %v14436_v6 = vld [vmem:[#allocation2 + $0xc] ss:$16 sps:$4 sm:$0x3c]  }
 0x419   : > { %6102 = vmatpush1.bf16.msra.mxu0 %v12821_v41  ;;  %v12902_v41 = vld [vmem:[#allocation9 + $0x900] ss:$16 sps:$4 sm:$0xff]  }
 0x41a   : > { %6127 = vmatpush1.bf16.msra.mxu1 %v12824_v8  ;;  %6103 = vmatprep.subr.bf16.mxu0 %v12829_v9  ;;  %v12905_v8 = vld [vmem:[#allocation9 + $0xa00] ss:$16 sps:$4 sm:$0xff]   ;;  %v12913_v9 = vld [vmem:[#allocation9 + $0x924] ss:$16 sps:$4 sm:$0xff]  }
 0x41b   : > { %6128 = vmatprep.subr.bf16.mxu1 %v12832_v56  ;;  %v12916_v56 = vld [vmem:[#allocation9 + $0xa24] ss:$16 sps:$4 sm:$0xff]  }
 0x41d   : > { %6104 = vmatpush1.bf16.msra.mxu0 %v12827_v10  ;;  %v6313_v10 = vrot.slane %v14436_v6, 2  ;;  %v13027_v6 = vld [vmem:[#allocation9 + $0x98c] ss:$16 sps:$4 sm:$0xff]  }
 0x41e   : > { %6129 = vmatpush1.bf16.msra.mxu1 %v12830_v11  ;;  %6105 = vmatprep.subr.bf16.mxu0 %v12835_v48  ;;  %v12911_v11 = vld [vmem:[#allocation9 + $0x920] ss:$16 sps:$4 sm:$0xff]  }
 0x41f   : > { %6130 = vmatprep.subr.bf16.mxu1 %v12838_v23  ;;  %v12914_v48 = vld [vmem:[#allocation9 + $0xa20] ss:$16 sps:$4 sm:$0xff]   ;;  %v12919_v23 = vld [vmem:[#allocation9 + $0x944] ss:$16 sps:$4 sm:$0xff]  }
 0x421   : > { %6106 = vmatpush1.bf16.msra.mxu0 %v12833_v12  ;;  %v12922_v12 = vld [vmem:[#allocation9 + $0xa44] ss:$16 sps:$4 sm:$0xff]  }
 0x422   : > { %6131 = vmatpush1.bf16.msra.mxu1 %v12836_v13  ;;  %6107 = vmatprep.subr.bf16.mxu0 %v12841_v26  ;;  %v12917_v13 = vld [vmem:[#allocation9 + $0x940] ss:$16 sps:$4 sm:$0xff]  }
 0x423   : > { %6132 = vmatprep.subr.bf16.mxu1 %v12844_v17  ;;  %v12920_v26 = vld [vmem:[#allocation9 + $0xa40] ss:$16 sps:$4 sm:$0xff]   ;;  %v12928_v17 = vld [vmem:[#allocation9 + $0xa64] ss:$16 sps:$4 sm:$0xff]  }
 0x425   : > { %6108 = vmatpush1.bf16.msra.mxu0 %v12839_v18  ;;  %v12923_v18 = vld [vmem:[#allocation9 + $0x960] ss:$16 sps:$4 sm:$0xff]  }
 0x426   : > { %6133 = vmatpush1.bf16.msra.mxu1 %v12842_v42  ;;  %6109 = vmatprep.subr.bf16.mxu0 %v12847_v29  ;;  %v12926_v42 = vld [vmem:[#allocation9 + $0xa60] ss:$16 sps:$4 sm:$0xff]   ;;  %v12931_v29 = vld [vmem:[#allocation9 + $0x984] ss:$16 sps:$4 sm:$0xff]  }
 0x427   : > { %6134 = vmatprep.subr.bf16.mxu1 %v12850_v19  ;;  %v12934_v19 = vld [vmem:[#allocation9 + $0xa84] ss:$16 sps:$4 sm:$0xff]  }
 0x429   : > { %6110 = vmatpush1.bf16.msra.mxu0 %v12845_v7  ;;  %v12929_v7 = vld [vmem:[#allocation9 + $0x980] ss:$16 sps:$4 sm:$0xff]  }
 0x42a   : > { %6135 = vmatpush1.bf16.msra.mxu1 %v12848_v21  ;;  %6958 = vmatprep.subr.bf16.mxu0 %v12856_v24  ;;  %v12932_v21 = vld [vmem:[#allocation9 + $0xa80] ss:$16 sps:$4 sm:$0xff]   ;;  %v12940_v24 = vld [vmem:[#allocation9 + $0xaa4] ss:$16 sps:$4 sm:$0xff]  }
 0x42b   : > { %6136 = vmatprep.subr.bf16.mxu1 %v12853_v28  ;;  %v12937_v28 = vld [vmem:[#allocation9 + $0x9a4] ss:$16 sps:$4 sm:$0xff]  }
 0x42c   : > { %6112 = vmatmul.mubr.bf16.vlgmr.msra.gmra.mrb[52].mxu0 %v14416_v39  ;;  %v12874_v39 = vld [vmem:[#allocation9 + $0x36c] ss:$16 sps:$4 sm:$0xff]  }
 0x42d   : > { %6959 = vmatpush1.bf16.msra.mxu0 %v12854_v49  ;;  %6990 = vmatprep.mubr.bf16.mxu0 %v6311_v31  ;;  %v12938_v49 = vld [vmem:[#allocation9 + $0xaa0] ss:$16 sps:$4 sm:$0xff]  }
 0x42e   : > { %6137 = vmatpush1.bf16.msra.mxu1 %v12851_v62  ;;  %6960 = vmatprep.subr.bf16.mxu0 %v12865_v30  ;;  %v12935_v62 = vld [vmem:[#allocation9 + $0x9a0] ss:$16 sps:$4 sm:$0xff]   ;;  %v12946_v30 = vld [vmem:[#allocation9 + $0xac4] ss:$16 sps:$4 sm:$0xff]  }
 0x42f   : > { %6138 = vmatprep.subr.bf16.mxu1 %v12862_v25  ;;  %v12943_v25 = vld [vmem:[#allocation9 + $0x9c4] ss:$16 sps:$4 sm:$0xff]  }
 0x431   : > { %6961 = vmatpush1.bf16.msra.mxu0 %v12863_v34 }
 0x432   : > { %6139 = vmatpush1.bf16.msra.mxu1 %v12860_v32  ;;  %6962 = vmatprep.subr.bf16.mxu0 %v12871_v15 }
 0x433   : > { %6140 = vmatprep.subr.bf16.mxu1 %v12868_v3 }
 0x435   : > { %6963 = vmatpush1.bf16.msra.mxu0 %v12869_v40  ;;  %v12941_v40 = vld [vmem:[#allocation9 + $0x9c0] ss:$16 sps:$4 sm:$0xff]  }
 0x436   : > { %6141 = vmatpush1.bf16.msra.mxu1 %v12866_v38  ;;  %6964 = vmatprep.subr.bf16.mxu0 %v12877_v1 }
 0x437   : > { %6142 = vmatprep.subr.bf16.mxu1 %v12874_v39  ;;  %v12944_v39 = vld [vmem:[#allocation9 + $0xac0] ss:$16 sps:$4 sm:$0xff]  }
 0x439   : > { %6965 = vmatpush1.bf16.msra.mxu0 %v12875_v43  ;;  %v12952_v43 = vld [vmem:[#allocation9 + $0xae4] ss:$16 sps:$4 sm:$0xff]  }
 0x43a   : > { %6143 = vmatpush1.bf16.msra.mxu1 %v12872_v14  ;;  %6966 = vmatprep.subr.bf16.mxu0 %v12883_v44  ;;  %v12949_v14 = vld [vmem:[#allocation9 + $0x9e4] ss:$16 sps:$4 sm:$0xff]   ;;  %v12947_v44 = vld [vmem:[#allocation9 + $0x9e0] ss:$16 sps:$4 sm:$0xff]  }
 0x43b   : > { %6144 = vmatprep.subr.bf16.mxu1 %v12880_v5  ;;  %v14448_v5 = vld [vmem:[#allocation2] ss:$16 sps:$4 sm:$0x3c]  }
 0x43d   : > { %6967 = vmatpush1.bf16.msra.mxu0 %v12881_v16  ;;  %v12955_v16 = vld [vmem:[#allocation9 + $0xb04] ss:$16 sps:$4 sm:$0xff]  }
 0x43e   : > { %6145 = vmatpush1.bf16.msra.mxu1 %v12878_v45  ;;  %6968 = vmatprep.subr.bf16.mxu0 %v12889_v47  ;;  %v12950_v45 = vld [vmem:[#allocation9 + $0xae0] ss:$16 sps:$4 sm:$0xff]  }
 0x43f   : > { %6146 = vmatprep.subr.bf16.mxu1 %v12886_v46  ;;  %v14432_v52 = vpop.f32.mrb[40].mxu0  ;;  %v12958_v46 = vld [vmem:[#allocation9 + $0x80c] ss:$16 sps:$4 sm:$0xff]   ;;  %v12953_v47 = vld [vmem:[#allocation9 + $0xb00] ss:$16 sps:$4 sm:$0xff]  }
 0x440   : > { %v14434_v55 = vpop.f32.mrb[41].mxu0 }
 0x441   : > { %6969 = vmatpush1.bf16.msra.mxu0 %v12887_v33  ;;  %v5217_v57 = vpop.f32.mrb[42].mxu0  ;;  %v6310_v33 = vrot.slane %v14448_v5, 2  ;;  %v13069_v5 = vld [vmem:[#allocation9 + $0xbcc] ss:$16 sps:$4 sm:$0xff]  }
 0x442   : > { %6147 = vmatpush1.bf16.msra.mxu1 %v12884_v51  ;;  %v5218_v60 = vpop.f32.mrb[43].mxu0  ;;  %6970 = vmatprep.subr.bf16.mxu0 %v12895_v54  ;;  %v12956_v51 = vld [vmem:[#allocation9 + $0x808] ss:$16 sps:$4 sm:$0xff]   ;;  %v12964_v54 = vld [vmem:[#allocation9 + $0x82c] ss:$16 sps:$4 sm:$0xff]  }
 0x443   : > { %6148 = vmatprep.subr.bf16.mxu1 %v12892_v53  ;;  %v12961_v53 = vld [vmem:[#allocation9 + $0xb24] ss:$16 sps:$4 sm:$0xff]   ;;  %v12968_v60 = vld [vmem:[#allocation9 + $0x848] ss:$16 sps:$4 sm:$0xff]  }
 0x444   : > { %v12967_v57 = vld [vmem:[#allocation9 + $0xb44] ss:$16 sps:$4 sm:$0xff]  }
 0x445   : > { %6971 = vmatpush1.bf16.msra.mxu0 %v12893_v36  ;;  %v12965_v36 = vld [vmem:[#allocation9 + $0xb40] ss:$16 sps:$4 sm:$0xff]  }
 0x446   : > { %6149 = vmatpush1.bf16.msra.mxu1 %v12890_v35  ;;  %6972 = vmatprep.subr.bf16.mxu0 %v12901_v63  ;;  %v12970_v35 = vld [vmem:[#allocation9 + $0x84c] ss:$16 sps:$4 sm:$0xff]  }
 0x447   : > { %6150 = vmatprep.subr.bf16.mxu1 %v12898_v61  ;;  %v12973_v61 = vld [vmem:[#allocation9 + $0xb64] ss:$16 sps:$4 sm:$0xff]   ;;  %v12976_v63 = vld [vmem:[#allocation9 + $0x86c] ss:$16 sps:$4 sm:$0xff]  }
 0x449   : > { %6973 = vmatpush1.bf16.msra.mxu0 %v12899_v50  ;;  %v12974_v50 = vld [vmem:[#allocation9 + $0x868] ss:$16 sps:$4 sm:$0xff]  }
 0x44a   : > { %6151 = vmatpush1.bf16.msra.mxu1 %v12896_v2  ;;  %6974 = vmatprep.subr.bf16.mxu0 %v12904_v37  ;;  %v12971_v2 = vld [vmem:[#allocation9 + $0xb60] ss:$16 sps:$4 sm:$0xff]  }
 0x44b   : > { %6999 = vmatprep.subr.bf16.mxu1 %v12907_v4  ;;  %v12977_v37 = vld [vmem:[#allocation9 + $0xb80] ss:$16 sps:$4 sm:$0xff]   ;;  %v12980_v4 = vld [vmem:[#allocation9 + $0x888] ss:$16 sps:$4 sm:$0xff]  }
 0x44d   : > { %6153 = vmatmul.mubr.bf16.vlgmr.msra.gmra.mrb[52].mxu1 %v14422_v20  ;;  %6975 = vmatpush1.bf16.msra.mxu0 %v12902_v41  ;;  %v12925_v20 = vld [vmem:[#allocation9 + $0x964] ss:$16 sps:$4 sm:$0xff]  }
 0x44e   : > { %7000 = vmatpush1.bf16.msra.mxu1 %v12905_v8  ;;  %7031 = vmatprep.mubr.bf16.mxu1 %v6313_v10  ;;  %v12985_v41 = vld [vmem:[#allocation9 + $0xba4] ss:$16 sps:$4 sm:$0xff]   ;;  %v12988_v8 = vld [vmem:[#allocation9 + $0x8ac] ss:$16 sps:$4 sm:$0xff]  }
 0x44f   : > { %6976 = vmatprep.subr.bf16.mxu0 %v12913_v9  ;;  %7001 = vmatprep.subr.bf16.mxu1 %v12916_v56  ;;  %v12983_v9 = vld [vmem:[#allocation9 + $0xba0] ss:$16 sps:$4 sm:$0xff]   ;;  %v12986_v56 = vld [vmem:[#allocation9 + $0x8a8] ss:$16 sps:$4 sm:$0xff]  }
 0x451   : > { %6977 = vmatpush1.bf16.msra.mxu0 %v12911_v11  ;;  %v12991_v11 = vld [vmem:[#allocation9 + $0xbc4] ss:$16 sps:$4 sm:$0xff]  }
 0x452   : > { %7002 = vmatpush1.bf16.msra.mxu1 %v12914_v48  ;;  %6978 = vmatprep.subr.bf16.mxu0 %v12919_v23  ;;  %v12994_v48 = vld [vmem:[#allocation9 + $0x8cc] ss:$16 sps:$4 sm:$0xff]  }
 0x453   : > { %7003 = vmatprep.subr.bf16.mxu1 %v12922_v12 }
 0x455   : > { %6979 = vmatpush1.bf16.msra.mxu0 %v12917_v13 }
 0x456   : > { %7004 = vmatpush1.bf16.msra.mxu1 %v12920_v26  ;;  %6980 = vmatprep.subr.bf16.mxu0 %v12925_v20  ;;  %v12989_v26 = vld [vmem:[#allocation9 + $0xbc0] ss:$16 sps:$4 sm:$0xff]   ;;  %v12992_v20 = vld [vmem:[#allocation9 + $0x8c8] ss:$16 sps:$4 sm:$0xff]  }
 0x457   : > { %7005 = vmatprep.subr.bf16.mxu1 %v12928_v17 }
 0x459   : > { %6981 = vmatpush1.bf16.msra.mxu0 %v12923_v18  ;;  %v12997_v18 = vld [vmem:[#allocation9 + $0xbe4] ss:$16 sps:$4 sm:$0xff]  }
 0x45a   : > { %7006 = vmatpush1.bf16.msra.mxu1 %v12926_v42  ;;  %6982 = vmatprep.subr.bf16.mxu0 %v12931_v29  ;;  %v13000_v42 = vld [vmem:[#allocation9 + $0x8ec] ss:$16 sps:$4 sm:$0xff]   ;;  %v14459_v29 = vld [vmem:[#allocation2 + $0x8] ss:$16 sps:$4 sm:$0x3c]  }
 0x45b   : > { %7007 = vmatprep.subr.bf16.mxu1 %v12934_v19  ;;  %v12995_v19 = vld [vmem:[#allocation9 + $0xbe0] ss:$16 sps:$4 sm:$0xff]  }
 0x45d   : > { %6983 = vmatpush1.bf16.msra.mxu0 %v12929_v7  ;;  %v12998_v7 = vld [vmem:[#allocation9 + $0x8e8] ss:$16 sps:$4 sm:$0xff]  }
 0x45e   : > { %7008 = vmatpush1.bf16.msra.mxu1 %v12932_v21  ;;  %6984 = vmatprep.subr.bf16.mxu0 %v12937_v28  ;;  %v13003_v21 = vld [vmem:[#allocation9 + $0x90c] ss:$16 sps:$4 sm:$0xff]  }
 0x45f   : > { %7009 = vmatprep.subr.bf16.mxu1 %v12940_v24  ;;  %v13006_v28 = vld [vmem:[#allocation9 + $0xa0c] ss:$16 sps:$4 sm:$0xff]   ;;  %v13001_v24 = vld [vmem:[#allocation9 + $0x908] ss:$16 sps:$4 sm:$0xff]  }
 0x460   : > { %v5254_v32 = vpop.f32.mrb[40].mxu1 }
 0x461   : > { %v14443_v34 = vadd.f32 %v5254_v32, %v14432_v52  ;;  %v5256_v3 = vpop.f32.mrb[41].mxu1  ;;  %6985 = vmatpush1.bf16.msra.mxu0 %v12935_v62  ;;  %v12959_v52 = vld [vmem:[#allocation9 + $0xb20] ss:$16 sps:$4 sm:$0xff]   ;;  %v13004_v62 = vld [vmem:[#allocation9 + $0xa08] ss:$16 sps:$4 sm:$0xff]  }
 0x462   : > { %v14446_v15 = vadd.f32 %v5256_v3, %v14434_v55  ;;  %7010 = vmatpush1.bf16.msra.mxu1 %v12938_v49  ;;  %v5258_v38 = vpop.f32.mrb[42].mxu1  ;;  %6986 = vmatprep.subr.bf16.mxu0 %v12943_v25  ;;  %v12962_v55 = vld [vmem:[#allocation9 + $0x828] ss:$16 sps:$4 sm:$0xff]   ;;  %v6312_v49 = vrot.slane %v14459_v29, 2  ;;  %v13009_v25 = vld [vmem:[#allocation9 + $0x92c] ss:$16 sps:$4 sm:$0xff]  }
 0x463   : > { %v5259_v1 = vpop.f32.mrb[43].mxu1  ;;  %7011 = vmatprep.subr.bf16.mxu1 %v12946_v30  ;;  %v13012_v30 = vld [vmem:[#allocation9 + $0xa2c] ss:$16 sps:$4 sm:$0xff]   ;;  %v13007_v32 = vld [vmem:[#allocation9 + $0x928] ss:$16 sps:$4 sm:$0xff]  }
 0x464   : > { %v13010_v3 = vld [vmem:[#allocation9 + $0xa28] ss:$16 sps:$4 sm:$0xff]   ;;  %v13015_v38 = vld [vmem:[#allocation9 + $0x94c] ss:$16 sps:$4 sm:$0xff]  }
 0x465   : > { %6987 = vmatpush1.bf16.msra.mxu0 %v12941_v40  ;;  %v13018_v40 = vld [vmem:[#allocation9 + $0xa4c] ss:$16 sps:$4 sm:$0xff]   ;;  %v13016_v1 = vld [vmem:[#allocation9 + $0xa48] ss:$16 sps:$4 sm:$0xff]  }
 0x466   : > { %7012 = vmatpush1.bf16.msra.mxu1 %v12944_v39  ;;  %6988 = vmatprep.subr.bf16.mxu0 %v12949_v14  ;;  %v13013_v39 = vld [vmem:[#allocation9 + $0x948] ss:$16 sps:$4 sm:$0xff]   ;;  %v13021_v14 = vld [vmem:[#allocation9 + $0x96c] ss:$16 sps:$4 sm:$0xff]  }
 0x467   : > { %7013 = vmatprep.subr.bf16.mxu1 %v12952_v43  ;;  %v13024_v43 = vld [vmem:[#allocation9 + $0xa6c] ss:$16 sps:$4 sm:$0xff]  }
 0x469   : > { %6989 = vmatpush1.bf16.msra.mxu0 %v12947_v44  ;;  %v13019_v44 = vld [vmem:[#allocation9 + $0x968] ss:$16 sps:$4 sm:$0xff]  }
 0x46a   : > { %7014 = vmatpush1.bf16.msra.mxu1 %v12950_v45  ;;  %7040 = vmatprep.subr.bf16.mxu0 %v12958_v46  ;;  %v13022_v45 = vld [vmem:[#allocation9 + $0xa68] ss:$16 sps:$4 sm:$0xff]  }
 0x46b   : > { %7015 = vmatprep.subr.bf16.mxu1 %v12955_v16  ;;  %v13025_v16 = vld [vmem:[#allocation9 + $0x988] ss:$16 sps:$4 sm:$0xff]  }
 0x46c   : > { %6991 = vmatmul.mubr.bf16.vlgmr.msra.gmra.mrb[56].mxu0 %v6310_v33  ;;  %v13028_v46 = vld [vmem:[#allocation9 + $0xa88] ss:$16 sps:$4 sm:$0xff]  }
 0x46d   : > { %7041 = vmatpush1.bf16.msra.mxu0 %v12956_v51  ;;  %7072 = vmatprep.mubr.bf16.mxu0 %v6311_v31  ;;  %v12982_v31 = vld [vmem:[#allocation9 + $0x88c] ss:$16 sps:$4 sm:$0xff]  }
 0x46e   : > { %7016 = vmatpush1.bf16.msra.mxu1 %v12953_v47  ;;  %7042 = vmatprep.subr.bf16.mxu0 %v12964_v54  ;;  %v13033_v47 = vld [vmem:[#allocation9 + $0x9ac] ss:$16 sps:$4 sm:$0xff]   ;;  %v13034_v54 = vld [vmem:[#allocation9 + $0xaa8] ss:$16 sps:$4 sm:$0xff]  }
 0x46f   : > { %7017 = vmatprep.subr.bf16.mxu1 %v12961_v53  ;;  %v13036_v51 = vld [vmem:[#allocation9 + $0xaac] ss:$16 sps:$4 sm:$0xff]   ;;  %v13031_v53 = vld [vmem:[#allocation9 + $0x9a8] ss:$16 sps:$4 sm:$0xff]  }
 0x471   : > { %7043 = vmatpush1.bf16.msra.mxu0 %v12962_v55  ;;  %v13042_v55 = vld [vmem:[#allocation9 + $0xacc] ss:$16 sps:$4 sm:$0xff]  }
 0x472   : > { %7018 = vmatpush1.bf16.msra.mxu1 %v12959_v52  ;;  %7044 = vmatprep.subr.bf16.mxu0 %v12970_v35  ;;  %v13039_v52 = vld [vmem:[#allocation9 + $0x9cc] ss:$16 sps:$4 sm:$0xff]  }
 0x473   : > { %7019 = vmatprep.subr.bf16.mxu1 %v12967_v57 }
 0x475   : > { %7045 = vmatpush1.bf16.msra.mxu0 %v12968_v60 }
 0x476   : > { %7020 = vmatpush1.bf16.msra.mxu1 %v12965_v36  ;;  %7046 = vmatprep.subr.bf16.mxu0 %v12976_v63  ;;  %v13037_v63 = vld [vmem:[#allocation9 + $0x9c8] ss:$16 sps:$4 sm:$0xff]  }
 0x477   : > { %7021 = vmatprep.subr.bf16.mxu1 %v12973_v61 }
 0x479   : > { %7047 = vmatpush1.bf16.msra.mxu0 %v12974_v50 }
 0x47a   : > { %7022 = vmatpush1.bf16.msra.mxu1 %v12971_v2  ;;  %7048 = vmatprep.subr.bf16.mxu0 %v12982_v31  ;;  %v13040_v2 = vld [vmem:[#allocation9 + $0xac8] ss:$16 sps:$4 sm:$0xff]   ;;  %v13048_v31 = vld [vmem:[#allocation9 + $0xaec] ss:$16 sps:$4 sm:$0xff]  }
 0x47b   : > { %7023 = vmatprep.subr.bf16.mxu1 %v12979_v22  ;;  %v13045_v22 = vld [vmem:[#allocation9 + $0x9ec] ss:$16 sps:$4 sm:$0xff]  }
 0x47d   : > { %7049 = vmatpush1.bf16.msra.mxu0 %v12980_v4  ;;  %v13046_v4 = vld [vmem:[#allocation9 + $0xae8] ss:$16 sps:$4 sm:$0xff]  }
 0x47e   : > { %7024 = vmatpush1.bf16.msra.mxu1 %v12977_v37  ;;  %7050 = vmatprep.subr.bf16.mxu0 %v12988_v8  ;;  %v13043_v37 = vld [vmem:[#allocation9 + $0x9e8] ss:$16 sps:$4 sm:$0xff]  }
 0x47f   : > { %7025 = vmatprep.subr.bf16.mxu1 %v12985_v41  ;;  %v14455_v23 = vpop.f32.mrb[44].mxu0  ;;  %v13051_v41 = vld [vmem:[#allocation9 + $0xb0c] ss:$16 sps:$4 sm:$0xff]   ;;  %v13049_v8 = vld [vmem:[#allocation9 + $0xb08] ss:$16 sps:$4 sm:$0xff]  }
 0x480   : > { %v14457_v12 = vpop.f32.mrb[45].mxu0 }
 0x481   : > { %v5299_v13 = vpop.f32.mrb[46].mxu0  ;;  %7051 = vmatpush1.bf16.msra.mxu0 %v12986_v56  ;;  %v13052_v56 = vld [vmem:[#allocation9 + $0xb28] ss:$16 sps:$4 sm:$0xff]  }
 0x482   : > { %7026 = vmatpush1.bf16.msra.mxu1 %v12983_v9  ;;  %v5300_v17 = vpop.f32.mrb[47].mxu0  ;;  %7052 = vmatprep.subr.bf16.mxu0 %v12994_v48  ;;  %v13054_v9 = vld [vmem:[#allocation9 + $0xb2c] ss:$16 sps:$4 sm:$0xff]   ;;  %v13055_v48 = vld [vmem:[#allocation9 + $0xb48] ss:$16 sps:$4 sm:$0xff]  }
 0x483   : > { %7027 = vmatprep.subr.bf16.mxu1 %v12991_v11  ;;  %v13057_v11 = vld [vmem:[#allocation9 + $0xb4c] ss:$16 sps:$4 sm:$0xff]   ;;  %v13064_v17 = vld [vmem:[#allocation9 + $0xba8] ss:$16 sps:$4 sm:$0xff]  }
 0x484   : > { %v13063_v13 = vld [vmem:[#allocation9 + $0xb8c] ss:$16 sps:$4 sm:$0xff]  }
 0x485   : > { %7053 = vmatpush1.bf16.msra.mxu0 %v12992_v20  ;;  %v13066_v20 = vld [vmem:[#allocation9 + $0xbac] ss:$16 sps:$4 sm:$0xff]  }
 0x486   : > { %7028 = vmatpush1.bf16.msra.mxu1 %v12989_v26  ;;  %7054 = vmatprep.subr.bf16.mxu0 %v13000_v42  ;;  %v13061_v26 = vld [vmem:[#allocation9 + $0xb88] ss:$16 sps:$4 sm:$0xff]  }
 0x487   : > { %7029 = vmatprep.subr.bf16.mxu1 %v12997_v18 }
 0x489   : > { %7055 = vmatpush1.bf16.msra.mxu0 %v12998_v7 }
 0x48a   : > { %7030 = vmatpush1.bf16.msra.mxu1 %v12995_v19  ;;  %7056 = vmatprep.subr.bf16.mxu0 %v13003_v21  ;;  %v13067_v21 = vld [vmem:[#allocation9 + $0xbc8] ss:$16 sps:$4 sm:$0xff]  }
 0x48b   : > { %7081 = vmatprep.subr.bf16.mxu1 %v13006_v28  ;;  %v13072_v28 = vld [vmem:[#allocation9 + $0xbec] ss:$16 sps:$4 sm:$0xff]  }
 0x48d   : > { %7032 = vmatmul.mubr.bf16.vlgmr.msra.gmra.mrb[56].mxu1 %v6312_v49  ;;  %7057 = vmatpush1.bf16.msra.mxu0 %v13001_v24 }
 0x48e   : > { %7082 = vmatpush1.bf16.msra.mxu1 %v13004_v62  ;;  %7113 = vmatprep.mubr.bf16.mxu1 %v6313_v10  ;;  %v13030_v10 = vld [vmem:[#allocation9 + $0xa8c] ss:$16 sps:$4 sm:$0xff]   ;;  %v13073_v62 = vld [vmem:[#allocation12 + $0x400] ss:$16 sps:$4 sm:$0xff]  }
 0x48f   : > { %7058 = vmatprep.subr.bf16.mxu0 %v13009_v25  ;;  %7083 = vmatprep.subr.bf16.mxu1 %v13012_v30  ;;  %v13075_v25 = vld [vmem:[#allocation12 + $0x404] ss:$16 sps:$4 sm:$0xff]  }
 0x490   : > { %v13078_v30 = vld [vmem:[#allocation12 + $0x424] ss:$16 sps:$4 sm:$0xff]  }
 0x491   : > { %7059 = vmatpush1.bf16.msra.mxu0 %v13007_v32  ;;  %v13070_v32 = vld [vmem:[#allocation9 + $0xbe8] ss:$16 sps:$4 sm:$0xff]  }
 0x492   : > { %7084 = vmatpush1.bf16.msra.mxu1 %v13010_v3  ;;  %7060 = vmatprep.subr.bf16.mxu0 %v13015_v38  ;;  %v13076_v3 = vld [vmem:[#allocation12 + $0x420] ss:$16 sps:$4 sm:$0xff]   ;;  %v13084_v38 = vld [vmem:[#allocation12 + $0x464] ss:$16 sps:$4 sm:$0xff]  }
 0x493   : > { %7085 = vmatprep.subr.bf16.mxu1 %v13018_v40  ;;  %v13082_v40 = vld [vmem:[#allocation12 + $0x460] ss:$16 sps:$4 sm:$0xff]  }
 0x495   : > { %7061 = vmatpush1.bf16.msra.mxu0 %v13013_v39  ;;  %v13087_v39 = vld [vmem:[#allocation12 + $0x484] ss:$16 sps:$4 sm:$0xff]  }
 0x496   : > { %7086 = vmatpush1.bf16.msra.mxu1 %v13016_v1  ;;  %7062 = vmatprep.subr.bf16.mxu0 %v13021_v14  ;;  %v13085_v1 = vld [vmem:[#allocation12 + $0x480] ss:$16 sps:$4 sm:$0xff]   ;;  %v13090_v14 = vld [vmem:[#allocation12 + $0x4a4] ss:$16 sps:$4 sm:$0xff]  }
 0x497   : > { %7087 = vmatprep.subr.bf16.mxu1 %v13024_v43  ;;  %v13088_v43 = vld [vmem:[#allocation12 + $0x4a0] ss:$16 sps:$4 sm:$0xff]  }
 0x499   : > { %7063 = vmatpush1.bf16.msra.mxu0 %v13019_v44  ;;  %v13093_v44 = vld [vmem:[#allocation12 + $0x4c4] ss:$16 sps:$4 sm:$0xff]  }
 0x49a   : > { %7088 = vmatpush1.bf16.msra.mxu1 %v13022_v45  ;;  %7064 = vmatprep.subr.bf16.mxu0 %v13027_v6  ;;  %v13091_v45 = vld [vmem:[#allocation12 + $0x4c0] ss:$16 sps:$4 sm:$0xff]  }
 0x49b   : > { %7089 = vmatprep.subr.bf16.mxu1 %v13030_v10  ;;  %v13096_v10 = vld [vmem:[#allocation12 + $0x4e4] ss:$16 sps:$4 sm:$0xff]  }
 0x49d   : > { %7065 = vmatpush1.bf16.msra.mxu0 %v13025_v16  ;;  %v13094_v16 = vld [vmem:[#allocation12 + $0x4e0] ss:$16 sps:$4 sm:$0xff]  }
 0x49e   : > { %7090 = vmatpush1.bf16.msra.mxu1 %v13028_v46  ;;  %7066 = vmatprep.subr.bf16.mxu0 %v13033_v47 }
 0x49f   : > { %7091 = vmatprep.subr.bf16.mxu1 %v13036_v51 }
 0x4a0   : > { %v5336_v57 = vpop.f32.mrb[44].mxu1 }
 0x4a1   : > { %v14467_v35 = vadd.f32 %v5336_v57, %v14455_v23  ;;  %v5338_v36 = vpop.f32.mrb[45].mxu1  ;;  %7067 = vmatpush1.bf16.msra.mxu0 %v13031_v53  ;;  %v13060_v23 = vld [vmem:[#allocation9 + $0xb6c] ss:$16 sps:$4 sm:$0xff]   ;;  %v13099_v53 = vld [vmem:[#allocation12 + $0x504] ss:$16 sps:$4 sm:$0xff]  }
 0x4a2   : > { %v14470_v60 = vadd.f32 %v5338_v36, %v14457_v12  ;;  %v5340_v61 = vpop.f32.mrb[46].mxu1  ;;  %7092 = vmatpush1.bf16.msra.mxu1 %v13034_v54  ;;  %7068 = vmatprep.subr.bf16.mxu0 %v13039_v52  ;;  %v13058_v12 = vld [vmem:[#allocation9 + $0xb68] ss:$16 sps:$4 sm:$0xff]   ;;  %v13097_v54 = vld [vmem:[#allocation12 + $0x500] ss:$16 sps:$4 sm:$0xff]  }
 0x4a3   : > { %v5341_v50 = vpop.f32.mrb[47].mxu1  ;;  %7093 = vmatprep.subr.bf16.mxu1 %v13042_v55  ;;  %v7167_v52 = vld [vmem:[#allocation3] sm:$0x33]  ;;  %v7170_v55 = vld [vmem:[#allocation3 + $0x8] sm:$0x33] }
 0x4a4   : > { %v7180_v57 = vld [vmem:[#allocation3 + $0x10] sm:$0x66]  ;;  %v7183_v61 = vld [vmem:[#allocation3 + $0x18] sm:$0x66]  ;;  %v7171_v50 = vsel %vm14482_vm10, 0, %v7170_v55 }
 0x4a5   : > { %7069 = vmatpush1.bf16.msra.mxu0 %v13037_v63  ;;  %v13100_v63 = vld [vmem:[#allocation12 + $0x520] ss:$16 sps:$4 sm:$0xff]   ;;  %7172 = vst [vmem:[#allocation3 + $0x8] sm:$0x33] %v7171_v50 }
 0x4a6   : > { %7094 = vmatpush1.bf16.msra.mxu1 %v13040_v2  ;;  %7070 = vmatprep.subr.bf16.mxu0 %v13045_v22  ;;  %v7168_v2 = vsel %vm14482_vm10, 0, %v7167_v52  ;;  %v13102_v22 = vld [vmem:[#allocation12 + $0x524] ss:$16 sps:$4 sm:$0xff]   ;;  %v13184_v55 = vld [vmem:[#allocation12 + $0x740] ss:$16 sps:$4 sm:$0xff]  }
 0x4a7   : > { %7095 = vmatprep.subr.bf16.mxu1 %v13048_v31  ;;  %v13105_v31 = vld [vmem:[#allocation12 + $0x544] ss:$16 sps:$4 sm:$0xff]   ;;  %7169 = vst [vmem:[#allocation3] sm:$0x33] %v7168_v2  ;;  %v13196_v2 = vld [vmem:[#allocation12 + $0x780] ss:$16 sps:$4 sm:$0xff]  }
 0x4a8   : > { %v13186_v52 = vld [vmem:[#allocation12 + $0x744] ss:$16 sps:$4 sm:$0xff]   ;;  %v13202_v50 = vld [vmem:[#allocation12 + $0x7a0] ss:$16 sps:$4 sm:$0xff]  }
 0x4a9   : > { %7071 = vmatpush1.bf16.msra.mxu0 %v13043_v37  ;;  %v7181_v37 = vsel %vm7179_vm13, 0, %v7180_v57  ;;  %v13192_v57 = vld [vmem:[#allocation12 + $0x764] ss:$16 sps:$4 sm:$0xff]  }
 0x4aa   : > { %7096 = vmatpush1.bf16.msra.mxu1 %v13046_v4  ;;  %8190 = vmatprep.subr.bf16.mxu0 %v13075_v25  ;;  %v7184_v4 = vsel %vm7179_vm13, 0, %v7183_v61  ;;  %7182 = vst [vmem:[#allocation3 + $0x10] sm:$0x66] %v7181_v37  ;;  %v13130_v25 = vld [vmem:[#allocation12 + $0x620] ss:$16 sps:$4 sm:$0xff]  }
 0x4ab   : > { %7097 = vmatprep.subr.bf16.mxu1 %v13051_v41  ;;  %v13103_v41 = vld [vmem:[#allocation12 + $0x540] ss:$16 sps:$4 sm:$0xff]   ;;  %7185 = vst [vmem:[#allocation3 + $0x18] sm:$0x66] %v7184_v4  ;;  %v13210_v37 = vld [vmem:[#allocation12 + $0x7c4] ss:$16 sps:$4 sm:$0xff]  }
 0x4ac   : > { %7073 = vmatmul.mubr.bf16.vlgmr.msra.gmra.mrb[60].mxu0 %v6310_v33  ;;  %v13190_v61 = vld [vmem:[#allocation12 + $0x760] ss:$16 sps:$4 sm:$0xff]  }
 0x4ad   : > { %8191 = vmatpush1.bf16.msra.mxu0 %v13073_v62  ;;  %v13124_v62 = vld [vmem:[#allocation12 + $0x600] ss:$16 sps:$4 sm:$0xff]  }
 0x4ae   : > { %7098 = vmatpush1.bf16.msra.mxu1 %v13049_v8  ;;  %8192 = vmatprep.subr.bf16.mxu0 %v13078_v30  ;;  %v13108_v8 = vld [vmem:[#allocation12 + $0x564] ss:$16 sps:$4 sm:$0xff]   ;;  %v13214_v4 = vld [vmem:[#allocation12 + $0x7e0] ss:$16 sps:$4 sm:$0xff]  }
 0x4af   : > { %7099 = vmatprep.subr.bf16.mxu1 %v13054_v9  ;;  %v13132_v30 = vld [vmem:[#allocation12 + $0x624] ss:$16 sps:$4 sm:$0xff]  }
 0x4b1   : > { %8193 = vmatpush1.bf16.msra.mxu0 %v13076_v3  ;;  %v13144_v3 = vld [vmem:[#allocation12 + $0x664] ss:$16 sps:$4 sm:$0xff]  }
 0x4b2   : > { %7100 = vmatpush1.bf16.msra.mxu1 %v13052_v56  ;;  %v13219_v56 = vld [vmem:[#allocation12 + $0x5ec] ss:$16 sps:$4 sm:$0xff]  }
 0x4b3   : > { %7101 = vmatprep.subr.bf16.mxu1 %v13057_v11  ;;  %v13106_v11 = vld [vmem:[#allocation12 + $0x560] ss:$16 sps:$4 sm:$0xff]  }
 0x4b6   : > { %7102 = vmatpush1.bf16.msra.mxu1 %v13055_v48  ;;  %v13111_v48 = vld [vmem:[#allocation12 + $0x584] ss:$16 sps:$4 sm:$0xff]  }
 0x4b7   : > { %7103 = vmatprep.subr.bf16.mxu1 %v13060_v23  ;;  %v13109_v23 = vld [vmem:[#allocation12 + $0x580] ss:$16 sps:$4 sm:$0xff]  }
 0x4ba   : > { %7104 = vmatpush1.bf16.msra.mxu1 %v13058_v12  ;;  %v13114_v12 = vld [vmem:[#allocation12 + $0x5a4] ss:$16 sps:$4 sm:$0xff]  }
 0x4bb   : > { %7105 = vmatprep.subr.bf16.mxu1 %v13063_v13  ;;  %v13112_v13 = vld [vmem:[#allocation12 + $0x5a0] ss:$16 sps:$4 sm:$0xff]  }
 0x4be   : > { %7106 = vmatpush1.bf16.msra.mxu1 %v13061_v26  ;;  %v13117_v26 = vld [vmem:[#allocation12 + $0x5c4] ss:$16 sps:$4 sm:$0xff]  }
 0x4bf   : > { %7107 = vmatprep.subr.bf16.mxu1 %v13066_v20  ;;  %v6031_v33 = vpop.f32.mrb[48].mxu0  ;;  %v13115_v20 = vld [vmem:[#allocation12 + $0x5c0] ss:$16 sps:$4 sm:$0xff]  }
 0x4c0   : > { %v6032_v18 = vadd.f32 %v6031_v33, %v14443_v34  ;;  %v6033_v42 = vpop.f32.mrb[49].mxu0  ;;  %v13081_v34 = vld [vmem:[#allocation12 + $0x444] ss:$16 sps:$4 sm:$0xff]  }
 0x4c1   : > { %v6034_v19 = vadd.f32 %v6033_v42, %v14446_v15  ;;  %v6035_v7 = vpop.f32.mrb[50].mxu0  ;;  %v13079_v15 = vld [vmem:[#allocation12 + $0x440] ss:$16 sps:$4 sm:$0xff]   ;;  %8194 = vmatprep.subr.bf16.mxu0 %v13081_v34 }
 0x4c2   : > { %7108 = vmatpush1.bf16.msra.mxu1 %v13064_v17  ;;  %v6036_v24 = vpop.f32.mrb[51].mxu0  ;;  %8195 = vmatpush1.bf16.msra.mxu0 %v13079_v15  ;;  %v13148_v34 = vld [vmem:[#allocation12 + $0x680] ss:$16 sps:$4 sm:$0xff]   ;;  %v13150_v15 = vld [vmem:[#allocation12 + $0x684] ss:$16 sps:$4 sm:$0xff]  }
 0x4c3   : > { %7109 = vmatprep.subr.bf16.mxu1 %v13069_v5  ;;  %8196 = vmatprep.subr.bf16.mxu0 %v13084_v38  ;;  %v13120_v5 = vld [vmem:[#allocation12 + $0x5e4] ss:$16 sps:$4 sm:$0xff]   ;;  %v13129_v24 = vld [vmem:[#allocation12 + $0x40c] ss:$16 sps:$4 sm:$0xff]   ;;  %v13154_v38 = vld [vmem:[#allocation12 + $0x6a0] ss:$16 sps:$4 sm:$0xff]  }
 0x4c6   : > { %7110 = vmatpush1.bf16.msra.mxu1 %v13067_v21  ;;  %8197 = vmatpush1.bf16.msra.mxu0 %v13082_v40  ;;  %v13118_v21 = vld [vmem:[#allocation12 + $0x5e0] ss:$16 sps:$4 sm:$0xff]   ;;  %v13156_v40 = vld [vmem:[#allocation12 + $0x6a4] ss:$16 sps:$4 sm:$0xff]  }
 0x4c7   : > { %7111 = vmatprep.subr.bf16.mxu1 %v13072_v28  ;;  %8198 = vmatprep.subr.bf16.mxu0 %v13087_v39  ;;  %v13126_v28 = vld [vmem:[#allocation12 + $0x604] ss:$16 sps:$4 sm:$0xff]   ;;  %v13160_v39 = vld [vmem:[#allocation12 + $0x6c0] ss:$16 sps:$4 sm:$0xff]  }
 0x4ca   : > { %7112 = vmatpush1.bf16.msra.mxu1 %v13070_v32  ;;  %8199 = vmatpush1.bf16.msra.mxu0 %v13085_v1  ;;  %v13138_v32 = vld [vmem:[#allocation12 + $0x644] ss:$16 sps:$4 sm:$0xff]  }
 0x4cb   : > { %8200 = vmatprep.subr.bf16.mxu0 %v13090_v14  ;;  %8231 = vmatprep.subr.bf16.mxu1 %v13126_v28  ;;  %v13162_v1 = vld [vmem:[#allocation12 + $0x6c4] ss:$16 sps:$4 sm:$0xff]  }
 0x4cd   : > { %7114 = vmatmul.mubr.bf16.vlgmr.msra.gmra.mrb[60].mxu1 %v6312_v49 }
 0x4ce   : > { %8201 = vmatpush1.bf16.msra.mxu0 %v13088_v43  ;;  %8232 = vmatpush1.bf16.msra.mxu1 %v13124_v62  ;;  %v13168_v43 = vld [vmem:[#allocation12 + $0x6e4] ss:$16 sps:$4 sm:$0xff]  }
 0x4cf   : > { %8202 = vmatprep.subr.bf16.mxu0 %v13093_v44  ;;  %8233 = vmatprep.subr.bf16.mxu1 %v13132_v30 }
 0x4d2   : > { %8203 = vmatpush1.bf16.msra.mxu0 %v13091_v45  ;;  %8234 = vmatpush1.bf16.msra.mxu1 %v13130_v25 }
 0x4d3   : > { %8204 = vmatprep.subr.bf16.mxu0 %v13096_v10  ;;  %8235 = vmatprep.subr.bf16.mxu1 %v13138_v32 }
 0x4d6   : > { %8205 = vmatpush1.bf16.msra.mxu0 %v13094_v16 }
 0x4d7   : > { %8206 = vmatprep.subr.bf16.mxu0 %v13099_v53  ;;  %v13180_v53 = vld [vmem:[#allocation12 + $0x724] ss:$16 sps:$4 sm:$0xff]  }
 0x4da   : > { %8207 = vmatpush1.bf16.msra.mxu0 %v13097_v54  ;;  %v13178_v54 = vld [vmem:[#allocation12 + $0x720] ss:$16 sps:$4 sm:$0xff]  }
 0x4db   : > { %8208 = vmatprep.subr.bf16.mxu0 %v13102_v22  ;;  %v13204_v22 = vld [vmem:[#allocation12 + $0x7a4] ss:$16 sps:$4 sm:$0xff]  }
 0x4de   : > { %8209 = vmatpush1.bf16.msra.mxu0 %v13100_v63  ;;  %v13198_v63 = vld [vmem:[#allocation12 + $0x784] ss:$16 sps:$4 sm:$0xff]  }
 0x4df   : > { %8210 = vmatprep.subr.bf16.mxu0 %v13105_v31  ;;  %v13208_v31 = vld [vmem:[#allocation12 + $0x7c0] ss:$16 sps:$4 sm:$0xff]  }
 0x4e0   : > { %v6072_v6 = vpop.f32.mrb[48].mxu1 }
 0x4e1   : > { %v14478_v29 = vadd.f32 %v6072_v6, %v6032_v18  ;;  %v6074_v49 = vpop.f32.mrb[49].mxu1  ;;  %v13166_v6 = vld [vmem:[#allocation12 + $0x6e0] ss:$16 sps:$4 sm:$0xff]  }
 0x4e2   : > { %v14480_v46 = vadd.f32 %v6074_v49, %v6034_v19  ;;  %v6076_v47 = vpop.f32.mrb[50].mxu1  ;;  %8211 = vmatpush1.bf16.msra.mxu0 %v13103_v41  ;;  %v13216_v41 = vld [vmem:[#allocation12 + $0x7e4] ss:$16 sps:$4 sm:$0xff]  }
 0x4e3   : > { %v6077_v51 = vpop.f32.mrb[51].mxu1  ;;  %8212 = vmatprep.subr.bf16.mxu0 %v13108_v8  ;;  %v13174_v47 = vld [vmem:[#allocation12 + $0x704] ss:$16 sps:$4 sm:$0xff]  }
 0x4e4   : > { %v13172_v51 = vld [vmem:[#allocation12 + $0x700] ss:$16 sps:$4 sm:$0xff]  }
 0x4e6   : > { %8213 = vmatpush1.bf16.msra.mxu0 %v13106_v11 }
 0x4e7   : > { %8214 = vmatprep.subr.bf16.mxu0 %v13111_v48 }
 0x4ea   : > { %8215 = vmatpush1.bf16.msra.mxu0 %v13109_v23 }
 0x4eb   : > { %8216 = vmatprep.subr.bf16.mxu0 %v13114_v12  ;;  %v13225_v12 = vld [vmem:[#allocation12 + $0x60c] ss:$16 sps:$4 sm:$0xff]  }
 0x4ee   : > { %8217 = vmatpush1.bf16.msra.mxu0 %v13112_v13  ;;  %v14513_v13 = vld [vmem:[#allocation10] sm:$0xf] }
 0x4ef   : > { %8218 = vmatprep.subr.bf16.mxu0 %v13117_v26 }
 0x4f2   : > { %8219 = vmatpush1.bf16.msra.mxu0 %v13115_v20 }
 0x4f3   : > { %8220 = vmatprep.subr.bf16.mxu0 %v13120_v5 }
 0x4f6   : > { %8221 = vmatpush1.bf16.msra.mxu0 %v13118_v21 }
 0x4f7   : > { %8272 = vmatprep.subr.bf16.mxu0 %v13129_v24 }
 0x4ff   : > { %v6113_v17 = vpop.f32.mrb[52].mxu0 }
 0x500   : > { %v6114_v33 = vadd.f32 %v6113_v17, %v14467_v35  ;;  %v6115_v18 = vpop.f32.mrb[53].mxu0  ;;  %v13136_v35 = vld [vmem:[#allocation12 + $0x640] ss:$16 sps:$4 sm:$0xff]   ;;  %v7131_v17 = vrot.slane %v14513_v13, %v14374_v0 }
 0x501   : > { %v6116_v42 = vadd.f32 %v6115_v18, %v14470_v60  ;;  %v6117_v19 = vpop.f32.mrb[54].mxu0  ;;  %8236 = vmatpush1.bf16.msra.mxu1 %v13136_v35  ;;  %v13142_v60 = vld [vmem:[#allocation12 + $0x660] ss:$16 sps:$4 sm:$0xff]   ;;  %v7135_v18 = vrot.slane %v14513_v13, %v14376_v27 }
 0x502   : > { %v6118_v7 = vpop.f32.mrb[55].mxu0  ;;  %8237 = vmatprep.subr.bf16.mxu1 %v13144_v3 }
 0x505   : > { %8238 = vmatpush1.bf16.msra.mxu1 %v13142_v60 }
 0x506   : > { %8239 = vmatprep.subr.bf16.mxu1 %v13150_v15 }
 0x509   : > { %8240 = vmatpush1.bf16.msra.mxu1 %v13148_v34  ;;  %v7223_v34 = vld [vmem:[#allocation3] sm:$0xee] }
 0x50a   : > { %8241 = vmatprep.subr.bf16.mxu1 %v13156_v40 }
 0x50d   : > { %8242 = vmatpush1.bf16.msra.mxu1 %v13154_v38  ;;  %v7229_v38 = vld [vmem:[#allocation3 + $0x10] sm:$0x33] }
 0x50e   : > { %8243 = vmatprep.subr.bf16.mxu1 %v13162_v1 }
 0x511   : > { %8244 = vmatpush1.bf16.msra.mxu1 %v13160_v39 }
 0x512   : > { %8245 = vmatprep.subr.bf16.mxu1 %v13168_v43 }
 0x515   : > { %8246 = vmatpush1.bf16.msra.mxu1 %v13166_v6 }
 0x516   : > { %8247 = vmatprep.subr.bf16.mxu1 %v13174_v47 }
 0x519   : > { %8248 = vmatpush1.bf16.msra.mxu1 %v13172_v51 }
 0x51a   : > { %8249 = vmatprep.subr.bf16.mxu1 %v13180_v53 }
 0x51d   : > { %8250 = vmatpush1.bf16.msra.mxu1 %v13178_v54 }
 0x51e   : > { %8251 = vmatprep.subr.bf16.mxu1 %v13186_v52 }
 0x520   : > { %v6154_v14 = vpop.f32.mrb[52].mxu1 }
 0x521   : > { %v14509_v44 = vadd.f32 %v6154_v14, %v6114_v33  ;;  %v6156_v45 = vpop.f32.mrb[53].mxu1  ;;  %8252 = vmatpush1.bf16.msra.mxu1 %v13184_v55 }
 0x522   : > { %v14511_v10 = vadd.f32 %v6156_v45, %v6116_v42  ;;  %v6158_v49 = vpop.f32.mrb[54].mxu1  ;;  %8253 = vmatprep.subr.bf16.mxu1 %v13192_v57 }
 0x523   : > { %v6159_v16 = vpop.f32.mrb[55].mxu1 }
 0x525   : > { %8254 = vmatpush1.bf16.msra.mxu1 %v13190_v61 }
 0x526   : > { %8255 = vmatprep.subr.bf16.mxu1 %v13198_v63  ;;  %v13127_v63 = vld [vmem:[#allocation12 + $0x408] ss:$16 sps:$4 sm:$0xff]  }
 0x529   : > { %8256 = vmatpush1.bf16.msra.mxu1 %v13196_v2  ;;  %v13135_v2 = vld [vmem:[#allocation12 + $0x42c] ss:$16 sps:$4 sm:$0xff]  }
 0x52a   : > { %8257 = vmatprep.subr.bf16.mxu1 %v13204_v22  ;;  %v13141_v22 = vld [vmem:[#allocation12 + $0x44c] ss:$16 sps:$4 sm:$0xff]  }
 0x52d   : > { %8258 = vmatpush1.bf16.msra.mxu1 %v13202_v50  ;;  %v13133_v50 = vld [vmem:[#allocation12 + $0x428] ss:$16 sps:$4 sm:$0xff]  }
 0x52e   : > { %8259 = vmatprep.subr.bf16.mxu1 %v13210_v37  ;;  %v13147_v37 = vld [vmem:[#allocation12 + $0x46c] ss:$16 sps:$4 sm:$0xff]  }
 0x531   : > { %8260 = vmatpush1.bf16.msra.mxu1 %v13208_v31  ;;  %v13139_v31 = vld [vmem:[#allocation12 + $0x448] ss:$16 sps:$4 sm:$0xff]  }
 0x532   : > { %8261 = vmatprep.subr.bf16.mxu1 %v13216_v41  ;;  %v13153_v41 = vld [vmem:[#allocation12 + $0x48c] ss:$16 sps:$4 sm:$0xff]  }
 0x535   : > { %8262 = vmatpush1.bf16.msra.mxu1 %v13214_v4  ;;  %v13145_v4 = vld [vmem:[#allocation12 + $0x468] ss:$16 sps:$4 sm:$0xff]  }
 0x536   : > { %8313 = vmatprep.subr.bf16.mxu1 %v13225_v12  ;;  %v13163_v12 = vld [vmem:[#allocation12 + $0x4c8] ss:$16 sps:$4 sm:$0xff]  }
 0x53f   : > { %v6992_v8 = vpop.f32.mrb[56].mxu0 }
 0x540   : > { %v6994_v11 = vpop.f32.mrb[57].mxu0 }
 0x541   : > { %v6996_v48 = vpop.f32.mrb[58].mxu0 }
 0x542   : > { %v6997_v23 = vpop.f32.mrb[59].mxu0  ;;  %v13157_v48 = vld [vmem:[#allocation12 + $0x4a8] ss:$16 sps:$4 sm:$0xff]  }
 0x543   : > { %v13165_v23 = vld [vmem:[#allocation12 + $0x4cc] ss:$16 sps:$4 sm:$0xff]  }
 0x560   : > { %v7033_v26 = vpop.f32.mrb[56].mxu1 }
 0x561   : > { %v7034_v20 = vadd.f32 %v7033_v26, %v6992_v8  ;;  %v7035_v5 = vpop.f32.mrb[57].mxu1  ;;  %v13151_v8 = vld [vmem:[#allocation12 + $0x488] ss:$16 sps:$4 sm:$0xff]   ;;  %v13171_v26 = vld [vmem:[#allocation12 + $0x4ec] ss:$16 sps:$4 sm:$0xff]  }
 0x562   : > { %v7036_v33 = vadd.f32 %v7035_v5, %v6994_v11  ;;  %v7037_v42 = vpop.f32.mrb[58].mxu1  ;;  %v13159_v11 = vld [vmem:[#allocation12 + $0x4ac] ss:$16 sps:$4 sm:$0xff]  }
 0x563   : > { %v7122_v19 = vadd.f32 %v7034_v20, %v14478_v29  ;;  %v7038_v7 = vpop.f32.mrb[59].mxu1  ;;  %v13169_v20 = vld [vmem:[#allocation12 + $0x4e8] ss:$16 sps:$4 sm:$0xff]   ;;  %v13177_v5 = vld [vmem:[#allocation12 + $0x50c] ss:$16 sps:$4 sm:$0xff]  }
 0x564   : > { %v7123_v21 = vadd.f32 %v7036_v33, %v14480_v46  ;;  %v7143_v7 = vrot.slane %v14513_v13, %v14387_v59 }
 0x565   : > { %v7148_v28 = vadd.f32 %v7131_v17, %v7122_v19 }
 0x566   : > { %v7149_v24 = vadd.f32 %v7135_v18, %v7123_v21  ;;  %v7139_v18 = vrot.slane %v14513_v13, %v14385_v58  ;;  %v13187_v13 = vld [vmem:[#allocation12 + $0x548] ss:$16 sps:$4 sm:$0xff]  }
 0x567   : > { %v7152_v62 = vmax.f32 %v7148_v28, 0.0 }
 0x568   : > { %v7153_v25 = vmax.f32 %v7149_v24, 0.0 }
 0x56a   : > { %v11637_v30 = vpack.c.bf16 %v7153_v25, %v7152_v62  ;;  %v13175_v62 = vld [vmem:[#allocation12 + $0x508] ss:$16 sps:$4 sm:$0xff]  }
 0x56c   : > { %v7197_v35 = vshrl.u32 %v11637_v30, 16  ;;  %v7200_v32 = vshll.u32 %v11637_v30, 16  ;;  %v13183_v30 = vld [vmem:[#allocation12 + $0x52c] ss:$16 sps:$4 sm:$0xff]  }
 0x56e   : > { %v7199_v60 = vrot.slane %v7197_v35, 6  ;;  %v7202_v3 = vrot.slane %v7200_v32, 7 }
 0x570   : > { %v7203_v15 = vor.u32 %v7202_v3, %v7199_v60  ;;  %v13181_v3 = vld [vmem:[#allocation12 + $0x528] ss:$16 sps:$4 sm:$0xff]  }
 0x572   : > { %v7212_v40 = vrot.slane %v7203_v15, 4  ;;  %v7224_v29 = vsel %vm7222_vm2, %v7203_v15, %v7223_v34  ;;  %v13189_v15 = vld [vmem:[#allocation12 + $0x54c] ss:$16 sps:$4 sm:$0xff]  }
 0x573   : > { %7225 = vst [vmem:[#allocation3] sm:$0xee] %v7224_v29  ;;  %v13195_v29 = vld [vmem:[#allocation12 + $0x56c] ss:$16 sps:$4 sm:$0xff]  }
 0x574   : > { %v7230_v46 = vsel %vm14482_vm10, %v7212_v40, %v7229_v38 }
 0x575   : > { %7231 = vst [vmem:[#allocation3 + $0x10] sm:$0x33] %v7230_v46 }
 0x57c   : > { %v13121_v39 = vld [vmem:[#allocation3] ss:$16 sps:$4 sm:$0x3e]   ;;  %v13123_v1 = vld [vmem:[#allocation3 + $0x4] ss:$16 sps:$4 sm:$0x3e]  }
 0x57d   : > { %v7515_v14 = vshrl.u32 %v13121_v39, 16  ;;  %v7518_v43 = vshll.u32 %v13121_v39, 16  ;;  %v7523_v45 = vshrl.u32 %v13123_v1, 16  ;;  %v7526_v6 = vshll.u32 %v13123_v1, 16  ;;  %v13193_v1 = vld [vmem:[#allocation12 + $0x568] ss:$16 sps:$4 sm:$0xff]  }
 0x57f   : > { %v7074_v49 = vpop.f32.mrb[60].mxu0  ;;  %v7517_v16 = vrot.slane %v7515_v14, 1  ;;  %v7520_v47 = vrot.slane %v7518_v43, 2  ;;  %v7525_v53 = vrot.slane %v7523_v45, 1  ;;  %v7528_v54 = vrot.slane %v7526_v6, 2 }
 0x580   : > { %v7076_v51 = vpop.f32.mrb[61].mxu0  ;;  %v13201_v43 = vld [vmem:[#allocation12 + $0x58c] ss:$16 sps:$4 sm:$0xff]   ;;  %v7232_v45 = vld [vmem:[#allocation3 + $0x18] sm:$0x33] }
 0x581   : > { %v7078_v52 = vpop.f32.mrb[62].mxu0  ;;  %v14528_v55 = vor.u32 %v7520_v47, %v7517_v16  ;;  %v7529_v61 = vor.u32 %v7528_v54, %v7525_v53  ;;  %v13199_v16 = vld [vmem:[#allocation12 + $0x588] ss:$16 sps:$4 sm:$0xff]   ;;  %v13213_v54 = vld [vmem:[#allocation12 + $0x5cc] ss:$16 sps:$4 sm:$0xff]  }
 0x582   : > { %v7079_v57 = vpop.f32.mrb[63].mxu0  ;;  %v13205_v53 = vld [vmem:[#allocation12 + $0x5a8] ss:$16 sps:$4 sm:$0xff]  }
 0x583   : > { %8222 = vmatprep.mubr.bf16.mxu0 %v7529_v61  ;;  %v13211_v52 = vld [vmem:[#allocation12 + $0x5c8] ss:$16 sps:$4 sm:$0xff]  }
 0x584   : > { %8223 = vmatmul.mubr.bf16.vlgmr.msra.gmra.mrb[64].mxu0 %v14528_v55 }
 0x585   : > { %8273 = vmatpush1.bf16.msra.mxu0 %v13127_v63  ;;  %8304 = vmatprep.mubr.bf16.mxu0 %v7529_v61 }
 0x586   : > { %8274 = vmatprep.subr.bf16.mxu0 %v13135_v2  ;;  %v13217_v2 = vld [vmem:[#allocation12 + $0x5e8] ss:$16 sps:$4 sm:$0xff]  }
 0x589   : > { %8275 = vmatpush1.bf16.msra.mxu0 %v13133_v50 }
 0x58a   : > { %8276 = vmatprep.subr.bf16.mxu0 %v13141_v22  ;;  %v13228_v22 = vld [vmem:[#allocation12 + $0x4] ss:$16 sps:$4 sm:$0xff]  }
 0x58d   : > { %8277 = vmatpush1.bf16.msra.mxu0 %v13139_v31 }
 0x58e   : > { %8278 = vmatprep.subr.bf16.mxu0 %v13147_v37 }
 0x591   : > { %8279 = vmatpush1.bf16.msra.mxu0 %v13145_v4 }
 0x592   : > { %8280 = vmatprep.subr.bf16.mxu0 %v13153_v41 }
 0x595   : > { %8281 = vmatpush1.bf16.msra.mxu0 %v13151_v8 }
 0x596   : > { %8282 = vmatprep.subr.bf16.mxu0 %v13159_v11 }
 0x599   : > { %8283 = vmatpush1.bf16.msra.mxu0 %v13157_v48  ;;  %v13223_v48 = vld [vmem:[#allocation12 + $0x608] ss:$16 sps:$4 sm:$0xff]  }
 0x59a   : > { %8284 = vmatprep.subr.bf16.mxu0 %v13165_v23  ;;  %v13226_v23 = vld [vmem:[#allocation12] ss:$16 sps:$4 sm:$0xff]  }
 0x59d   : > { %8285 = vmatpush1.bf16.msra.mxu0 %v13163_v12  ;;  %v14546_v12 = vld [vmem:[#allocation3] sm:$0xff] }
 0x59e   : > { %8286 = vmatprep.subr.bf16.mxu0 %v13171_v26  ;;  %v13233_v26 = vld [vmem:[#allocation12 + $0x62c] ss:$16 sps:$4 sm:$0xff]  }
 0x5a0   : > { %v7115_v17 = vpop.f32.mrb[60].mxu1 }
 0x5a1   : > { %v7116_v33 = vadd.f32 %v7115_v17, %v7074_v49  ;;  %v7117_v42 = vpop.f32.mrb[61].mxu1  ;;  %8287 = vmatpush1.bf16.msra.mxu0 %v13169_v20  ;;  %v13236_v20 = vld [vmem:[#allocation12 + $0x24] ss:$16 sps:$4 sm:$0xff]   ;;  %v14552_v17 = vcombine.high %v14546_v12, %v14546_v12 }
 0x5a2   : > { %v7118_v19 = vadd.f32 %v7117_v42, %v7076_v51  ;;  %v7119_v21 = vpop.f32.mrb[62].mxu1  ;;  %8288 = vmatprep.subr.bf16.mxu0 %v13177_v5  ;;  %v13207_v51 = vld [vmem:[#allocation12 + $0x5ac] ss:$16 sps:$4 sm:$0xff]   ;;  %v13231_v5 = vld [vmem:[#allocation12 + $0x628] ss:$16 sps:$4 sm:$0xff]  }
 0x5a3   : > { %v7124_v28 = vadd.f32 %v7116_v33, %v14509_v44  ;;  %v7120_v24 = vpop.f32.mrb[63].mxu1  ;;  %v13234_v33 = vld [vmem:[#allocation12 + $0x20] ss:$16 sps:$4 sm:$0xff]   ;;  %v13242_v42 = vld [vmem:[#allocation12 + $0x44] ss:$16 sps:$4 sm:$0xff]  }
 0x5a4   : > { %v7125_v25 = vadd.f32 %v7118_v19, %v14511_v10  ;;  %v7226_v10 = vld [vmem:[#allocation3 + $0x8] sm:$0xee] }
 0x5a5   : > { %v7150_v35 = vadd.f32 %v7139_v18, %v7124_v28  ;;  %8289 = vmatpush1.bf16.msra.mxu0 %v13175_v62  ;;  %v13239_v18 = vld [vmem:[#allocation12 + $0x64c] ss:$16 sps:$4 sm:$0xff]   ;;  %v13240_v19 = vld [vmem:[#allocation12 + $0x40] ss:$16 sps:$4 sm:$0xff]   ;;  %v13248_v21 = vld [vmem:[#allocation12 + $0x64] ss:$16 sps:$4 sm:$0xff]  }
 0x5a6   : > { %v7151_v32 = vadd.f32 %v7143_v7, %v7125_v25  ;;  %8290 = vmatprep.subr.bf16.mxu0 %v13183_v30  ;;  %v13245_v7 = vld [vmem:[#allocation12 + $0x66c] ss:$16 sps:$4 sm:$0xff]   ;;  %v13243_v28 = vld [vmem:[#allocation12 + $0x668] ss:$16 sps:$4 sm:$0xff]   ;;  %v13246_v24 = vld [vmem:[#allocation12 + $0x60] ss:$16 sps:$4 sm:$0xff]  }
 0x5a7   : > { %v7154_v60 = vmax.f32 %v7150_v35, 0.0  ;;  %v13251_v62 = vld [vmem:[#allocation12 + $0x68c] ss:$16 sps:$4 sm:$0xff]   ;;  %v13254_v25 = vld [vmem:[#allocation12 + $0x84] ss:$16 sps:$4 sm:$0xff]  }
 0x5a8   : > { %v7155_v34 = vmax.f32 %v7151_v32, 0.0  ;;  %v13249_v30 = vld [vmem:[#allocation12 + $0x688] ss:$16 sps:$4 sm:$0xff]   ;;  %v13252_v35 = vld [vmem:[#allocation12 + $0x80] ss:$16 sps:$4 sm:$0xff]  }
 0x5a9   : > { %8291 = vmatpush1.bf16.msra.mxu0 %v13181_v3  ;;  %v13257_v32 = vld [vmem:[#allocation12 + $0x6ac] ss:$16 sps:$4 sm:$0xff]   ;;  %v13255_v3 = vld [vmem:[#allocation12 + $0x6a8] ss:$16 sps:$4 sm:$0xff]  }
 0x5aa   : > { %v11638_v38 = vpack.c.bf16 %v7155_v34, %v7154_v60  ;;  %8292 = vmatprep.subr.bf16.mxu0 %v13189_v15  ;;  %v13260_v60 = vld [vmem:[#allocation12 + $0xa4] ss:$16 sps:$4 sm:$0xff]   ;;  %v13258_v34 = vld [vmem:[#allocation12 + $0xa0] ss:$16 sps:$4 sm:$0xff]   ;;  %v13263_v15 = vld [vmem:[#allocation12 + $0x6cc] ss:$16 sps:$4 sm:$0xff]  }
 0x5ac   : > { %v7205_v40 = vshrl.u32 %v11638_v38, 16  ;;  %v7208_v44 = vshll.u32 %v11638_v38, 16  ;;  %v13266_v38 = vld [vmem:[#allocation12 + $0xc4] ss:$16 sps:$4 sm:$0xff]  }
 0x5ad   : > { %8293 = vmatpush1.bf16.msra.mxu0 %v13187_v13  ;;  %v13261_v13 = vld [vmem:[#allocation12 + $0x6c8] ss:$16 sps:$4 sm:$0xff]  }
 0x5ae   : > { %v7207_v46 = vrot.slane %v7205_v40, 6  ;;  %v7210_v39 = vrot.slane %v7208_v44, 7  ;;  %8294 = vmatprep.subr.bf16.mxu0 %v13195_v29  ;;  %v13264_v40 = vld [vmem:[#allocation12 + $0xc0] ss:$16 sps:$4 sm:$0xff]   ;;  %v13269_v44 = vld [vmem:[#allocation12 + $0x6ec] ss:$16 sps:$4 sm:$0xff]  }
 0x5af   : > { %v13272_v29 = vld [vmem:[#allocation12 + $0xe4] ss:$16 sps:$4 sm:$0xff]  }
 0x5b0   : > { %v7211_v14 = vor.u32 %v7210_v39, %v7207_v46  ;;  %v13267_v46 = vld [vmem:[#allocation12 + $0x6e8] ss:$16 sps:$4 sm:$0xff]   ;;  %v13270_v39 = vld [vmem:[#allocation12 + $0xe0] ss:$16 sps:$4 sm:$0xff]  }
 0x5b1   : > { %8295 = vmatpush1.bf16.msra.mxu0 %v13193_v1  ;;  %v13278_v1 = vld [vmem:[#allocation12 + $0x104] ss:$16 sps:$4 sm:$0xff]  }
 0x5b2   : > { %v7213_v6 = vrot.slane %v7211_v14, 4  ;;  %v7227_v49 = vsel %vm7222_vm2, %v7211_v14, %v7226_v10  ;;  %8296 = vmatprep.subr.bf16.mxu0 %v13201_v43  ;;  %v13275_v10 = vld [vmem:[#allocation12 + $0x70c] ss:$16 sps:$4 sm:$0xff]   ;;  %v13273_v14 = vld [vmem:[#allocation12 + $0x708] ss:$16 sps:$4 sm:$0xff]  }
 0x5b3   : > { %7228 = vst [vmem:[#allocation3 + $0x8] sm:$0xee] %v7227_v49  ;;  %v13276_v43 = vld [vmem:[#allocation12 + $0x100] ss:$16 sps:$4 sm:$0xff]   ;;  %v13279_v49 = vld [vmem:[#allocation12 + $0x728] ss:$16 sps:$4 sm:$0xff]  }
 0x5b4   : > { %v7233_v47 = vsel %vm14482_vm10, %v7213_v6, %v7232_v45  ;;  %v13281_v45 = vld [vmem:[#allocation12 + $0x72c] ss:$16 sps:$4 sm:$0xff]   ;;  %v13284_v6 = vld [vmem:[#allocation12 + $0x124] ss:$16 sps:$4 sm:$0xff]  }
 0x5b5   : > { %7234 = vst [vmem:[#allocation3 + $0x18] sm:$0x33] %v7233_v47  ;;  %8297 = vmatpush1.bf16.msra.mxu0 %v13199_v16  ;;  %v13282_v16 = vld [vmem:[#allocation12 + $0x120] ss:$16 sps:$4 sm:$0xff]   ;;  %v13287_v47 = vld [vmem:[#allocation12 + $0x74c] ss:$16 sps:$4 sm:$0xff]  }
 0x5b6   : > { %8298 = vmatprep.subr.bf16.mxu0 %v13207_v51  ;;  %v13290_v51 = vld [vmem:[#allocation12 + $0x144] ss:$16 sps:$4 sm:$0xff]  }
 0x5b9   : > { %8299 = vmatpush1.bf16.msra.mxu0 %v13205_v53  ;;  %v13285_v53 = vld [vmem:[#allocation12 + $0x748] ss:$16 sps:$4 sm:$0xff]  }
 0x5ba   : > { %8300 = vmatprep.subr.bf16.mxu0 %v13213_v54  ;;  %v13288_v54 = vld [vmem:[#allocation12 + $0x140] ss:$16 sps:$4 sm:$0xff]  }
 0x5bc   : > { %v13220_v9 = vld [vmem:[#allocation3 + $0x8] ss:$16 sps:$4 sm:$0x3e]   ;;  %v13222_v57 = vld [vmem:[#allocation3 + $0xc] ss:$16 sps:$4 sm:$0x3e]  }
 0x5bd   : > { %v7531_v61 = vshrl.u32 %v13220_v9, 16  ;;  %v7534_v63 = vshll.u32 %v13220_v9, 16  ;;  %8301 = vmatpush1.bf16.msra.mxu0 %v13211_v52  ;;  %v7539_v50 = vshrl.u32 %v13222_v57, 16  ;;  %v7542_v36 = vshll.u32 %v13222_v57, 16  ;;  %v13293_v52 = vld [vmem:[#allocation12 + $0x76c] ss:$16 sps:$4 sm:$0xff]  }
 0x5be   : > { %8302 = vmatprep.subr.bf16.mxu0 %v13219_v56  ;;  %v13296_v56 = vld [vmem:[#allocation12 + $0x164] ss:$16 sps:$4 sm:$0xff]   ;;  %v13291_v9 = vld [vmem:[#allocation12 + $0x768] ss:$16 sps:$4 sm:$0xff]   ;;  %v13294_v57 = vld [vmem:[#allocation12 + $0x160] ss:$16 sps:$4 sm:$0xff]  }
 0x5bf   : > { %v7533_v31 = vrot.slane %v7531_v61, 1  ;;  %v7536_v37 = vrot.slane %v7534_v63, 2  ;;  %v7541_v4 = vrot.slane %v7539_v50, 1  ;;  %v7544_v41 = vrot.slane %v7542_v36, 2  ;;  %v13299_v61 = vld [vmem:[#allocation12 + $0x78c] ss:$16 sps:$4 sm:$0xff]  }
 0x5c0   : > { %v13302_v63 = vld [vmem:[#allocation12 + $0x184] ss:$16 sps:$4 sm:$0xff]   ;;  %v13300_v50 = vld [vmem:[#allocation12 + $0x180] ss:$16 sps:$4 sm:$0xff]   ;;  %v13305_v36 = vld [vmem:[#allocation12 + $0x7ac] ss:$16 sps:$4 sm:$0xff]  }
 0x5c1   : > { %v14544_v8 = vor.u32 %v7536_v37, %v7533_v31  ;;  %8303 = vmatpush1.bf16.msra.mxu0 %v13217_v2  ;;  %v7545_v11 = vor.u32 %v7544_v41, %v7541_v4  ;;  %v13297_v2 = vld [vmem:[#allocation12 + $0x788] ss:$16 sps:$4 sm:$0xff]   ;;  %v13306_v37 = vld [vmem:[#allocation12 + $0x1a0] ss:$16 sps:$4 sm:$0xff]   ;;  %v13311_v4 = vld [vmem:[#allocation12 + $0x7cc] ss:$16 sps:$4 sm:$0xff]  }
 0x5c2   : > { %9008 = vmatprep.subr.bf16.mxu0 %v13228_v22  ;;  %v13308_v22 = vld [vmem:[#allocation12 + $0x1a4] ss:$16 sps:$4 sm:$0xff]   ;;  %v13303_v31 = vld [vmem:[#allocation12 + $0x7a8] ss:$16 sps:$4 sm:$0xff]  }
 0x5c3   : > { %8263 = vmatprep.mubr.bf16.mxu1 %v7545_v11  ;;  %v13314_v41 = vld [vmem:[#allocation12 + $0x1c4] ss:$16 sps:$4 sm:$0xff]  }
 0x5c4   : > { %8305 = vmatmul.mubr.bf16.vlgmr.msra.gmra.mrb[68].mxu0 %v14528_v55  ;;  %8264 = vmatmul.mubr.bf16.vlgmr.msra.gmra.mrb[64].mxu1 %v14544_v8  ;;  %v13237_v55 = vld [vmem:[#allocation12 + $0x648] ss:$16 sps:$4 sm:$0xff]  }
 0x5c5   : > { %8314 = vmatpush1.bf16.msra.mxu1 %v13223_v48  ;;  %9009 = vmatpush1.bf16.msra.mxu0 %v13226_v23  ;;  %v13312_v48 = vld [vmem:[#allocation12 + $0x1c0] ss:$16 sps:$4 sm:$0xff]   ;;  %v13317_v23 = vld [vmem:[#allocation12 + $0x7ec] ss:$16 sps:$4 sm:$0xff]  }
 0x5c6   : > { %9040 = vmatprep.mubr.bf16.mxu0 %v14552_v17  ;;  %8345 = vmatprep.mubr.bf16.mxu1 %v7545_v11  ;;  %v13309_v11 = vld [vmem:[#allocation12 + $0x7c8] ss:$16 sps:$4 sm:$0xff]  }
 0x5c7   : > { %8315 = vmatprep.subr.bf16.mxu1 %v13233_v26  ;;  %9010 = vmatprep.subr.bf16.mxu0 %v13236_v20  ;;  %v13320_v26 = vld [vmem:[#allocation12 + $0x1e4] ss:$16 sps:$4 sm:$0xff]   ;;  %v13315_v20 = vld [vmem:[#allocation12 + $0x7e8] ss:$16 sps:$4 sm:$0xff]  }
 0x5c9   : > { %8316 = vmatpush1.bf16.msra.mxu1 %v13231_v5  ;;  %9011 = vmatpush1.bf16.msra.mxu0 %v13234_v33  ;;  %v13318_v5 = vld [vmem:[#allocation12 + $0x1e0] ss:$16 sps:$4 sm:$0xff]   ;;  %v13323_v33 = vld [vmem:[#allocation12 + $0x204] ss:$16 sps:$4 sm:$0xff]  }
 0x5ca   : > { %8317 = vmatprep.subr.bf16.mxu1 %v13239_v18  ;;  %9012 = vmatprep.subr.bf16.mxu0 %v13242_v42  ;;  %v13326_v18 = vld [vmem:[#allocation12 + $0xc] ss:$16 sps:$4 sm:$0xff]   ;;  %v14555_v42 = vld [vmem:[#allocation3 + $0x8] sm:$0xff] }
 0x5cd   : > { %8318 = vmatpush1.bf16.msra.mxu1 %v13237_v55  ;;  %9013 = vmatpush1.bf16.msra.mxu0 %v13240_v19  ;;  %v13321_v55 = vld [vmem:[#allocation12 + $0x200] ss:$16 sps:$4 sm:$0xff]   ;;  %v14559_v19 = vcombine.low %v14546_v12, %v14546_v12  ;;  %v13332_v12 = vld [vmem:[#allocation12 + $0x28] ss:$16 sps:$4 sm:$0xff]  }
 0x5ce   : > { %8319 = vmatprep.subr.bf16.mxu1 %v13245_v7  ;;  %9014 = vmatprep.subr.bf16.mxu0 %v13248_v21  ;;  %v13324_v7 = vld [vmem:[#allocation12 + $0x8] ss:$16 sps:$4 sm:$0xff]   ;;  %v14563_v21 = vcombine.high %v14555_v42, %v14555_v42 }
 0x5d1   : > { %8320 = vmatpush1.bf16.msra.mxu1 %v13243_v28  ;;  %9015 = vmatpush1.bf16.msra.mxu0 %v13246_v24  ;;  %v13331_v28 = vld [vmem:[#allocation12 + $0x224] ss:$16 sps:$4 sm:$0xff]   ;;  %v13334_v24 = vld [vmem:[#allocation12 + $0x2c] ss:$16 sps:$4 sm:$0xff]  }
 0x5d2   : > { %8321 = vmatprep.subr.bf16.mxu1 %v13251_v62  ;;  %9016 = vmatprep.subr.bf16.mxu0 %v13254_v25  ;;  %v13329_v62 = vld [vmem:[#allocation12 + $0x220] ss:$16 sps:$4 sm:$0xff]   ;;  %v13337_v25 = vld [vmem:[#allocation12 + $0x244] ss:$16 sps:$4 sm:$0xff]  }
 0x5d5   : > { %8322 = vmatpush1.bf16.msra.mxu1 %v13249_v30  ;;  %9017 = vmatpush1.bf16.msra.mxu0 %v13252_v35  ;;  %v13340_v30 = vld [vmem:[#allocation12 + $0x4c] ss:$16 sps:$4 sm:$0xff]   ;;  %v13335_v35 = vld [vmem:[#allocation12 + $0x240] ss:$16 sps:$4 sm:$0xff]  }
 0x5d6   : > { %8323 = vmatprep.subr.bf16.mxu1 %v13257_v32  ;;  %9018 = vmatprep.subr.bf16.mxu0 %v13260_v60  ;;  %v13338_v32 = vld [vmem:[#allocation12 + $0x48] ss:$16 sps:$4 sm:$0xff]   ;;  %v13346_v60 = vld [vmem:[#allocation12 + $0x6c] ss:$16 sps:$4 sm:$0xff]  }
 0x5d9   : > { %8324 = vmatpush1.bf16.msra.mxu1 %v13255_v3  ;;  %9019 = vmatpush1.bf16.msra.mxu0 %v13258_v34  ;;  %v13341_v3 = vld [vmem:[#allocation12 + $0x260] ss:$16 sps:$4 sm:$0xff]   ;;  %v13344_v34 = vld [vmem:[#allocation12 + $0x68] ss:$16 sps:$4 sm:$0xff]  }
 0x5da   : > { %8325 = vmatprep.subr.bf16.mxu1 %v13263_v15  ;;  %9020 = vmatprep.subr.bf16.mxu0 %v13266_v38  ;;  %v13349_v15 = vld [vmem:[#allocation12 + $0x284] ss:$16 sps:$4 sm:$0xff]   ;;  %v13347_v38 = vld [vmem:[#allocation12 + $0x280] ss:$16 sps:$4 sm:$0xff]  }
 0x5dd   : > { %8326 = vmatpush1.bf16.msra.mxu1 %v13261_v13  ;;  %9021 = vmatpush1.bf16.msra.mxu0 %v13264_v40  ;;  %v13350_v13 = vld [vmem:[#allocation12 + $0x88] ss:$16 sps:$4 sm:$0xff]   ;;  %v13355_v40 = vld [vmem:[#allocation12 + $0x2a4] ss:$16 sps:$4 sm:$0xff]  }
 0x5de   : > { %8327 = vmatprep.subr.bf16.mxu1 %v13269_v44  ;;  %9022 = vmatprep.subr.bf16.mxu0 %v13272_v29  ;;  %v13358_v44 = vld [vmem:[#allocation12 + $0xac] ss:$16 sps:$4 sm:$0xff]   ;;  %v13353_v29 = vld [vmem:[#allocation12 + $0x2a0] ss:$16 sps:$4 sm:$0xff]  }
 0x5e1   : > { %8328 = vmatpush1.bf16.msra.mxu1 %v13267_v46  ;;  %9023 = vmatpush1.bf16.msra.mxu0 %v13270_v39  ;;  %v13356_v46 = vld [vmem:[#allocation12 + $0xa8] ss:$16 sps:$4 sm:$0xff]   ;;  %v13361_v39 = vld [vmem:[#allocation12 + $0x2c4] ss:$16 sps:$4 sm:$0xff]  }
 0x5e2   : > { %8329 = vmatprep.subr.bf16.mxu1 %v13275_v10  ;;  %9024 = vmatprep.subr.bf16.mxu0 %v13278_v1  ;;  %v13364_v10 = vld [vmem:[#allocation12 + $0xcc] ss:$16 sps:$4 sm:$0xff]   ;;  %v13359_v1 = vld [vmem:[#allocation12 + $0x2c0] ss:$16 sps:$4 sm:$0xff]  }
 0x5e5   : > { %8330 = vmatpush1.bf16.msra.mxu1 %v13273_v14  ;;  %9025 = vmatpush1.bf16.msra.mxu0 %v13276_v43  ;;  %v13362_v14 = vld [vmem:[#allocation12 + $0xc8] ss:$16 sps:$4 sm:$0xff]   ;;  %v13367_v43 = vld [vmem:[#allocation12 + $0x2e4] ss:$16 sps:$4 sm:$0xff]  }
 0x5e6   : > { %8331 = vmatprep.subr.bf16.mxu1 %v13281_v45  ;;  %9026 = vmatprep.subr.bf16.mxu0 %v13284_v6  ;;  %v13370_v45 = vld [vmem:[#allocation12 + $0xec] ss:$16 sps:$4 sm:$0xff]   ;;  %v13365_v6 = vld [vmem:[#allocation12 + $0x2e0] ss:$16 sps:$4 sm:$0xff]  }
 0x5e9   : > { %8332 = vmatpush1.bf16.msra.mxu1 %v13279_v49  ;;  %9027 = vmatpush1.bf16.msra.mxu0 %v13282_v16  ;;  %v13368_v49 = vld [vmem:[#allocation12 + $0xe8] ss:$16 sps:$4 sm:$0xff]   ;;  %v13373_v16 = vld [vmem:[#allocation12 + $0x304] ss:$16 sps:$4 sm:$0xff]  }
 0x5ea   : > { %8333 = vmatprep.subr.bf16.mxu1 %v13287_v47  ;;  %9028 = vmatprep.subr.bf16.mxu0 %v13290_v51  ;;  %v13376_v47 = vld [vmem:[#allocation12 + $0x10c] ss:$16 sps:$4 sm:$0xff]   ;;  %v13371_v51 = vld [vmem:[#allocation12 + $0x300] ss:$16 sps:$4 sm:$0xff]  }
 0x5ed   : > { %8334 = vmatpush1.bf16.msra.mxu1 %v13285_v53  ;;  %9029 = vmatpush1.bf16.msra.mxu0 %v13288_v54  ;;  %v13374_v53 = vld [vmem:[#allocation12 + $0x108] ss:$16 sps:$4 sm:$0xff]   ;;  %v13379_v54 = vld [vmem:[#allocation12 + $0x324] ss:$16 sps:$4 sm:$0xff]  }
 0x5ee   : > { %8335 = vmatprep.subr.bf16.mxu1 %v13293_v52  ;;  %9030 = vmatprep.subr.bf16.mxu0 %v13296_v56  ;;  %v13382_v52 = vld [vmem:[#allocation12 + $0x12c] ss:$16 sps:$4 sm:$0xff]   ;;  %v13377_v56 = vld [vmem:[#allocation12 + $0x320] ss:$16 sps:$4 sm:$0xff]  }
 0x5f1   : > { %8336 = vmatpush1.bf16.msra.mxu1 %v13291_v9  ;;  %9031 = vmatpush1.bf16.msra.mxu0 %v13294_v57  ;;  %v13380_v9 = vld [vmem:[#allocation12 + $0x128] ss:$16 sps:$4 sm:$0xff]   ;;  %v13385_v57 = vld [vmem:[#allocation12 + $0x344] ss:$16 sps:$4 sm:$0xff]  }
 0x5f2   : > { %8337 = vmatprep.subr.bf16.mxu1 %v13299_v61  ;;  %9032 = vmatprep.subr.bf16.mxu0 %v13302_v63  ;;  %v13388_v61 = vld [vmem:[#allocation12 + $0x14c] ss:$16 sps:$4 sm:$0xff]   ;;  %v13383_v63 = vld [vmem:[#allocation12 + $0x340] ss:$16 sps:$4 sm:$0xff]  }
 0x5f5   : > { %8338 = vmatpush1.bf16.msra.mxu1 %v13297_v2  ;;  %9033 = vmatpush1.bf16.msra.mxu0 %v13300_v50  ;;  %v13386_v2 = vld [vmem:[#allocation12 + $0x148] ss:$16 sps:$4 sm:$0xff]   ;;  %v13391_v50 = vld [vmem:[#allocation12 + $0x364] ss:$16 sps:$4 sm:$0xff]  }
 0x5f6   : > { %8339 = vmatprep.subr.bf16.mxu1 %v13305_v36  ;;  %9034 = vmatprep.subr.bf16.mxu0 %v13308_v22  ;;  %v13394_v36 = vld [vmem:[#allocation12 + $0x16c] ss:$16 sps:$4 sm:$0xff]   ;;  %v13389_v22 = vld [vmem:[#allocation12 + $0x360] ss:$16 sps:$4 sm:$0xff]  }
 0x5f9   : > { %8340 = vmatpush1.bf16.msra.mxu1 %v13303_v31  ;;  %9035 = vmatpush1.bf16.msra.mxu0 %v13306_v37  ;;  %v13392_v31 = vld [vmem:[#allocation12 + $0x168] ss:$16 sps:$4 sm:$0xff]   ;;  %v13397_v37 = vld [vmem:[#allocation12 + $0x384] ss:$16 sps:$4 sm:$0xff]  }
 0x5fa   : > { %8341 = vmatprep.subr.bf16.mxu1 %v13311_v4  ;;  %9036 = vmatprep.subr.bf16.mxu0 %v13314_v41  ;;  %v13400_v4 = vld [vmem:[#allocation12 + $0x18c] ss:$16 sps:$4 sm:$0xff]   ;;  %v13395_v41 = vld [vmem:[#allocation12 + $0x380] ss:$16 sps:$4 sm:$0xff]  }
 0x5fd   : > { %8342 = vmatpush1.bf16.msra.mxu1 %v13309_v11  ;;  %9037 = vmatpush1.bf16.msra.mxu0 %v13312_v48  ;;  %v13398_v11 = vld [vmem:[#allocation12 + $0x188] ss:$16 sps:$4 sm:$0xff]   ;;  %v13403_v48 = vld [vmem:[#allocation12 + $0x3a4] ss:$16 sps:$4 sm:$0xff]  }
 0x5fe   : > { %8343 = vmatprep.subr.bf16.mxu1 %v13317_v23  ;;  %9038 = vmatprep.subr.bf16.mxu0 %v13320_v26  ;;  %v13406_v23 = vld [vmem:[#allocation12 + $0x1ac] ss:$16 sps:$4 sm:$0xff]   ;;  %v13401_v26 = vld [vmem:[#allocation12 + $0x3a0] ss:$16 sps:$4 sm:$0xff]  }
 0x601   : > { %8344 = vmatpush1.bf16.msra.mxu1 %v13315_v20  ;;  %9039 = vmatpush1.bf16.msra.mxu0 %v13318_v5  ;;  %v13404_v20 = vld [vmem:[#allocation12 + $0x1a8] ss:$16 sps:$4 sm:$0xff]   ;;  %v13409_v5 = vld [vmem:[#allocation12 + $0x3c4] ss:$16 sps:$4 sm:$0xff]  }
 0x602   : > { %9049 = vmatprep.subr.bf16.mxu1 %v13323_v33  ;;  %9090 = vmatprep.subr.bf16.mxu0 %v13326_v18  ;;  %v13412_v33 = vld [vmem:[#allocation12 + $0x1cc] ss:$16 sps:$4 sm:$0xff]   ;;  %v13407_v18 = vld [vmem:[#allocation12 + $0x3c0] ss:$16 sps:$4 sm:$0xff]  }
 0x604   : > { %8346 = vmatmul.mubr.bf16.vlgmr.msra.gmra.mrb[68].mxu1 %v14544_v8  ;;  %9041 = vmatmul.mubr.bf16.vlgmr.msra.gmra.mrb[72].mxu0 %v14559_v19  ;;  %v13343_v8 = vld [vmem:[#allocation12 + $0x264] ss:$16 sps:$4 sm:$0xff]  }
 0x605   : > { %9050 = vmatpush1.bf16.msra.mxu1 %v13321_v55  ;;  %9081 = vmatprep.mubr.bf16.mxu1 %v14563_v21  ;;  %v13410_v55 = vld [vmem:[#allocation12 + $0x1c8] ss:$16 sps:$4 sm:$0xff]  }
 0x606   : > { %9091 = vmatpush1.bf16.msra.mxu0 %v13324_v7  ;;  %9122 = vmatprep.mubr.bf16.mxu0 %v14552_v17  ;;  %v13352_v17 = vld [vmem:[#allocation12 + $0x8c] ss:$16 sps:$4 sm:$0xff]   ;;  %v13415_v7 = vld [vmem:[#allocation12 + $0x3e4] ss:$16 sps:$4 sm:$0xff]  }
 0x607   : > { %9051 = vmatprep.subr.bf16.mxu1 %v13331_v28  ;;  %9092 = vmatprep.subr.bf16.mxu0 %v13334_v24  ;;  %v13418_v28 = vld [vmem:[#allocation12 + $0x1ec] ss:$16 sps:$4 sm:$0xff]   ;;  %v13413_v24 = vld [vmem:[#allocation12 + $0x3e0] ss:$16 sps:$4 sm:$0xff]  }
 0x609   : > { %9052 = vmatpush1.bf16.msra.mxu1 %v13329_v62  ;;  %v13416_v62 = vld [vmem:[#allocation12 + $0x1e8] ss:$16 sps:$4 sm:$0xff]  }
 0x60a   : > { %9093 = vmatpush1.bf16.msra.mxu0 %v13332_v12  ;;  %9053 = vmatprep.subr.bf16.mxu1 %v13337_v25  ;;  %v13421_v12 = vld [vmem:[#allocation12 + $0x20c] ss:$16 sps:$4 sm:$0xff]   ;;  %v13424_v25 = vld [vmem:[#allocation12 + $0x804] ss:$16 sps:$4 sm:$0xff]  }
 0x60b   : > { %9094 = vmatprep.subr.bf16.mxu0 %v13340_v30  ;;  %v13419_v30 = vld [vmem:[#allocation12 + $0x208] ss:$16 sps:$4 sm:$0xff]  }
 0x60d   : > { %9054 = vmatpush1.bf16.msra.mxu1 %v13335_v35  ;;  %v14569_v35 = vld [vmem:[#allocation3 + $0x4] ss:$16 sps:$4 sm:$0x78]  }
 0x60e   : > { %9095 = vmatpush1.bf16.msra.mxu0 %v13338_v32  ;;  %9055 = vmatprep.subr.bf16.mxu1 %v13343_v8  ;;  %v14573_v32 = vcombine.low %v14555_v42, %v14555_v42  ;;  %v13422_v8 = vld [vmem:[#allocation12 + $0x800] ss:$16 sps:$4 sm:$0xff]   ;;  %v13436_v42 = vld [vmem:[#allocation12 + $0x24c] ss:$16 sps:$4 sm:$0xff]  }
 0x60f   : > { %9096 = vmatprep.subr.bf16.mxu0 %v13346_v60  ;;  %v13430_v60 = vld [vmem:[#allocation12 + $0x22c] ss:$16 sps:$4 sm:$0xff]  }
 0x611   : > { %9056 = vmatpush1.bf16.msra.mxu1 %v13341_v3  ;;  %v13433_v3 = vld [vmem:[#allocation12 + $0x824] ss:$16 sps:$4 sm:$0xff]  }
 0x612   : > { %9097 = vmatpush1.bf16.msra.mxu0 %v13344_v34  ;;  %9057 = vmatprep.subr.bf16.mxu1 %v13349_v15  ;;  %v9322_v34 = vrot.slane %v14569_v35, 3  ;;  %v13428_v15 = vld [vmem:[#allocation12 + $0x228] ss:$16 sps:$4 sm:$0xff]   ;;  %v13550_v35 = vld [vmem:[#allocation12 + $0x88c] ss:$16 sps:$4 sm:$0xff]  }
 0x613   : > { %9098 = vmatprep.subr.bf16.mxu0 %v13352_v17  ;;  %v13431_v17 = vld [vmem:[#allocation12 + $0x820] ss:$16 sps:$4 sm:$0xff]  }
 0x615   : > { %9058 = vmatpush1.bf16.msra.mxu1 %v13347_v38  ;;  %v13439_v38 = vld [vmem:[#allocation12 + $0x844] ss:$16 sps:$4 sm:$0xff]  }
 0x616   : > { %9099 = vmatpush1.bf16.msra.mxu0 %v13350_v13  ;;  %9059 = vmatprep.subr.bf16.mxu1 %v13355_v40  ;;  %v13434_v13 = vld [vmem:[#allocation12 + $0x248] ss:$16 sps:$4 sm:$0xff]   ;;  %v13442_v40 = vld [vmem:[#allocation12 + $0x26c] ss:$16 sps:$4 sm:$0xff]  }
 0x617   : > { %9100 = vmatprep.subr.bf16.mxu0 %v13358_v44  ;;  %v13445_v44 = vld [vmem:[#allocation12 + $0x864] ss:$16 sps:$4 sm:$0xff]  }
 0x619   : > { %9060 = vmatpush1.bf16.msra.mxu1 %v13353_v29  ;;  %v13440_v29 = vld [vmem:[#allocation12 + $0x268] ss:$16 sps:$4 sm:$0xff]  }
 0x61a   : > { %9101 = vmatpush1.bf16.msra.mxu0 %v13356_v46  ;;  %9061 = vmatprep.subr.bf16.mxu1 %v13361_v39  ;;  %v13448_v46 = vld [vmem:[#allocation12 + $0x28c] ss:$16 sps:$4 sm:$0xff]   ;;  %v13451_v39 = vld [vmem:[#allocation12 + $0x884] ss:$16 sps:$4 sm:$0xff]  }
 0x61b   : > { %9102 = vmatprep.subr.bf16.mxu0 %v13364_v10  ;;  %v13446_v10 = vld [vmem:[#allocation12 + $0x288] ss:$16 sps:$4 sm:$0xff]  }
 0x61d   : > { %9062 = vmatpush1.bf16.msra.mxu1 %v13359_v1  ;;  %v13449_v1 = vld [vmem:[#allocation12 + $0x880] ss:$16 sps:$4 sm:$0xff]  }
 0x61e   : > { %9103 = vmatpush1.bf16.msra.mxu0 %v13362_v14  ;;  %9063 = vmatprep.subr.bf16.mxu1 %v13367_v43  ;;  %v13454_v14 = vld [vmem:[#allocation12 + $0x2ac] ss:$16 sps:$4 sm:$0xff]   ;;  %v13457_v43 = vld [vmem:[#allocation12 + $0x8a4] ss:$16 sps:$4 sm:$0xff]  }
 0x61f   : > { %9104 = vmatprep.subr.bf16.mxu0 %v13370_v45  ;;  %v13452_v45 = vld [vmem:[#allocation12 + $0x2a8] ss:$16 sps:$4 sm:$0xff]  }
 0x621   : > { %9064 = vmatpush1.bf16.msra.mxu1 %v13365_v6  ;;  %v13455_v6 = vld [vmem:[#allocation12 + $0x8a0] ss:$16 sps:$4 sm:$0xff]  }
 0x622   : > { %9105 = vmatpush1.bf16.msra.mxu0 %v13368_v49  ;;  %9065 = vmatprep.subr.bf16.mxu1 %v13373_v16  ;;  %v13460_v49 = vld [vmem:[#allocation12 + $0x2cc] ss:$16 sps:$4 sm:$0xff]  }
 0x623   : > { %9106 = vmatprep.subr.bf16.mxu0 %v13376_v47  ;;  %v13463_v47 = vld [vmem:[#allocation12 + $0x8c4] ss:$16 sps:$4 sm:$0xff]  }
 0x625   : > { %9066 = vmatpush1.bf16.msra.mxu1 %v13371_v51 }
 0x626   : > { %9107 = vmatpush1.bf16.msra.mxu0 %v13374_v53  ;;  %9067 = vmatprep.subr.bf16.mxu1 %v13379_v54  ;;  %v13458_v54 = vld [vmem:[#allocation12 + $0x2c8] ss:$16 sps:$4 sm:$0xff]  }
 0x627   : > { %9108 = vmatprep.subr.bf16.mxu0 %v13382_v52 }
 0x629   : > { %9068 = vmatpush1.bf16.msra.mxu1 %v13377_v56  ;;  %v13461_v56 = vld [vmem:[#allocation12 + $0x8c0] ss:$16 sps:$4 sm:$0xff]  }
 0x62a   : > { %9109 = vmatpush1.bf16.msra.mxu0 %v13380_v9  ;;  %9069 = vmatprep.subr.bf16.mxu1 %v13385_v57  ;;  %v13466_v9 = vld [vmem:[#allocation12 + $0x2ec] ss:$16 sps:$4 sm:$0xff]   ;;  %v13469_v57 = vld [vmem:[#allocation12 + $0x8e4] ss:$16 sps:$4 sm:$0xff]  }
 0x62b   : > { %9110 = vmatprep.subr.bf16.mxu0 %v13388_v61  ;;  %v13464_v61 = vld [vmem:[#allocation12 + $0x2e8] ss:$16 sps:$4 sm:$0xff]  }
 0x62d   : > { %9070 = vmatpush1.bf16.msra.mxu1 %v13383_v63  ;;  %v13467_v63 = vld [vmem:[#allocation12 + $0x8e0] ss:$16 sps:$4 sm:$0xff]  }
 0x62e   : > { %9111 = vmatpush1.bf16.msra.mxu0 %v13386_v2  ;;  %9071 = vmatprep.subr.bf16.mxu1 %v13391_v50  ;;  %v13472_v2 = vld [vmem:[#allocation12 + $0x30c] ss:$16 sps:$4 sm:$0xff]   ;;  %v13475_v50 = vld [vmem:[#allocation12 + $0x904] ss:$16 sps:$4 sm:$0xff]  }
 0x62f   : > { %9112 = vmatprep.subr.bf16.mxu0 %v13394_v36  ;;  %v13470_v36 = vld [vmem:[#allocation12 + $0x308] ss:$16 sps:$4 sm:$0xff]  }
 0x631   : > { %9072 = vmatpush1.bf16.msra.mxu1 %v13389_v22  ;;  %v13473_v22 = vld [vmem:[#allocation12 + $0x900] ss:$16 sps:$4 sm:$0xff]  }
 0x632   : > { %9113 = vmatpush1.bf16.msra.mxu0 %v13392_v31  ;;  %9073 = vmatprep.subr.bf16.mxu1 %v13397_v37  ;;  %v13478_v31 = vld [vmem:[#allocation12 + $0x32c] ss:$16 sps:$4 sm:$0xff]   ;;  %v13481_v37 = vld [vmem:[#allocation12 + $0x924] ss:$16 sps:$4 sm:$0xff]  }
 0x633   : > { %9114 = vmatprep.subr.bf16.mxu0 %v13400_v4  ;;  %v13476_v4 = vld [vmem:[#allocation12 + $0x328] ss:$16 sps:$4 sm:$0xff]  }
 0x635   : > { %9074 = vmatpush1.bf16.msra.mxu1 %v13395_v41  ;;  %v13479_v41 = vld [vmem:[#allocation12 + $0x920] ss:$16 sps:$4 sm:$0xff]  }
 0x636   : > { %9115 = vmatpush1.bf16.msra.mxu0 %v13398_v11  ;;  %9075 = vmatprep.subr.bf16.mxu1 %v13403_v48  ;;  %v13484_v11 = vld [vmem:[#allocation12 + $0x34c] ss:$16 sps:$4 sm:$0xff]   ;;  %v13487_v48 = vld [vmem:[#allocation12 + $0x944] ss:$16 sps:$4 sm:$0xff]  }
 0x637   : > { %9116 = vmatprep.subr.bf16.mxu0 %v13406_v23  ;;  %v13482_v23 = vld [vmem:[#allocation12 + $0x348] ss:$16 sps:$4 sm:$0xff]  }
 0x639   : > { %9076 = vmatpush1.bf16.msra.mxu1 %v13401_v26  ;;  %v13485_v26 = vld [vmem:[#allocation12 + $0x940] ss:$16 sps:$4 sm:$0xff]  }
 0x63a   : > { %9117 = vmatpush1.bf16.msra.mxu0 %v13404_v20  ;;  %9077 = vmatprep.subr.bf16.mxu1 %v13409_v5  ;;  %v13490_v20 = vld [vmem:[#allocation12 + $0x36c] ss:$16 sps:$4 sm:$0xff]   ;;  %v13493_v5 = vld [vmem:[#allocation12 + $0x964] ss:$16 sps:$4 sm:$0xff]  }
 0x63b   : > { %9118 = vmatprep.subr.bf16.mxu0 %v13412_v33  ;;  %v13488_v33 = vld [vmem:[#allocation12 + $0x368] ss:$16 sps:$4 sm:$0xff]  }
 0x63d   : > { %9078 = vmatpush1.bf16.msra.mxu1 %v13407_v18  ;;  %v13491_v18 = vld [vmem:[#allocation12 + $0x960] ss:$16 sps:$4 sm:$0xff]  }
 0x63e   : > { %9119 = vmatpush1.bf16.msra.mxu0 %v13410_v55  ;;  %9079 = vmatprep.subr.bf16.mxu1 %v13415_v7  ;;  %v13496_v55 = vld [vmem:[#allocation12 + $0x38c] ss:$16 sps:$4 sm:$0xff]   ;;  %v13499_v7 = vld [vmem:[#allocation12 + $0x984] ss:$16 sps:$4 sm:$0xff]  }
 0x63f   : > { %9120 = vmatprep.subr.bf16.mxu0 %v13418_v28  ;;  %v13494_v28 = vld [vmem:[#allocation12 + $0x388] ss:$16 sps:$4 sm:$0xff]  }
 0x641   : > { %9080 = vmatpush1.bf16.msra.mxu1 %v13413_v24  ;;  %v13497_v24 = vld [vmem:[#allocation12 + $0x980] ss:$16 sps:$4 sm:$0xff]  }
 0x642   : > { %9121 = vmatpush1.bf16.msra.mxu0 %v13416_v62  ;;  %9131 = vmatprep.subr.bf16.mxu1 %v13421_v12  ;;  %v13502_v62 = vld [vmem:[#allocation12 + $0x3ac] ss:$16 sps:$4 sm:$0xff]   ;;  %v13505_v12 = vld [vmem:[#allocation12 + $0x9a4] ss:$16 sps:$4 sm:$0xff]  }
 0x643   : > { %9969 = vmatprep.subr.bf16.mxu0 %v13424_v25  ;;  %v13500_v25 = vld [vmem:[#allocation12 + $0x3a8] ss:$16 sps:$4 sm:$0xff]  }
 0x644   : > { %9082 = vmatmul.mubr.bf16.vlgmr.msra.gmra.mrb[72].mxu1 %v14573_v32 }
 0x645   : > { %9123 = vmatmul.mubr.bf16.vlgmr.msra.gmra.mrb[76].mxu0 %v14559_v19  ;;  %9132 = vmatpush1.bf16.msra.mxu1 %v13419_v30  ;;  %v13437_v19 = vld [vmem:[#allocation12 + $0x840] ss:$16 sps:$4 sm:$0xff]  }
 0x646   : > { %9163 = vmatprep.mubr.bf16.mxu1 %v14563_v21  ;;  %9970 = vmatpush1.bf16.msra.mxu0 %v13422_v8  ;;  %v13443_v21 = vld [vmem:[#allocation12 + $0x860] ss:$16 sps:$4 sm:$0xff]   ;;  %v13508_v8 = vld [vmem:[#allocation12 + $0x3cc] ss:$16 sps:$4 sm:$0xff]  }
 0x647   : > { %10001 = vmatprep.mubr.bf16.mxu0 %v9322_v34  ;;  %9133 = vmatprep.subr.bf16.mxu1 %v13430_v60  ;;  %v13503_v30 = vld [vmem:[#allocation12 + $0x9a0] ss:$16 sps:$4 sm:$0xff]   ;;  %v13511_v60 = vld [vmem:[#allocation12 + $0x9c4] ss:$16 sps:$4 sm:$0xff]  }
 0x648   : > { %9971 = vmatprep.subr.bf16.mxu0 %v13433_v3  ;;  %v13506_v3 = vld [vmem:[#allocation12 + $0x3c8] ss:$16 sps:$4 sm:$0xff]  }
 0x649   : > { %9134 = vmatpush1.bf16.msra.mxu1 %v13428_v15  ;;  %v13509_v15 = vld [vmem:[#allocation12 + $0x9c0] ss:$16 sps:$4 sm:$0xff]  }
 0x64a   : > { %9972 = vmatpush1.bf16.msra.mxu0 %v13431_v17  ;;  %9135 = vmatprep.subr.bf16.mxu1 %v13436_v42  ;;  %v13514_v17 = vld [vmem:[#allocation12 + $0x3ec] ss:$16 sps:$4 sm:$0xff]   ;;  %v13517_v42 = vld [vmem:[#allocation12 + $0x9e4] ss:$16 sps:$4 sm:$0xff]  }
 0x64b   : > { %9973 = vmatprep.subr.bf16.mxu0 %v13439_v38  ;;  %v13512_v38 = vld [vmem:[#allocation12 + $0x3e8] ss:$16 sps:$4 sm:$0xff]  }
 0x64d   : > { %9136 = vmatpush1.bf16.msra.mxu1 %v13434_v13  ;;  %v13515_v13 = vld [vmem:[#allocation12 + $0x9e0] ss:$16 sps:$4 sm:$0xff]  }
 0x64e   : > { %9974 = vmatpush1.bf16.msra.mxu0 %v13437_v19  ;;  %9137 = vmatprep.subr.bf16.mxu1 %v13442_v40  ;;  %v13520_v19 = vld [vmem:[#allocation12 + $0xa04] ss:$16 sps:$4 sm:$0xff]   ;;  %v14585_v40 = vld [vmem:[#allocation3] ss:$16 sps:$4 sm:$0x78]  }
 0x64f   : > { %9975 = vmatprep.subr.bf16.mxu0 %v13445_v44  ;;  %v13523_v44 = vld [vmem:[#allocation12 + $0x80c] ss:$16 sps:$4 sm:$0xff]  }
 0x651   : > { %9138 = vmatpush1.bf16.msra.mxu1 %v13440_v29  ;;  %v14587_v29 = vld [vmem:[#allocation3 + $0xc] ss:$16 sps:$4 sm:$0x78]  }
 0x652   : > { %9976 = vmatpush1.bf16.msra.mxu0 %v13443_v21  ;;  %9139 = vmatprep.subr.bf16.mxu1 %v13448_v46  ;;  %v13518_v21 = vld [vmem:[#allocation12 + $0xa00] ss:$16 sps:$4 sm:$0xff]   ;;  %v13521_v46 = vld [vmem:[#allocation12 + $0x808] ss:$16 sps:$4 sm:$0xff]  }
 0x653   : > { %9977 = vmatprep.subr.bf16.mxu0 %v13451_v39  ;;  %v9321_v39 = vrot.slane %v14585_v40, 3  ;;  %v13634_v40 = vld [vmem:[#allocation12 + $0xaac] ss:$16 sps:$4 sm:$0xff]  }
 0x655   : > { %9140 = vmatpush1.bf16.msra.mxu1 %v13446_v10  ;;  %v13529_v10 = vld [vmem:[#allocation12 + $0xa24] ss:$16 sps:$4 sm:$0xff]  }
 0x656   : > { %9978 = vmatpush1.bf16.msra.mxu0 %v13449_v1  ;;  %9141 = vmatprep.subr.bf16.mxu1 %v13454_v14  ;;  %v9324_v1 = vrot.slane %v14587_v29, 3  ;;  %v13532_v14 = vld [vmem:[#allocation12 + $0x82c] ss:$16 sps:$4 sm:$0xff]  }
 0x657   : > { %v14581_v16 = vpop.f32.mrb[64].mxu0  ;;  %9979 = vmatprep.subr.bf16.mxu0 %v13457_v43  ;;  %v13527_v43 = vld [vmem:[#allocation12 + $0xa20] ss:$16 sps:$4 sm:$0xff]  }
 0x658   : > { %v14583_v51 = vpop.f32.mrb[65].mxu0 }
 0x659   : > { %9142 = vmatpush1.bf16.msra.mxu1 %v13452_v45  ;;  %v8228_v53 = vpop.f32.mrb[66].mxu0  ;;  %v13530_v45 = vld [vmem:[#allocation12 + $0x828] ss:$16 sps:$4 sm:$0xff]  }
 0x65a   : > { %9980 = vmatpush1.bf16.msra.mxu0 %v13455_v6  ;;  %v8229_v52 = vpop.f32.mrb[67].mxu0  ;;  %9143 = vmatprep.subr.bf16.mxu1 %v13460_v49  ;;  %v13535_v6 = vld [vmem:[#allocation12 + $0xa44] ss:$16 sps:$4 sm:$0xff]   ;;  %v13538_v49 = vld [vmem:[#allocation12 + $0x84c] ss:$16 sps:$4 sm:$0xff]  }
 0x65b   : > { %9981 = vmatprep.subr.bf16.mxu0 %v13463_v47  ;;  %v13536_v47 = vld [vmem:[#allocation12 + $0x848] ss:$16 sps:$4 sm:$0xff]   ;;  %v13541_v53 = vld [vmem:[#allocation12 + $0xa64] ss:$16 sps:$4 sm:$0xff]   ;;  %v13539_v52 = vld [vmem:[#allocation12 + $0xa60] ss:$16 sps:$4 sm:$0xff]  }
 0x65d   : > { %9144 = vmatpush1.bf16.msra.mxu1 %v13458_v54  ;;  %v13544_v54 = vld [vmem:[#allocation12 + $0x86c] ss:$16 sps:$4 sm:$0xff]  }
 0x65e   : > { %9982 = vmatpush1.bf16.msra.mxu0 %v13461_v56  ;;  %9145 = vmatprep.subr.bf16.mxu1 %v13466_v9  ;;  %v13542_v56 = vld [vmem:[#allocation12 + $0x868] ss:$16 sps:$4 sm:$0xff]   ;;  %v13547_v9 = vld [vmem:[#allocation12 + $0xa84] ss:$16 sps:$4 sm:$0xff]  }
 0x65f   : > { %9983 = vmatprep.subr.bf16.mxu0 %v13469_v57  ;;  %v13548_v57 = vld [vmem:[#allocation12 + $0x888] ss:$16 sps:$4 sm:$0xff]  }
 0x661   : > { %9146 = vmatpush1.bf16.msra.mxu1 %v13464_v61  ;;  %v13553_v61 = vld [vmem:[#allocation12 + $0xaa4] ss:$16 sps:$4 sm:$0xff]  }
 0x662   : > { %9984 = vmatpush1.bf16.msra.mxu0 %v13467_v63  ;;  %9147 = vmatprep.subr.bf16.mxu1 %v13472_v2  ;;  %v13556_v63 = vld [vmem:[#allocation12 + $0x8ac] ss:$16 sps:$4 sm:$0xff]   ;;  %v13551_v2 = vld [vmem:[#allocation12 + $0xaa0] ss:$16 sps:$4 sm:$0xff]  }
 0x663   : > { %9985 = vmatprep.subr.bf16.mxu0 %v13475_v50  ;;  %v13554_v50 = vld [vmem:[#allocation12 + $0x8a8] ss:$16 sps:$4 sm:$0xff]  }
 0x665   : > { %9148 = vmatpush1.bf16.msra.mxu1 %v13470_v36  ;;  %v13559_v36 = vld [vmem:[#allocation12 + $0xac4] ss:$16 sps:$4 sm:$0xff]  }
 0x666   : > { %9986 = vmatpush1.bf16.msra.mxu0 %v13473_v22  ;;  %9149 = vmatprep.subr.bf16.mxu1 %v13478_v31 }
 0x667   : > { %9987 = vmatprep.subr.bf16.mxu0 %v13481_v37  ;;  %v13562_v37 = vld [vmem:[#allocation12 + $0x8cc] ss:$16 sps:$4 sm:$0xff]  }
 0x669   : > { %9150 = vmatpush1.bf16.msra.mxu1 %v13476_v4 }
 0x66a   : > { %9988 = vmatpush1.bf16.msra.mxu0 %v13479_v41  ;;  %9151 = vmatprep.subr.bf16.mxu1 %v13484_v11 }
 0x66b   : > { %9989 = vmatprep.subr.bf16.mxu0 %v13487_v48 }
 0x66d   : > { %9152 = vmatpush1.bf16.msra.mxu1 %v13482_v23 }
 0x66e   : > { %9990 = vmatpush1.bf16.msra.mxu0 %v13485_v26  ;;  %9153 = vmatprep.subr.bf16.mxu1 %v13490_v20  ;;  %v13557_v20 = vld [vmem:[#allocation12 + $0xac0] ss:$16 sps:$4 sm:$0xff]  }
 0x66f   : > { %9991 = vmatprep.subr.bf16.mxu0 %v13493_v5 }
 0x671   : > { %9154 = vmatpush1.bf16.msra.mxu1 %v13488_v33 }
 0x672   : > { %9992 = vmatpush1.bf16.msra.mxu0 %v13491_v18  ;;  %9155 = vmatprep.subr.bf16.mxu1 %v13496_v55  ;;  %v13560_v18 = vld [vmem:[#allocation12 + $0x8c8] ss:$16 sps:$4 sm:$0xff]   ;;  %v13565_v55 = vld [vmem:[#allocation12 + $0xae4] ss:$16 sps:$4 sm:$0xff]  }
 0x673   : > { %9993 = vmatprep.subr.bf16.mxu0 %v13499_v7  ;;  %v13568_v7 = vld [vmem:[#allocation12 + $0x8ec] ss:$16 sps:$4 sm:$0xff]  }
 0x675   : > { %9156 = vmatpush1.bf16.msra.mxu1 %v13494_v28  ;;  %v13566_v28 = vld [vmem:[#allocation12 + $0x8e8] ss:$16 sps:$4 sm:$0xff]  }
 0x676   : > { %9994 = vmatpush1.bf16.msra.mxu0 %v13497_v24  ;;  %9157 = vmatprep.subr.bf16.mxu1 %v13502_v62  ;;  %v13571_v24 = vld [vmem:[#allocation12 + $0xb04] ss:$16 sps:$4 sm:$0xff]   ;;  %v13569_v62 = vld [vmem:[#allocation12 + $0xb00] ss:$16 sps:$4 sm:$0xff]  }
 0x677   : > { %9995 = vmatprep.subr.bf16.mxu0 %v13505_v12  ;;  %v13572_v12 = vld [vmem:[#allocation12 + $0x908] ss:$16 sps:$4 sm:$0xff]  }
 0x679   : > { %9158 = vmatpush1.bf16.msra.mxu1 %v13500_v25  ;;  %v13577_v25 = vld [vmem:[#allocation12 + $0xb24] ss:$16 sps:$4 sm:$0xff]  }
 0x67a   : > { %9996 = vmatpush1.bf16.msra.mxu0 %v13503_v30  ;;  %9159 = vmatprep.subr.bf16.mxu1 %v13508_v8  ;;  %v13580_v30 = vld [vmem:[#allocation12 + $0x92c] ss:$16 sps:$4 sm:$0xff]   ;;  %v13575_v8 = vld [vmem:[#allocation12 + $0xb20] ss:$16 sps:$4 sm:$0xff]  }
 0x67b   : > { %9997 = vmatprep.subr.bf16.mxu0 %v13511_v60  ;;  %v13578_v60 = vld [vmem:[#allocation12 + $0x928] ss:$16 sps:$4 sm:$0xff]  }
 0x67d   : > { %9160 = vmatpush1.bf16.msra.mxu1 %v13506_v3  ;;  %v13583_v3 = vld [vmem:[#allocation12 + $0xb44] ss:$16 sps:$4 sm:$0xff]  }
 0x67e   : > { %9998 = vmatpush1.bf16.msra.mxu0 %v13509_v15  ;;  %9161 = vmatprep.subr.bf16.mxu1 %v13514_v17  ;;  %v13586_v15 = vld [vmem:[#allocation12 + $0x94c] ss:$16 sps:$4 sm:$0xff]   ;;  %v13581_v17 = vld [vmem:[#allocation12 + $0xb40] ss:$16 sps:$4 sm:$0xff]  }
 0x67f   : > { %9999 = vmatprep.subr.bf16.mxu0 %v13517_v42  ;;  %v13584_v42 = vld [vmem:[#allocation12 + $0x948] ss:$16 sps:$4 sm:$0xff]  }
 0x681   : > { %9162 = vmatpush1.bf16.msra.mxu1 %v13512_v38  ;;  %v13589_v38 = vld [vmem:[#allocation12 + $0xb64] ss:$16 sps:$4 sm:$0xff]  }
 0x682   : > { %10000 = vmatpush1.bf16.msra.mxu0 %v13515_v13  ;;  %10010 = vmatprep.subr.bf16.mxu1 %v13520_v19  ;;  %v13592_v13 = vld [vmem:[#allocation12 + $0x96c] ss:$16 sps:$4 sm:$0xff]   ;;  %v13587_v19 = vld [vmem:[#allocation12 + $0xb60] ss:$16 sps:$4 sm:$0xff]  }
 0x683   : > { %10051 = vmatprep.subr.bf16.mxu0 %v13523_v44  ;;  %v13590_v44 = vld [vmem:[#allocation12 + $0x968] ss:$16 sps:$4 sm:$0xff]  }
 0x684   : > { %9164 = vmatmul.mubr.bf16.vlgmr.msra.gmra.mrb[76].mxu1 %v14573_v32  ;;  %v13533_v32 = vld [vmem:[#allocation12 + $0xa40] ss:$16 sps:$4 sm:$0xff]  }
 0x685   : > { %10002 = vmatmul.mubr.bf16.vlgmr.msra.gmra.mrb[80].mxu0 %v9321_v39  ;;  %10011 = vmatpush1.bf16.msra.mxu1 %v13518_v21  ;;  %v13595_v21 = vld [vmem:[#allocation12 + $0xb84] ss:$16 sps:$4 sm:$0xff]  }
 0x686   : > { %10042 = vmatprep.mubr.bf16.mxu1 %v9324_v1  ;;  %10052 = vmatpush1.bf16.msra.mxu0 %v13521_v46  ;;  %v13598_v46 = vld [vmem:[#allocation12 + $0x98c] ss:$16 sps:$4 sm:$0xff]  }
 0x687   : > { %10083 = vmatprep.mubr.bf16.mxu0 %v9322_v34  ;;  %10012 = vmatprep.subr.bf16.mxu1 %v13529_v10  ;;  %v13545_v34 = vld [vmem:[#allocation12 + $0xa80] ss:$16 sps:$4 sm:$0xff]  }
 0x688   : > { %10053 = vmatprep.subr.bf16.mxu0 %v13532_v14  ;;  %v13593_v10 = vld [vmem:[#allocation12 + $0xb80] ss:$16 sps:$4 sm:$0xff]   ;;  %v13596_v14 = vld [vmem:[#allocation12 + $0x988] ss:$16 sps:$4 sm:$0xff]  }
 0x689   : > { %10013 = vmatpush1.bf16.msra.mxu1 %v13527_v43  ;;  %v13601_v43 = vld [vmem:[#allocation12 + $0xba4] ss:$16 sps:$4 sm:$0xff]  }
 0x68a   : > { %10054 = vmatpush1.bf16.msra.mxu0 %v13530_v45  ;;  %10014 = vmatprep.subr.bf16.mxu1 %v13535_v6  ;;  %v13604_v45 = vld [vmem:[#allocation12 + $0x9ac] ss:$16 sps:$4 sm:$0xff]   ;;  %v13599_v6 = vld [vmem:[#allocation12 + $0xba0] ss:$16 sps:$4 sm:$0xff]  }
 0x68b   : > { %10055 = vmatprep.subr.bf16.mxu0 %v13538_v49  ;;  %v13602_v49 = vld [vmem:[#allocation12 + $0x9a8] ss:$16 sps:$4 sm:$0xff]  }
 0x68d   : > { %10015 = vmatpush1.bf16.msra.mxu1 %v13533_v32  ;;  %v13607_v32 = vld [vmem:[#allocation12 + $0xbc4] ss:$16 sps:$4 sm:$0xff]  }
 0x68e   : > { %10056 = vmatpush1.bf16.msra.mxu0 %v13536_v47  ;;  %10016 = vmatprep.subr.bf16.mxu1 %v13541_v53  ;;  %v13610_v47 = vld [vmem:[#allocation12 + $0x9cc] ss:$16 sps:$4 sm:$0xff]   ;;  %v13605_v53 = vld [vmem:[#allocation12 + $0xbc0] ss:$16 sps:$4 sm:$0xff]  }
 0x68f   : > { %10057 = vmatprep.subr.bf16.mxu0 %v13544_v54  ;;  %v13608_v54 = vld [vmem:[#allocation12 + $0x9c8] ss:$16 sps:$4 sm:$0xff]  }
 0x691   : > { %10017 = vmatpush1.bf16.msra.mxu1 %v13539_v52  ;;  %v13613_v52 = vld [vmem:[#allocation12 + $0xbe4] ss:$16 sps:$4 sm:$0xff]  }
 0x692   : > { %10058 = vmatpush1.bf16.msra.mxu0 %v13542_v56  ;;  %10018 = vmatprep.subr.bf16.mxu1 %v13547_v9  ;;  %v13616_v56 = vld [vmem:[#allocation12 + $0x9ec] ss:$16 sps:$4 sm:$0xff]   ;;  %v14608_v9 = vld [vmem:[#allocation3 + $0x8] ss:$16 sps:$4 sm:$0x78]  }
 0x693   : > { %10059 = vmatprep.subr.bf16.mxu0 %v13550_v35  ;;  %v13611_v35 = vld [vmem:[#allocation12 + $0xbe0] ss:$16 sps:$4 sm:$0xff]  }
 0x695   : > { %10019 = vmatpush1.bf16.msra.mxu1 %v13545_v34  ;;  %v13614_v34 = vld [vmem:[#allocation12 + $0x9e8] ss:$16 sps:$4 sm:$0xff]  }
 0x696   : > { %10060 = vmatpush1.bf16.msra.mxu0 %v13548_v57  ;;  %10020 = vmatprep.subr.bf16.mxu1 %v13553_v61  ;;  %v13619_v57 = vld [vmem:[#allocation12 + $0xa0c] ss:$16 sps:$4 sm:$0xff]   ;;  %v13617_v61 = vld [vmem:[#allocation12 + $0xa08] ss:$16 sps:$4 sm:$0xff]  }
 0x697   : > { %v14598_v22 = vpop.f32.mrb[68].mxu0  ;;  %v8265_v31 = vpop.f32.mrb[64].mxu1  ;;  %10061 = vmatprep.subr.bf16.mxu0 %v13556_v63  ;;  %v9323_v63 = vrot.slane %v14608_v9, 3 }
 0x698   : > { %v14601_v4 = vadd.f32 %v8265_v31, %v14581_v16  ;;  %v14603_v41 = vpop.f32.mrb[69].mxu0  ;;  %v8267_v11 = vpop.f32.mrb[65].mxu1  ;;  %v13563_v16 = vld [vmem:[#allocation12 + $0xae0] ss:$16 sps:$4 sm:$0xff]   ;;  %v13623_v31 = vld [vmem:[#allocation12 + $0xa48] ss:$16 sps:$4 sm:$0xff]  }
 0x699   : > { %v14606_v48 = vadd.f32 %v8267_v11, %v14583_v51  ;;  %v8310_v23 = vpop.f32.mrb[70].mxu0  ;;  %10021 = vmatpush1.bf16.msra.mxu1 %v13551_v2  ;;  %v8269_v26 = vpop.f32.mrb[66].mxu1  ;;  %v13574_v51 = vld [vmem:[#allocation12 + $0x90c] ss:$16 sps:$4 sm:$0xff]   ;;  %v13626_v11 = vld [vmem:[#allocation12 + $0xa68] ss:$16 sps:$4 sm:$0xff]  }
 0x69a   : > { %10062 = vmatpush1.bf16.msra.mxu0 %v13554_v50  ;;  %v8311_v5 = vpop.f32.mrb[71].mxu0  ;;  %v8270_v33 = vpop.f32.mrb[67].mxu1  ;;  %10022 = vmatprep.subr.bf16.mxu1 %v13559_v36  ;;  %v13622_v2 = vld [vmem:[#allocation12 + $0xa2c] ss:$16 sps:$4 sm:$0xff]   ;;  %v13620_v50 = vld [vmem:[#allocation12 + $0xa28] ss:$16 sps:$4 sm:$0xff]  }
 0x69b   : > { %10063 = vmatprep.subr.bf16.mxu0 %v13562_v37  ;;  %v13625_v36 = vld [vmem:[#allocation12 + $0xa4c] ss:$16 sps:$4 sm:$0xff]   ;;  %v13629_v26 = vld [vmem:[#allocation12 + $0xa88] ss:$16 sps:$4 sm:$0xff]  }
 0x69c   : > { %v13628_v37 = vld [vmem:[#allocation12 + $0xa6c] ss:$16 sps:$4 sm:$0xff]  }
 0x69d   : > { %10023 = vmatpush1.bf16.msra.mxu1 %v13557_v20  ;;  %v13631_v23 = vld [vmem:[#allocation12 + $0xa8c] ss:$16 sps:$4 sm:$0xff]  }
 0x69e   : > { %10064 = vmatpush1.bf16.msra.mxu0 %v13560_v18  ;;  %10024 = vmatprep.subr.bf16.mxu1 %v13565_v55  ;;  %v13637_v20 = vld [vmem:[#allocation12 + $0xacc] ss:$16 sps:$4 sm:$0xff]  }
 0x69f   : > { %10065 = vmatprep.subr.bf16.mxu0 %v13568_v7 }
 0x6a1   : > { %10025 = vmatpush1.bf16.msra.mxu1 %v13563_v16 }
 0x6a2   : > { %10066 = vmatpush1.bf16.msra.mxu0 %v13566_v28  ;;  %10026 = vmatprep.subr.bf16.mxu1 %v13571_v24 }
 0x6a3   : > { %10067 = vmatprep.subr.bf16.mxu0 %v13574_v51  ;;  %v13635_v51 = vld [vmem:[#allocation12 + $0xac8] ss:$16 sps:$4 sm:$0xff]  }
 0x6a5   : > { %10027 = vmatpush1.bf16.msra.mxu1 %v13569_v62 }
 0x6a6   : > { %10068 = vmatpush1.bf16.msra.mxu0 %v13572_v12  ;;  %10028 = vmatprep.subr.bf16.mxu1 %v13577_v25  ;;  %v13640_v25 = vld [vmem:[#allocation12 + $0xaec] ss:$16 sps:$4 sm:$0xff]  }
 0x6a7   : > { %10069 = vmatprep.subr.bf16.mxu0 %v13580_v30  ;;  %v13638_v30 = vld [vmem:[#allocation12 + $0xae8] ss:$16 sps:$4 sm:$0xff]  }
 0x6a9   : > { %10029 = vmatpush1.bf16.msra.mxu1 %v13575_v8  ;;  %v13646_v8 = vld [vmem:[#allocation12 + $0xb2c] ss:$16 sps:$4 sm:$0xff]  }
 0x6aa   : > { %10070 = vmatpush1.bf16.msra.mxu0 %v13578_v60  ;;  %10030 = vmatprep.subr.bf16.mxu1 %v13583_v3  ;;  %v13647_v60 = vld [vmem:[#allocation12 + $0xb48] ss:$16 sps:$4 sm:$0xff]   ;;  %v13652_v3 = vld [vmem:[#allocation12 + $0xb6c] ss:$16 sps:$4 sm:$0xff]  }
 0x6ab   : > { %10071 = vmatprep.subr.bf16.mxu0 %v13586_v15  ;;  %v13650_v15 = vld [vmem:[#allocation12 + $0xb68] ss:$16 sps:$4 sm:$0xff]  }
 0x6ad   : > { %10031 = vmatpush1.bf16.msra.mxu1 %v13581_v17  ;;  %v13655_v17 = vld [vmem:[#allocation12 + $0xb8c] ss:$16 sps:$4 sm:$0xff]  }
 0x6ae   : > { %10072 = vmatpush1.bf16.msra.mxu0 %v13584_v42  ;;  %10032 = vmatprep.subr.bf16.mxu1 %v13589_v38  ;;  %v13653_v42 = vld [vmem:[#allocation12 + $0xb88] ss:$16 sps:$4 sm:$0xff]   ;;  %v13658_v38 = vld [vmem:[#allocation12 + $0xbac] ss:$16 sps:$4 sm:$0xff]  }
 0x6af   : > { %10073 = vmatprep.subr.bf16.mxu0 %v13592_v13  ;;  %v13656_v13 = vld [vmem:[#allocation12 + $0xba8] ss:$16 sps:$4 sm:$0xff]  }
 0x6b1   : > { %10033 = vmatpush1.bf16.msra.mxu1 %v13587_v19  ;;  %v13661_v19 = vld [vmem:[#allocation12 + $0xbcc] ss:$16 sps:$4 sm:$0xff]  }
 0x6b2   : > { %10074 = vmatpush1.bf16.msra.mxu0 %v13590_v44  ;;  %10034 = vmatprep.subr.bf16.mxu1 %v13595_v21  ;;  %v13659_v44 = vld [vmem:[#allocation12 + $0xbc8] ss:$16 sps:$4 sm:$0xff]   ;;  %v13664_v21 = vld [vmem:[#allocation12 + $0xbec] ss:$16 sps:$4 sm:$0xff]  }
 0x6b3   : > { %10075 = vmatprep.subr.bf16.mxu0 %v13598_v46  ;;  %v13662_v46 = vld [vmem:[#allocation12 + $0xbe8] ss:$16 sps:$4 sm:$0xff]  }
 0x6b5   : > { %10035 = vmatpush1.bf16.msra.mxu1 %v13593_v10 }
 0x6b6   : > { %10076 = vmatpush1.bf16.msra.mxu0 %v13596_v14  ;;  %10036 = vmatprep.subr.bf16.mxu1 %v13601_v43 }
 0x6b7   : > { %10077 = vmatprep.subr.bf16.mxu0 %v13604_v45 }
 0x6b9   : > { %10037 = vmatpush1.bf16.msra.mxu1 %v13599_v6 }
 0x6ba   : > { %10078 = vmatpush1.bf16.msra.mxu0 %v13602_v49  ;;  %10038 = vmatprep.subr.bf16.mxu1 %v13607_v32 }
 0x6bb   : > { %10079 = vmatprep.subr.bf16.mxu0 %v13610_v47 }
 0x6bd   : > { %10039 = vmatpush1.bf16.msra.mxu1 %v13605_v53 }
 0x6be   : > { %10080 = vmatpush1.bf16.msra.mxu0 %v13608_v54  ;;  %10040 = vmatprep.subr.bf16.mxu1 %v13613_v52 }
 0x6bf   : > { %10081 = vmatprep.subr.bf16.mxu0 %v13616_v56 }
 0x6c1   : > { %10041 = vmatpush1.bf16.msra.mxu1 %v13611_v35 }
 0x6c2   : > { %10082 = vmatpush1.bf16.msra.mxu0 %v13614_v34  ;;  %10092 = vmatprep.subr.bf16.mxu1 %v13619_v57 }
 0x6c4   : > { %10043 = vmatmul.mubr.bf16.vlgmr.msra.gmra.mrb[80].mxu1 %v9323_v63 }
 0x6c5   : > { %10084 = vmatmul.mubr.bf16.vlgmr.msra.gmra.mrb[84].mxu0 %v9321_v39  ;;  %10093 = vmatpush1.bf16.msra.mxu1 %v13617_v61  ;;  %v13632_v39 = vld [vmem:[#allocation12 + $0xaa8] ss:$16 sps:$4 sm:$0xff]  }
 0x6c6   : > { %10124 = vmatprep.mubr.bf16.mxu1 %v9324_v1  ;;  %10094 = vmatprep.subr.bf16.mxu1 %v13622_v2 }
 0x6c9   : > { %10095 = vmatpush1.bf16.msra.mxu1 %v13620_v50 }
 0x6ca   : > { %10096 = vmatprep.subr.bf16.mxu1 %v13625_v36 }
 0x6cd   : > { %10097 = vmatpush1.bf16.msra.mxu1 %v13623_v31 }
 0x6ce   : > { %10098 = vmatprep.subr.bf16.mxu1 %v13628_v37  ;;  %v10137_v37 = vld [vmem:[#allocation13] sm:$0xf] }
 0x6d1   : > { %10099 = vmatpush1.bf16.msra.mxu1 %v13626_v11 }
 0x6d2   : > { %10100 = vmatprep.subr.bf16.mxu1 %v13631_v23 }
 0x6d5   : > { %10101 = vmatpush1.bf16.msra.mxu1 %v13629_v26  ;;  %v10142_v26 = vrot.slane %v10137_v37, %v14374_v0 }
 0x6d6   : > { %10102 = vmatprep.subr.bf16.mxu1 %v13634_v40 }
 0x6d7   : > { %v8347_v29 = vpop.f32.mrb[68].mxu1  ;;  %v9042_v1 = vpop.f32.mrb[72].mxu0 }
 0x6d8   : > { %v8348_v5 = vadd.f32 %v8347_v29, %v14598_v22  ;;  %v9043_v33 = vadd.f32 %v9042_v1, %v14601_v4  ;;  %v8349_v18 = vpop.f32.mrb[69].mxu1  ;;  %v9044_v55 = vpop.f32.mrb[73].mxu0  ;;  %v13643_v22 = vld [vmem:[#allocation12 + $0xb0c] ss:$16 sps:$4 sm:$0xff]   ;;  %v13641_v4 = vld [vmem:[#allocation12 + $0xb08] ss:$16 sps:$4 sm:$0xff]   ;;  %v10146_v29 = vrot.slane %v10137_v37, %v14376_v27 }
 0x6d9   : > { %v8350_v7 = vadd.f32 %v8349_v18, %v14603_v41  ;;  %v9045_v16 = vadd.f32 %v9044_v55, %v14606_v48  ;;  %v8351_v28 = vpop.f32.mrb[70].mxu1  ;;  %v9046_v24 = vpop.f32.mrb[74].mxu0  ;;  %10103 = vmatpush1.bf16.msra.mxu1 %v13632_v39  ;;  %v13644_v41 = vld [vmem:[#allocation12 + $0xb28] ss:$16 sps:$4 sm:$0xff]   ;;  %v13649_v48 = vld [vmem:[#allocation12 + $0xb4c] ss:$16 sps:$4 sm:$0xff]  }
 0x6da   : > { %v8352_v62 = vpop.f32.mrb[71].mxu1  ;;  %v9047_v12 = vpop.f32.mrb[75].mxu0  ;;  %10104 = vmatprep.subr.bf16.mxu1 %v13637_v20 }
 0x6dd   : > { %10105 = vmatpush1.bf16.msra.mxu1 %v13635_v51 }
 0x6de   : > { %10106 = vmatprep.subr.bf16.mxu1 %v13640_v25  ;;  %v10150_v25 = vrot.slane %v10137_v37, %v14385_v58 }
 0x6e1   : > { %10107 = vmatpush1.bf16.msra.mxu1 %v13638_v30 }
 0x6e2   : > { %10108 = vmatprep.subr.bf16.mxu1 %v13643_v22 }
 0x6e5   : > { %10109 = vmatpush1.bf16.msra.mxu1 %v13641_v4  ;;  %v10154_v4 = vrot.slane %v10137_v37, %v14387_v59 }
 0x6e6   : > { %10110 = vmatprep.subr.bf16.mxu1 %v13646_v8 }
 0x6e9   : > { %10111 = vmatpush1.bf16.msra.mxu1 %v13644_v41 }
 0x6ea   : > { %10112 = vmatprep.subr.bf16.mxu1 %v13649_v48 }
 0x6ed   : > { %10113 = vmatpush1.bf16.msra.mxu1 %v13647_v60 }
 0x6ee   : > { %10114 = vmatprep.subr.bf16.mxu1 %v13652_v3 }
 0x6f1   : > { %10115 = vmatpush1.bf16.msra.mxu1 %v13650_v15 }
 0x6f2   : > { %10116 = vmatprep.subr.bf16.mxu1 %v13655_v17 }
 0x6f5   : > { %10117 = vmatpush1.bf16.msra.mxu1 %v13653_v42 }
 0x6f6   : > { %10118 = vmatprep.subr.bf16.mxu1 %v13658_v38 }
 0x6f9   : > { %10119 = vmatpush1.bf16.msra.mxu1 %v13656_v13 }
 0x6fa   : > { %10120 = vmatprep.subr.bf16.mxu1 %v13661_v19 }
 0x6fd   : > { %10121 = vmatpush1.bf16.msra.mxu1 %v13659_v44 }
 0x6fe   : > { %10122 = vmatprep.subr.bf16.mxu1 %v13664_v21 }
 0x701   : > { %10123 = vmatpush1.bf16.msra.mxu1 %v13662_v46 }
 0x704   : > { %10125 = vmatmul.mubr.bf16.vlgmr.msra.gmra.mrb[84].mxu1 %v9323_v63 }
 0x717   : > { %v9083_v10 = vpop.f32.mrb[72].mxu1 }
 0x718   : > { %v9084_v14 = vadd.f32 %v9083_v10, %v9043_v33  ;;  %v9124_v43 = vpop.f32.mrb[76].mxu0  ;;  %v9085_v45 = vpop.f32.mrb[73].mxu1 }
 0x719   : > { %v9125_v6 = vadd.f32 %v9124_v43, %v8348_v5  ;;  %v9086_v49 = vadd.f32 %v9085_v45, %v9045_v16  ;;  %v9126_v32 = vpop.f32.mrb[77].mxu0  ;;  %v9087_v47 = vpop.f32.mrb[74].mxu1 }
 0x71a   : > { %v9127_v53 = vadd.f32 %v9126_v32, %v8350_v7  ;;  %v9128_v54 = vpop.f32.mrb[78].mxu0  ;;  %v9088_v52 = vpop.f32.mrb[75].mxu1 }
 0x71b   : > { %v9129_v56 = vpop.f32.mrb[79].mxu0 }
 0x757   : > { %v9165_v35 = vpop.f32.mrb[76].mxu1 }
 0x758   : > { %v9166_v34 = vadd.f32 %v9165_v35, %v9125_v6  ;;  %v10003_v57 = vpop.f32.mrb[80].mxu0  ;;  %v9167_v61 = vpop.f32.mrb[77].mxu1 }
 0x759   : > { %v9168_v2 = vadd.f32 %v9167_v61, %v9127_v53  ;;  %v10005_v50 = vpop.f32.mrb[81].mxu0  ;;  %v9169_v9 = vpop.f32.mrb[78].mxu1 }
 0x75a   : > { %v10007_v63 = vpop.f32.mrb[82].mxu0  ;;  %v9170_v36 = vpop.f32.mrb[79].mxu1 }
 0x75b   : > { %v10008_v31 = vpop.f32.mrb[83].mxu0 }
 0x797   : > { %v10044_v11 = vpop.f32.mrb[80].mxu1 }
 0x798   : > { %v10045_v23 = vadd.f32 %v10044_v11, %v10003_v57  ;;  %v10085_v40 = vpop.f32.mrb[84].mxu0  ;;  %v10046_v39 = vpop.f32.mrb[81].mxu1 }
 0x799   : > { %v10047_v20 = vadd.f32 %v10046_v39, %v10005_v50  ;;  %v10087_v1 = vpop.f32.mrb[85].mxu0  ;;  %v10048_v5 = vpop.f32.mrb[82].mxu1 }
 0x79a   : > { %v10133_v33 = vadd.f32 %v10045_v23, %v9084_v14  ;;  %v10089_v18 = vpop.f32.mrb[86].mxu0  ;;  %v10049_v55 = vpop.f32.mrb[83].mxu1 }
 0x79b   : > { %v10134_v7 = vadd.f32 %v10047_v20, %v9086_v49  ;;  %v10090_v16 = vpop.f32.mrb[87].mxu0 }
 0x79c   : > { %v10159_v28 = vadd.f32 %v10142_v26, %v10133_v33 }
 0x79d   : > { %v10160_v24 = vadd.f32 %v10146_v29, %v10134_v7 }
 0x79e   : > { %v10163_v51 = vmax.f32 %v10159_v28, 0.0 }
 0x79f   : > { %v10164_v62 = vmax.f32 %v10160_v24, 0.0 }
 0x7a1   : > { %v11639_v0 = vpack.c.bf16 %v10164_v62, %v10163_v51 }
 0x7a3   : > { %10183 = vst [vmem:[%s353_s20] sm:$0xff] %v11639_v0 }
 0x7d7   : > { %v10126_v12 = vpop.f32.mrb[84].mxu1 }
 0x7d8   : > { %v10127_v27 = vadd.f32 %v10126_v12, %v10085_v40  ;;  %v10128_v30 = vpop.f32.mrb[85].mxu1 }
 0x7d9   : > { %v10129_v22 = vadd.f32 %v10128_v30, %v10087_v1  ;;  %v10130_v8 = vpop.f32.mrb[86].mxu1 }
 0x7da   : > { %v10135_v41 = vadd.f32 %v10127_v27, %v9166_v34  ;;  %v10131_v48 = vpop.f32.mrb[87].mxu1 }
 0x7db   : > { %v10136_v60 = vadd.f32 %v10129_v22, %v9168_v2 }
 0x7dc   : > { %v10161_v3 = vadd.f32 %v10150_v25, %v10135_v41 }
 0x7dd   : > { %v10162_v15 = vadd.f32 %v10154_v4, %v10136_v60 }
 0x7de   : > { %v10165_v17 = vmax.f32 %v10161_v3, 0.0 }
 0x7df   : > { %v10166_v42 = vmax.f32 %v10162_v15, 0.0 }
 0x7e1   : > { %v11640_v38 = vpack.c.bf16 %v10166_v42, %v10165_v17 }
 0x7e3   : > { %10184 = vst [vmem:[%s353_s20 + $0x8] sm:$0xff] %v11640_v38 }
 0x7e4   : > { %13851 = shalt.err (!%p13848_p6)
}
 0x7e5   : > { %s13852_s10 = scalar_lea.hbm %s14634_s21, 256  ;;  %s13856_s18 = scalar_lea.hbm %s14685_s7, 512 }
 0x7e6   : > { %p13853_p5 = scmp.ne.s32.totalorder %s14634_s21, %s13852_s10  ;;  %p13857_p10 = scmp.lt.u32.totalorder %s14634_s21, %s14685_s7 }
 0x7e7   : > { %p13858_p2 = scmp.lt.u32.totalorder %s13856_s18, %s13852_s10  ;;  %p13860_p4 = scmp.lt.u32.totalorder %s13852_s10, %s14634_s21 }
 0x7e8   : > { %p13854_p9 = pnand %p13853_p5, %p14719_p7 }
 0x7e9   : > { %p13859_p3 = por %p13858_p2, %p13857_p10 }
 0x7ea   : > { %p13855_p12 = pneg %p13854_p9 }
 0x7eb   : > { %p13861_p8 = por %p13860_p4, %p13859_p3 }
 0x7ed   : > { %p13862_p11 = pnand %p13861_p8, %p13855_p12 }
 0x7ef   : > { %13865 = shalt.err (!%p13862_p11)
}
 0x7f0   : > { %11667 = dma.vmem_to_hbm [thread:$0]  (%p14719_p7), %s14636_s4, 256, %s14634_s21, %s10186_s22  }
 0x7f1 PF: > { %p11704_p13 = scmp.ge.s32.totalorder %s13916_s27, 2  ;;  %s10212_s19 = sand.u32 1, %s13904_s24  }
 0x7f2   : > { %p14720_p1 = scmp.ne.s32.totalorder %s14698_s12, 0  ;;  %s10213_s29 = scalar_lea.sflag [#allocation6], %s10212_s19 }
 0x7f4   : > { %p11689_p0 = pnand %p11704_p13, %p14720_p1 }
 0x7f6   : > { %13899 = dma.done.wait (!%p11689_p0), %s10213_s29, 256  }
 0x7f7   : > { %13901 = vsyncadd (!%p11689_p0), %s10213_s29, 4294967040  ;;  %s14721_s27 = sld [smem:[#allocation22_spill]]  ;;  %s14722_s17 = sld [smem:[#allocation21_spill]] }
 0x7f8   : > { %s14723_s26 = sld [smem:[#allocation23_spill]]  ;;  %s14724_s24 = smov %s13908_s25 }
 0x7fd   : > { %p21_p6 = scmp.ge.s32.totalorder %s14721_s27, 4   ;;  %s14725_s25 = smov %s14722_s17 }
 0x7ff   :  { %23 = sbr.rel (!%p21_p6) target bundleno = 10 (0xa), region = 116 }
 0x806   :  { %10218 = vsyncpa [#allocation5], 1 }
 0x807   :  { %10220 = vsyncpa [#allocation5 + $0x1], 1 }
 0x808   :  { %10221 = vsyncpa [#allocation8], 1 }
 0x809   :  { %10222 = vsyncpa [#allocation11], 1 }
 0x80a   :  { %10223 = vsyncpa [#allocation14], 1 }
 0x80b   :  { %10224 = vsyncpa [#allocation6], 1 }
 0x80c   :  { %10226 = vsyncpa [#allocation6 + $0x1], 1 }

</bundles_post_ra>
